<compile_context>
chip_gen: v7x
topology: tpu7x:2x2x1
jax: 0.10.0
libtpu: 0.0.40
codegen_flags: <defaults>
</compile_context>

<pallas_src>
import jax
import jax.numpy as jnp
from jax import lax
from jax.experimental import pallas as pl
from jax.experimental.pallas import tpu as pltpu


def _full_spec(shape):
    # full-array block at grid=(1,)
    return pl.BlockSpec(shape, lambda *_, n=len(shape): (0,) * n)


# -----------------------------------------------------------------------------
# Fused per-modality kernel: 2-layer bidirectional LSTM + LayerNorm, entire
# recurrence inside one kernel.
# -----------------------------------------------------------------------------
def _modality_kernel(lens_ref, x_ref,
                     wih1f_ref, wih1b_ref, whh1f_ref, whh1b_ref, b1f_ref, b1b_ref,
                     lng_ref, lnb_ref,
                     wih2f_ref, wih2b_ref, whh2f_ref, whh2b_ref, b2f_ref, b2b_ref,
                     out_ref,
                     h1f_scr, h1b_scr, h1n_scr):
    T, B, _ = x_ref.shape
    H = whh1f_ref.shape[0]

    lens = lens_ref[...]                      # (B, 1) int32, loaded once

    # hoist all (loop-invariant) weight loads out of the time loops
    wih1f = wih1f_ref[...]; wih1b = wih1b_ref[...]
    whh1f = whh1f_ref[...]; whh1b = whh1b_ref[...]
    b1f = b1f_ref[...]; b1b = b1b_ref[...]
    wih2f = wih2f_ref[...]; wih2b = wih2b_ref[...]
    whh2f = whh2f_ref[...]; whh2b = whh2b_ref[...]
    b2f = b2f_ref[...]; b2b = b2b_ref[...]

    def cell(x_t, h, c, wih, whh, b):
        # gates = x_t @ W_ih + h @ W_hh + (b_ih + b_hh)
        g = (jnp.dot(x_t, wih, preferred_element_type=jnp.float32)
             + jnp.dot(h, whh, preferred_element_type=jnp.float32) + b)
        i = jax.nn.sigmoid(g[:, 0 * H:1 * H])
        f = jax.nn.sigmoid(g[:, 1 * H:2 * H])
        gg = jnp.tanh(g[:, 2 * H:3 * H])
        o = jax.nn.sigmoid(g[:, 3 * H:4 * H])
        c_new = f * c + i * gg
        h_new = o * jnp.tanh(c_new)
        return h_new, c_new

    z = jnp.zeros((B, H), jnp.float32)

    # ---- layer 1: forward and backward directions share one time loop ------
    def body1(s, carry):
        hf, cf, hb, cb = carry
        tf = s
        tb = T - 1 - s
        mf = tf < lens                        # (B,1) bool: pack_padded mask
        mb = tb < lens
        hf_n, cf_n = cell(x_ref[tf], hf, cf, wih1f, whh1f, b1f)
        hb_n, cb_n = cell(x_ref[tb], hb, cb, wih1b, whh1b, b1b)
        hf = jnp.where(mf, hf_n, hf)
        cf = jnp.where(mf, cf_n, cf)
        hb = jnp.where(mb, hb_n, hb)
        cb = jnp.where(mb, cb_n, cb)
        h1f_scr[tf] = hf
        h1b_scr[tb] = hb
        return hf, cf, hb, cb

    h1f, _, h1b, _ = lax.fori_loop(0, T, body1, (z, z, z, z))

    # ---- LayerNorm over the whole (T,B,2H) slab, fused in-kernel ------------
    # Padded timesteps of the forward half hold the carried state instead of
    # torch's zero padding; those rows are masked out of layer 2's recurrence,
    # so the final hiddens (the only module outputs) are identical.
    h1 = jnp.concatenate([h1f_scr[...], h1b_scr[...]], axis=-1)     # (T,B,2H)
    mean = jnp.mean(h1, axis=-1, keepdims=True)
    var = jnp.mean(jnp.square(h1 - mean), axis=-1, keepdims=True)
    h1n_scr[...] = (h1 - mean) * lax.rsqrt(var + 1e-5) * lng_ref[...] + lnb_ref[...]

    # ---- layer 2: bidirectional, only final hiddens are needed --------------
    def body2(s, carry):
        hf, cf, hb, cb = carry
        tf = s
        tb = T - 1 - s
        mf = tf < lens
        mb = tb < lens
        hf_n, cf_n = cell(h1n_scr[tf], hf, cf, wih2f, whh2f, b2f)
        hb_n, cb_n = cell(h1n_scr[tb], hb, cb, wih2b, whh2b, b2b)
        hf = jnp.where(mf, hf_n, hf)
        cf = jnp.where(mf, cf_n, cf)
        hb = jnp.where(mb, hb_n, hb)
        cb = jnp.where(mb, cb_n, cb)
        return hf, cf, hb, cb

    h2f, _, h2b, _ = lax.fori_loop(0, T, body2, (z, z, z, z))

    # single lane-dense final store: [h1_fwd | h1_bwd | h2_fwd | h2_bwd]
    out_ref[...] = jnp.concatenate([h1f, h1b, h2f, h2b], axis=-1)


def modality_features(x, lens_col, p1, p2, ln_g, ln_b):
    # x: (T, B, I) -> (B, 4H) = [h1_fwd | h1_bwd | h2_fwd | h2_bwd]
    T, B, _ = x.shape
    H = p1["w_hh_f"].shape[0]
    G = 4 * H
    in_arrays = (
        lens_col, x,
        p1["w_ih_f"], p1["w_ih_b"], p1["w_hh_f"], p1["w_hh_b"],
        p1["b_f"].reshape(1, G), p1["b_b"].reshape(1, G),
        ln_g.reshape(1, 2 * H), ln_b.reshape(1, 2 * H),
        p2["w_ih_f"], p2["w_ih_b"], p2["w_hh_f"], p2["w_hh_b"],
        p2["b_f"].reshape(1, G), p2["b_b"].reshape(1, G),
    )
    return pl.pallas_call(
        _modality_kernel,
        out_shape=jax.ShapeDtypeStruct((B, 4 * H), jnp.float32),
        grid=(1,),
        in_specs=[_full_spec(a.shape) for a in in_arrays],
        out_specs=_full_spec((B, 4 * H)),
        scratch_shapes=[pltpu.VMEM((T, B, H), jnp.float32),      # layer-1 fwd h_seq
                        pltpu.VMEM((T, B, H), jnp.float32),      # layer-1 bwd h_seq
                        pltpu.VMEM((T, B, 2 * H), jnp.float32)], # LayerNorm'd h_seq
        compiler_params=pltpu.CompilerParams(
            dimension_semantics=("arbitrary",)),
    )(*in_arrays)


# -----------------------------------------------------------------------------
# Fused head kernel: fc1 -> dropout(identity, eval) -> relu -> fc2
# -----------------------------------------------------------------------------
def _head_kernel(h_ref, w1_ref, b1_ref, w2_ref, b2_ref, o_ref):
    # TODO(synk): training-mode dropout (bernoulli mask) not implemented.
    h = jnp.dot(h_ref[...], w1_ref[...],
                preferred_element_type=jnp.float32) + b1_ref[...]
    h = jnp.maximum(h, 0.0)
    o_ref[...] = jnp.dot(h, w2_ref[...],
                         preferred_element_type=jnp.float32) + b2_ref[...]


def head(h, w1, b1, w2, b2):
    B, _ = h.shape
    F1 = w1.shape[1]
    O = w2.shape[1]
    arrays = (h, w1, b1.reshape(1, F1), w2, b2.reshape(1, O))
    return pl.pallas_call(
        _head_kernel,
        out_shape=jax.ShapeDtypeStruct((B, O), jnp.float32),
        grid=(1,),
        in_specs=[_full_spec(a.shape) for a in arrays],
        out_specs=_full_spec((B, O)),
    )(*arrays)


# -----------------------------------------------------------------------------
# Model glue (plain JAX around the Pallas kernels)
# -----------------------------------------------------------------------------
@jax.jit
def lflstm_forward(params, sentences, visual, acoustic, lengths):
    B = lengths.shape[0]
    lens_col = lengths.reshape(B, 1).astype(jnp.int32)

    out_t = modality_features(sentences, lens_col, params["trnn1"], params["trnn2"],
                              params["tln_g"], params["tln_b"])
    out_v = modality_features(visual, lens_col, params["vrnn1"], params["vrnn2"],
                              params["vln_g"], params["vln_b"])
    out_a = modality_features(acoustic, lens_col, params["arnn1"], params["arnn2"],
                              params["aln_g"], params["aln_b"])

    def split4(o, H):
        return o[:, :H], o[:, H:2 * H], o[:, 2 * H:3 * H], o[:, 3 * H:4 * H]

    Ht = params["trnn1"]["w_hh_f"].shape[0]
    Hv = params["vrnn1"]["w_hh_f"].shape[0]
    Ha = params["arnn1"]["w_hh_f"].shape[0]
    t1f, t1b, t2f, t2b = split4(out_t, Ht)
    v1f, v1b, v2f, v2b = split4(out_v, Hv)
    a1f, a1b, a2f, a2b = split4(out_a, Ha)

    # torch: cat((fh1t, fh2t, fh1v, fh2v, fh1a, fh2a), dim=2)
    #        .permute(1, 0, 2).contiguous().view(B, -1)
    # -> per-row layout: [all forward finals ; all backward finals]
    h = jnp.concatenate([t1f, t2f, v1f, v2f, a1f, a2f,
                         t1b, t2b, v1b, v2b, a1b, a2b], axis=1)

    return head(h, params["fc1_w"], params["fc1_b"], params["fc2_w"], params["fc2_b"])


# -----------------------------------------------------------------------------
# Deterministic parameter init (shapes dictated by the PyTorch __init__)
# -----------------------------------------------------------------------------
def init_lstm_params(key, in_size, hidden):
    ks = jax.random.split(key, 8)
    s = 0.1
    u = lambda k, shape: jax.random.uniform(k, shape, jnp.float32, -s, s)
    return {
        "w_ih_f": u(ks[0], (in_size, 4 * hidden)),   # = torch weight_ih_l0.T
        "w_hh_f": u(ks[1], (hidden, 4 * hidden)),    # = torch weight_hh_l0.T
        "b_f": u(ks[2], (4 * hidden,)) + u(ks[3], (4 * hidden,)),  # b_ih + b_hh
        "w_ih_b": u(ks[4], (in_size, 4 * hidden)),
        "w_hh_b": u(ks[5], (hidden, 4 * hidden)),
        "b_b": u(ks[6], (4 * hidden,)) + u(ks[7], (4 * hidden,)),
    }


def init_params(key, input_sizes, hidden_sizes, fc1_size, output_size):
    keys = jax.random.split(key, 12)
    h0, h1, h2 = hidden_sizes
    fused = sum(hidden_sizes) * 4
    s = 0.1
    u = lambda k, shape: jax.random.uniform(k, shape, jnp.float32, -s, s)
    return {
        "trnn1": init_lstm_params(keys[0], input_sizes[0], h0),
        "trnn2": init_lstm_params(keys[1], 2 * h0, h0),
        "vrnn1": init_lstm_params(keys[2], input_sizes[1], h1),
        "vrnn2": init_lstm_params(keys[3], 2 * h1, h1),
        "arnn1": init_lstm_params(keys[4], input_sizes[2], h2),
        "arnn2": init_lstm_params(keys[5], 2 * h2, h2),
        "tln_g": jnp.ones((2 * h0,), jnp.float32),
        "tln_b": jnp.zeros((2 * h0,), jnp.float32),
        "vln_g": jnp.ones((2 * h1,), jnp.float32),
        "vln_b": jnp.zeros((2 * h1,), jnp.float32),
        "aln_g": jnp.ones((2 * h2,), jnp.float32),
        "aln_b": jnp.zeros((2 * h2,), jnp.float32),
        "fc1_w": u(keys[6], (fused, fc1_size)),
        "fc1_b": u(keys[7], (fc1_size,)),
        "fc2_w": u(keys[8], (fc1_size, output_size)),
        "fc2_b": u(keys[9], (output_size,)),
    }


# -----------------------------------------------------------------------------
# Pure-JAX reference (lax.scan) used only for a self-consistency check
# -----------------------------------------------------------------------------
def _ref_lstm_dir(x, lengths, w_ih, w_hh, b, reverse):
    T, B, _ = x.shape
    H = w_hh.shape[0]
    xg = x @ w_ih + b
    mask = (jnp.arange(T)[:, None] < lengths[None, :]).astype(jnp.float32)
    order = jnp.arange(T)[::-1] if reverse else jnp.arange(T)

    def step(carry, t):
        h, c = carry
        g = xg[t] + h @ w_hh
        i = jax.nn.sigmoid(g[:, :H])
        f = jax.nn.sigmoid(g[:, H:2 * H])
        gg = jnp.tanh(g[:, 2 * H:3 * H])
        o = jax.nn.sigmoid(g[:, 3 * H:])
        c_new = f * c + i * gg
        h_new = o * jnp.tanh(c_new)
        m = mask[t][:, None]
        h2 = m * h_new + (1 - m) * h
        c2 = m * c_new + (1 - m) * c
        return (h2, c2), h2 * m

    (hf, _), hs = lax.scan(step, (jnp.zeros((B, H)), jnp.zeros((B, H))), order)
    if reverse:
        hs = hs[::-1]
    return hs, hf


def _ref_bilstm(x, lengths, p):
    hs_f, hf_f = _ref_lstm_dir(x, lengths, p["w_ih_f"], p["w_hh_f"], p["b_f"], False)
    hs_b, hf_b = _ref_lstm_dir(x, lengths, p["w_ih_b"], p["w_hh_b"], p["b_b"], True)
    return jnp.concatenate([hs_f, hs_b], -1), jnp.stack([hf_f, hf_b], 0)


def _ref_ln(x, g, b):
    mean = jnp.mean(x, -1, keepdims=True)
    var = jnp.mean(jnp.square(x - mean), -1, keepdims=True)
    return (x - mean) * lax.rsqrt(var + 1e-5) * g + b


def _ref_forward(params, sentences, visual, acoustic, lengths):
    B = lengths.shape[0]
    outs = []
    for x, k1, k2, gk, bk in (
        (sentences, "trnn1", "trnn2", "tln_g", "tln_b"),
        (visual, "vrnn1", "vrnn2", "vln_g", "vln_b"),
        (acoustic, "arnn1", "arnn2", "aln_g", "aln_b"),
    ):
        h1s, fh1 = _ref_bilstm(x, lengths, params[k1])
        normed = _ref_ln(h1s, params[gk], params[bk])
        _, fh2 = _ref_bilstm(normed, lengths, params[k2])
        outs += [fh1, fh2]
    h = jnp.concatenate(outs, 2).transpose(1, 0, 2).reshape(B, -1)
    h = jnp.maximum(h @ params["fc1_w"] + params["fc1_b"], 0.0)
    return h @ params["fc2_w"] + params["fc2_b"]


# -----------------------------------------------------------------------------
if __name__ == "__main__":
    # small shapes consistent with the module
    input_sizes = (12, 10, 14)
    hidden_sizes = (8, 6, 4)
    fc1_size = 32
    output_size = 2
    T, B = 8, 4

    params = init_params(jax.random.PRNGKey(42), input_sizes, hidden_sizes,
                         fc1_size, output_size)

    key = jax.random.PRNGKey(0)
    ks, kv, ka = jax.random.split(key, 3)
    sentences = jax.random.normal(ks, (T, B, input_sizes[0]), jnp.float32)
    visual = jax.random.normal(kv, (T, B, input_sizes[1]), jnp.float32)
    acoustic = jax.random.normal(ka, (T, B, input_sizes[2]), jnp.float32)
    lengths = jnp.array([8, 7, 5, 3], dtype=jnp.int32)  # sorted desc, like pack_padded

    out = lflstm_forward(params, sentences, visual, acoustic, lengths)
    out = jax.block_until_ready(out)
    assert out.shape == (B, output_size)

    ref = jax.block_until_ready(
        _ref_forward(params, sentences, visual, acoustic, lengths))
    assert jnp.allclose(out, ref, atol=1e-4, rtol=1e-4), (out, ref)

    print("KERNEL_OK")
</pallas_src>

<mosaic_0001>
module attributes {stable_mosaic.version = 11 : i64} {
  func.func @_modality_kernel(%arg0: i32, %arg1: memref<4x1xi32, #tpu.memory_space<vmem>>, %arg2: memref<8x4x14xf32, #tpu.memory_space<vmem>>, %arg3: memref<14x16xf32, #tpu.memory_space<vmem>>, %arg4: memref<14x16xf32, #tpu.memory_space<vmem>>, %arg5: memref<4x16xf32, #tpu.memory_space<vmem>>, %arg6: memref<4x16xf32, #tpu.memory_space<vmem>>, %arg7: memref<1x16xf32, #tpu.memory_space<vmem>>, %arg8: memref<1x16xf32, #tpu.memory_space<vmem>>, %arg9: memref<1x8xf32, #tpu.memory_space<vmem>>, %arg10: memref<1x8xf32, #tpu.memory_space<vmem>>, %arg11: memref<8x16xf32, #tpu.memory_space<vmem>>, %arg12: memref<8x16xf32, #tpu.memory_space<vmem>>, %arg13: memref<4x16xf32, #tpu.memory_space<vmem>>, %arg14: memref<4x16xf32, #tpu.memory_space<vmem>>, %arg15: memref<1x16xf32, #tpu.memory_space<vmem>>, %arg16: memref<1x16xf32, #tpu.memory_space<vmem>>, %arg17: memref<4x16xf32, #tpu.memory_space<vmem>>, %arg18: memref<8x4x4xf32, #tpu.memory_space<vmem>>, %arg19: memref<8x4x4xf32, #tpu.memory_space<vmem>>, %arg20: memref<8x4x8xf32, #tpu.memory_space<vmem>>) attributes {dimension_semantics = [#tpu.dimension_semantics<arbitrary>], iteration_bounds = array<i64: 1>, scalar_prefetch = 0 : i64, scratch_operands = 3 : i64, tpu.core_type = #tpu.core_type<tc>, window_params = [{pipeline_mode = #tpu.pipeline_mode<synchronous>, transform_indices = @transform_0, window_bounds = array<i64: 4, 1>}, {pipeline_mode = #tpu.pipeline_mode<synchronous>, transform_indices = @transform_1, window_bounds = array<i64: 8, 4, 14>}, {pipeline_mode = #tpu.pipeline_mode<synchronous>, transform_indices = @transform_2, window_bounds = array<i64: 14, 16>}, {pipeline_mode = #tpu.pipeline_mode<synchronous>, transform_indices = @transform_3, window_bounds = array<i64: 14, 16>}, {pipeline_mode = #tpu.pipeline_mode<synchronous>, transform_indices = @transform_4, window_bounds = array<i64: 4, 16>}, {pipeline_mode = #tpu.pipeline_mode<synchronous>, transform_indices = @transform_5, window_bounds = array<i64: 4, 16>}, {pipeline_mode = #tpu.pipeline_mode<synchronous>, transform_indices = @transform_6, window_bounds = array<i64: 1, 16>}, {pipeline_mode = #tpu.pipeline_mode<synchronous>, transform_indices = @transform_7, window_bounds = array<i64: 1, 16>}, {pipeline_mode = #tpu.pipeline_mode<synchronous>, transform_indices = @transform_8, window_bounds = array<i64: 1, 8>}, {pipeline_mode = #tpu.pipeline_mode<synchronous>, transform_indices = @transform_9, window_bounds = array<i64: 1, 8>}, {pipeline_mode = #tpu.pipeline_mode<synchronous>, transform_indices = @transform_10, window_bounds = array<i64: 8, 16>}, {pipeline_mode = #tpu.pipeline_mode<synchronous>, transform_indices = @transform_11, window_bounds = array<i64: 8, 16>}, {pipeline_mode = #tpu.pipeline_mode<synchronous>, transform_indices = @transform_12, window_bounds = array<i64: 4, 16>}, {pipeline_mode = #tpu.pipeline_mode<synchronous>, transform_indices = @transform_13, window_bounds = array<i64: 4, 16>}, {pipeline_mode = #tpu.pipeline_mode<synchronous>, transform_indices = @transform_14, window_bounds = array<i64: 1, 16>}, {pipeline_mode = #tpu.pipeline_mode<synchronous>, transform_indices = @transform_15, window_bounds = array<i64: 1, 16>}, {pipeline_mode = #tpu.pipeline_mode<synchronous>, transform_indices = @transform_16, window_bounds = array<i64: 4, 16>}]} {
    %c0 = arith.constant 0 : index
    %c0_0 = arith.constant 0 : index
    %0 = vector.load %arg1[%c0, %c0_0] : memref<4x1xi32, #tpu.memory_space<vmem>>, vector<4x1xi32>
    %c0_1 = arith.constant 0 : index
    %c0_2 = arith.constant 0 : index
    %1 = vector.load %arg3[%c0_1, %c0_2] : memref<14x16xf32, #tpu.memory_space<vmem>>, vector<14x16xf32>
    %c0_3 = arith.constant 0 : index
    %c0_4 = arith.constant 0 : index
    %2 = vector.load %arg4[%c0_3, %c0_4] : memref<14x16xf32, #tpu.memory_space<vmem>>, vector<14x16xf32>
    %c0_5 = arith.constant 0 : index
    %c0_6 = arith.constant 0 : index
    %3 = vector.load %arg5[%c0_5, %c0_6] : memref<4x16xf32, #tpu.memory_space<vmem>>, vector<4x16xf32>
    %c0_7 = arith.constant 0 : index
    %c0_8 = arith.constant 0 : index
    %4 = vector.load %arg6[%c0_7, %c0_8] : memref<4x16xf32, #tpu.memory_space<vmem>>, vector<4x16xf32>
    %c0_9 = arith.constant 0 : index
    %c0_10 = arith.constant 0 : index
    %5 = vector.load %arg7[%c0_9, %c0_10] : memref<1x16xf32, #tpu.memory_space<vmem>>, vector<1x16xf32>
    %c0_11 = arith.constant 0 : index
    %c0_12 = arith.constant 0 : index
    %6 = vector.load %arg8[%c0_11, %c0_12] : memref<1x16xf32, #tpu.memory_space<vmem>>, vector<1x16xf32>
    %c0_13 = arith.constant 0 : index
    %c0_14 = arith.constant 0 : index
    %7 = vector.load %arg11[%c0_13, %c0_14] : memref<8x16xf32, #tpu.memory_space<vmem>>, vector<8x16xf32>
    %c0_15 = arith.constant 0 : index
    %c0_16 = arith.constant 0 : index
    %8 = vector.load %arg12[%c0_15, %c0_16] : memref<8x16xf32, #tpu.memory_space<vmem>>, vector<8x16xf32>
    %c0_17 = arith.constant 0 : index
    %c0_18 = arith.constant 0 : index
    %9 = vector.load %arg13[%c0_17, %c0_18] : memref<4x16xf32, #tpu.memory_space<vmem>>, vector<4x16xf32>
    %c0_19 = arith.constant 0 : index
    %c0_20 = arith.constant 0 : index
    %10 = vector.load %arg14[%c0_19, %c0_20] : memref<4x16xf32, #tpu.memory_space<vmem>>, vector<4x16xf32>
    %c0_21 = arith.constant 0 : index
    %c0_22 = arith.constant 0 : index
    %11 = vector.load %arg15[%c0_21, %c0_22] : memref<1x16xf32, #tpu.memory_space<vmem>>, vector<1x16xf32>
    %c0_23 = arith.constant 0 : index
    %c0_24 = arith.constant 0 : index
    %12 = vector.load %arg16[%c0_23, %c0_24] : memref<1x16xf32, #tpu.memory_space<vmem>>, vector<1x16xf32>
    %cst = arith.constant 0.000000e+00 : f32
    %13 = vector.broadcast %cst : f32 to vector<4x4xf32>
    %c0_i32 = arith.constant 0 : i32
    %c8_i32 = arith.constant 8 : i32
    %14 = arith.addi %c0_i32, %c8_i32 : i32
    %c1_i32 = arith.constant 1 : i32
    %15:4 = scf.for %arg21 = %c0_i32 to %14 step %c1_i32 iter_args(%arg22 = %13, %arg23 = %13, %arg24 = %13, %arg25 = %13) -> (vector<4x4xf32>, vector<4x4xf32>, vector<4x4xf32>, vector<4x4xf32>)  : i32 {
      %c7_i32 = arith.constant 7 : i32
      %50 = arith.subi %c7_i32, %arg21 : i32
      %51 = vector.broadcast %arg21 : i32 to vector<4x1xi32>
      %52 = arith.cmpi slt, %51, %0 : vector<4x1xi32>
      %53 = vector.broadcast %50 : i32 to vector<4x1xi32>
      %54 = arith.cmpi slt, %53, %0 : vector<4x1xi32>
      %55 = arith.index_cast %arg21 : i32 to index
      %c0_50 = arith.constant 0 : index
      %c0_51 = arith.constant 0 : index
      %56 = vector.load %arg2[%55, %c0_50, %c0_51] : memref<8x4x14xf32, #tpu.memory_space<vmem>>, vector<1x4x14xf32>
      %57 = vector.shape_cast %56 : vector<1x4x14xf32> to vector<4x14xf32>
      %cst_52 = arith.constant dense<0.000000e+00> : vector<4x16xf32>
      %58 = tpu.matmul %57, %1, %cst_52 {dimension_numbers = #tpu.dot_dimension_numbers<[1], [0], [0], [1], [0, 0, 1, 1], [], []>} : vector<4x14xf32>, vector<14x16xf32>, vector<4x16xf32> -> vector<4x16xf32>
      %cst_53 = arith.constant dense<0.000000e+00> : vector<4x16xf32>
      %59 = tpu.matmul %arg22, %3, %cst_53 {dimension_numbers = #tpu.dot_dimension_numbers<[1], [0], [0], [1], [0, 0, 1, 1], [], []>} : vector<4x4xf32>, vector<4x16xf32>, vector<4x16xf32> -> vector<4x16xf32>
      %60 = arith.addf %58, %59 : vector<4x16xf32>
      %61 = vector.broadcast %5 : vector<1x16xf32> to vector<4x16xf32>
      %62 = arith.addf %60, %61 : vector<4x16xf32>
      %63 = vector.extract_strided_slice %62 {offsets = [0, 0], sizes = [4, 4], strides = [1, 1]} : vector<4x16xf32> to vector<4x4xf32>
      %64 = arith.negf %63 : vector<4x4xf32>
      %65 = math.exp %64 : vector<4x4xf32>
      %cst_54 = arith.constant 1.000000e+00 : f32
      %66 = vector.broadcast %cst_54 : f32 to vector<4x4xf32>
      %67 = arith.addf %66, %65 : vector<4x4xf32>
      %68 = arith.divf %66, %67 : vector<4x4xf32>
      %69 = vector.extract_strided_slice %62 {offsets = [0, 4], sizes = [4, 4], strides = [1, 1]} : vector<4x16xf32> to vector<4x4xf32>
      %70 = arith.negf %69 : vector<4x4xf32>
      %71 = math.exp %70 : vector<4x4xf32>
      %cst_55 = arith.constant 1.000000e+00 : f32
      %72 = vector.broadcast %cst_55 : f32 to vector<4x4xf32>
      %73 = arith.addf %72, %71 : vector<4x4xf32>
      %74 = arith.divf %72, %73 : vector<4x4xf32>
      %75 = vector.extract_strided_slice %62 {offsets = [0, 8], sizes = [4, 4], strides = [1, 1]} : vector<4x16xf32> to vector<4x4xf32>
      %76 = math.tanh %75 : vector<4x4xf32>
      %77 = vector.extract_strided_slice %62 {offsets = [0, 12], sizes = [4, 4], strides = [1, 1]} : vector<4x16xf32> to vector<4x4xf32>
      %78 = arith.negf %77 : vector<4x4xf32>
      %79 = math.exp %78 : vector<4x4xf32>
      %cst_56 = arith.constant 1.000000e+00 : f32
      %80 = vector.broadcast %cst_56 : f32 to vector<4x4xf32>
      %81 = arith.addf %80, %79 : vector<4x4xf32>
      %82 = arith.divf %80, %81 : vector<4x4xf32>
      %83 = arith.mulf %74, %arg23 : vector<4x4xf32>
      %84 = arith.mulf %68, %76 : vector<4x4xf32>
      %85 = arith.addf %83, %84 : vector<4x4xf32>
      %86 = math.tanh %85 : vector<4x4xf32>
      %87 = arith.mulf %82, %86 : vector<4x4xf32>
      %88 = arith.index_cast %50 : i32 to index
      %c0_57 = arith.constant 0 : index
      %c0_58 = arith.constant 0 : index
      %89 = vector.load %arg2[%88, %c0_57, %c0_58] : memref<8x4x14xf32, #tpu.memory_space<vmem>>, vector<1x4x14xf32>
      %90 = vector.shape_cast %89 : vector<1x4x14xf32> to vector<4x14xf32>
      %cst_59 = arith.constant dense<0.000000e+00> : vector<4x16xf32>
      %91 = tpu.matmul %90, %2, %cst_59 {dimension_numbers = #tpu.dot_dimension_numbers<[1], [0], [0], [1], [0, 0, 1, 1], [], []>} : vector<4x14xf32>, vector<14x16xf32>, vector<4x16xf32> -> vector<4x16xf32>
      %cst_60 = arith.constant dense<0.000000e+00> : vector<4x16xf32>
      %92 = tpu.matmul %arg24, %4, %cst_60 {dimension_numbers = #tpu.dot_dimension_numbers<[1], [0], [0], [1], [0, 0, 1, 1], [], []>} : vector<4x4xf32>, vector<4x16xf32>, vector<4x16xf32> -> vector<4x16xf32>
      %93 = arith.addf %91, %92 : vector<4x16xf32>
      %94 = vector.broadcast %6 : vector<1x16xf32> to vector<4x16xf32>
      %95 = arith.addf %93, %94 : vector<4x16xf32>
      %96 = vector.extract_strided_slice %95 {offsets = [0, 0], sizes = [4, 4], strides = [1, 1]} : vector<4x16xf32> to vector<4x4xf32>
      %97 = arith.negf %96 : vector<4x4xf32>
      %98 = math.exp %97 : vector<4x4xf32>
      %cst_61 = arith.constant 1.000000e+00 : f32
      %99 = vector.broadcast %cst_61 : f32 to vector<4x4xf32>
      %100 = arith.addf %99, %98 : vector<4x4xf32>
      %101 = arith.divf %99, %100 : vector<4x4xf32>
      %102 = vector.extract_strided_slice %95 {offsets = [0, 4], sizes = [4, 4], strides = [1, 1]} : vector<4x16xf32> to vector<4x4xf32>
      %103 = arith.negf %102 : vector<4x4xf32>
      %104 = math.exp %103 : vector<4x4xf32>
      %cst_62 = arith.constant 1.000000e+00 : f32
      %105 = vector.broadcast %cst_62 : f32 to vector<4x4xf32>
      %106 = arith.addf %105, %104 : vector<4x4xf32>
      %107 = arith.divf %105, %106 : vector<4x4xf32>
      %108 = vector.extract_strided_slice %95 {offsets = [0, 8], sizes = [4, 4], strides = [1, 1]} : vector<4x16xf32> to vector<4x4xf32>
      %109 = math.tanh %108 : vector<4x4xf32>
      %110 = vector.extract_strided_slice %95 {offsets = [0, 12], sizes = [4, 4], strides = [1, 1]} : vector<4x16xf32> to vector<4x4xf32>
      %111 = arith.negf %110 : vector<4x4xf32>
      %112 = math.exp %111 : vector<4x4xf32>
      %cst_63 = arith.constant 1.000000e+00 : f32
      %113 = vector.broadcast %cst_63 : f32 to vector<4x4xf32>
      %114 = arith.addf %113, %112 : vector<4x4xf32>
      %115 = arith.divf %113, %114 : vector<4x4xf32>
      %116 = arith.mulf %107, %arg25 : vector<4x4xf32>
      %117 = arith.mulf %101, %109 : vector<4x4xf32>
      %118 = arith.addf %116, %117 : vector<4x4xf32>
      %119 = math.tanh %118 : vector<4x4xf32>
      %120 = arith.mulf %115, %119 : vector<4x4xf32>
      %121 = vector.shape_cast %52 : vector<4x1xi1> to vector<4x1xi1>
      %122 = vector.broadcast %121 : vector<4x1xi1> to vector<4x4xi1>
      %123 = arith.select %122, %87, %arg22 : vector<4x4xi1>, vector<4x4xf32>
      %124 = vector.shape_cast %52 : vector<4x1xi1> to vector<4x1xi1>
      %125 = vector.broadcast %124 : vector<4x1xi1> to vector<4x4xi1>
      %126 = arith.select %125, %85, %arg23 : vector<4x4xi1>, vector<4x4xf32>
      %127 = vector.shape_cast %54 : vector<4x1xi1> to vector<4x1xi1>
      %128 = vector.broadcast %127 : vector<4x1xi1> to vector<4x4xi1>
      %129 = arith.select %128, %120, %arg24 : vector<4x4xi1>, vector<4x4xf32>
      %130 = vector.shape_cast %54 : vector<4x1xi1> to vector<4x1xi1>
      %131 = vector.broadcast %130 : vector<4x1xi1> to vector<4x4xi1>
      %132 = arith.select %131, %118, %arg25 : vector<4x4xi1>, vector<4x4xf32>
      %133 = arith.index_cast %arg21 : i32 to index
      %c0_64 = arith.constant 0 : index
      %c0_65 = arith.constant 0 : index
      %134 = vector.load %arg18[%133, %c0_64, %c0_65] : memref<8x4x4xf32, #tpu.memory_space<vmem>>, vector<1x4x4xf32>
      %135 = vector.shape_cast %134 : vector<1x4x4xf32> to vector<4x4xf32>
      %136 = vector.shape_cast %123 : vector<4x4xf32> to vector<1x4x4xf32>
      tpu.vector_store %arg18[%133, %c0_64, %c0_65], %136 {strides = array<i32>} : memref<8x4x4xf32, #tpu.memory_space<vmem>>, vector<1x4x4xf32>,
      %137 = arith.index_cast %50 : i32 to index
      %c0_66 = arith.constant 0 : index
      %c0_67 = arith.constant 0 : index
      %138 = vector.load %arg19[%137, %c0_66, %c0_67] : memref<8x4x4xf32, #tpu.memory_space<vmem>>, vector<1x4x4xf32>
      %139 = vector.shape_cast %138 : vector<1x4x4xf32> to vector<4x4xf32>
      %140 = vector.shape_cast %129 : vector<4x4xf32> to vector<1x4x4xf32>
      tpu.vector_store %arg19[%137, %c0_66, %c0_67], %140 {strides = array<i32>} : memref<8x4x4xf32, #tpu.memory_space<vmem>>, vector<1x4x4xf32>,
      scf.yield %123, %126, %129, %132 : vector<4x4xf32>, vector<4x4xf32>, vector<4x4xf32>, vector<4x4xf32>
    }
    %c8_i32_25 = arith.constant 8 : i32
    %c0_26 = arith.constant 0 : index
    %c0_27 = arith.constant 0 : index
    %c0_28 = arith.constant 0 : index
    %16 = vector.load %arg18[%c0_26, %c0_27, %c0_28] : memref<8x4x4xf32, #tpu.memory_space<vmem>>, vector<8x4x4xf32>
    %c0_29 = arith.constant 0 : index
    %c0_30 = arith.constant 0 : index
    %c0_31 = arith.constant 0 : index
    %17 = vector.load %arg19[%c0_29, %c0_30, %c0_31] : memref<8x4x4xf32, #tpu.memory_space<vmem>>, vector<8x4x4xf32>
    %18 = tpu.concatenate %16, %17 in 2 : vector<8x4x4xf32>, vector<8x4x4xf32> -> vector<8x4x8xf32>
    %cst_32 = arith.constant dense<0.000000e+00> : vector<8x4xf32>
    %19 = vector.multi_reduction <add>, %18, %cst_32 [2] : vector<8x4x8xf32> to vector<8x4xf32>
    %20 = vector.shape_cast %19 : vector<8x4xf32> to vector<8x4x1xf32>
    %cst_33 = arith.constant 8.000000e+00 : f32
    %21 = vector.broadcast %cst_33 : f32 to vector<8x4x1xf32>
    %22 = arith.divf %20, %21 : vector<8x4x1xf32>
    %23 = vector.broadcast %22 : vector<8x4x1xf32> to vector<8x4x8xf32>
    %24 = arith.subf %18, %23 : vector<8x4x8xf32>
    %25 = arith.mulf %24, %24 : vector<8x4x8xf32>
    %cst_34 = arith.constant dense<0.000000e+00> : vector<8x4xf32>
    %26 = vector.multi_reduction <add>, %25, %cst_34 [2] : vector<8x4x8xf32> to vector<8x4xf32>
    %27 = vector.shape_cast %26 : vector<8x4xf32> to vector<8x4x1xf32>
    %cst_35 = arith.constant 8.000000e+00 : f32
    %28 = vector.broadcast %cst_35 : f32 to vector<8x4x1xf32>
    %29 = arith.divf %27, %28 : vector<8x4x1xf32>
    %30 = vector.broadcast %22 : vector<8x4x1xf32> to vector<8x4x8xf32>
    %31 = arith.subf %18, %30 : vector<8x4x8xf32>
    %cst_36 = arith.constant 9.99999974E-6 : f32
    %32 = vector.broadcast %cst_36 : f32 to vector<8x4x1xf32>
    %33 = arith.addf %29, %32 : vector<8x4x1xf32>
    %34 = math.rsqrt %33 : vector<8x4x1xf32>
    %35 = vector.broadcast %34 : vector<8x4x1xf32> to vector<8x4x8xf32>
    %36 = arith.mulf %31, %35 : vector<8x4x8xf32>
    %c0_37 = arith.constant 0 : index
    %c0_38 = arith.constant 0 : index
    %37 = vector.load %arg9[%c0_37, %c0_38] : memref<1x8xf32, #tpu.memory_space<vmem>>, vector<1x8xf32>
    %38 = vector.shape_cast %37 : vector<1x8xf32> to vector<1x1x8xf32>
    %39 = vector.broadcast %38 : vector<1x1x8xf32> to vector<8x4x8xf32>
    %40 = arith.mulf %36, %39 : vector<8x4x8xf32>
    %c0_39 = arith.constant 0 : index
    %c0_40 = arith.constant 0 : index
    %41 = vector.load %arg10[%c0_39, %c0_40] : memref<1x8xf32, #tpu.memory_space<vmem>>, vector<1x8xf32>
    %42 = vector.shape_cast %41 : vector<1x8xf32> to vector<1x1x8xf32>
    %43 = vector.broadcast %42 : vector<1x1x8xf32> to vector<8x4x8xf32>
    %44 = arith.addf %40, %43 : vector<8x4x8xf32>
    %c0_41 = arith.constant 0 : index
    %c0_42 = arith.constant 0 : index
    %c0_43 = arith.constant 0 : index
    %45 = vector.load %arg20[%c0_41, %c0_42, %c0_43] : memref<8x4x8xf32, #tpu.memory_space<vmem>>, vector<8x4x8xf32>
    tpu.vector_store %arg20[%c0_41, %c0_42, %c0_43], %44 {strides = array<i32>} : memref<8x4x8xf32, #tpu.memory_space<vmem>>, vector<8x4x8xf32>,
    %c0_i32_44 = arith.constant 0 : i32
    %c8_i32_45 = arith.constant 8 : i32
    %46 = arith.addi %c0_i32_44, %c8_i32_45 : i32
    %c1_i32_46 = arith.constant 1 : i32
    %47:4 = scf.for %arg21 = %c0_i32_44 to %46 step %c1_i32_46 iter_args(%arg22 = %13, %arg23 = %13, %arg24 = %13, %arg25 = %13) -> (vector<4x4xf32>, vector<4x4xf32>, vector<4x4xf32>, vector<4x4xf32>)  : i32 {
      %c7_i32 = arith.constant 7 : i32
      %50 = arith.subi %c7_i32, %arg21 : i32
      %51 = vector.broadcast %arg21 : i32 to vector<4x1xi32>
      %52 = arith.cmpi slt, %51, %0 : vector<4x1xi32>
      %53 = vector.broadcast %50 : i32 to vector<4x1xi32>
      %54 = arith.cmpi slt, %53, %0 : vector<4x1xi32>
      %55 = arith.index_cast %arg21 : i32 to index
      %c0_50 = arith.constant 0 : index
      %c0_51 = arith.constant 0 : index
      %56 = vector.load %arg20[%55, %c0_50, %c0_51] : memref<8x4x8xf32, #tpu.memory_space<vmem>>, vector<1x4x8xf32>
      %57 = vector.shape_cast %56 : vector<1x4x8xf32> to vector<4x8xf32>
      %cst_52 = arith.constant dense<0.000000e+00> : vector<4x16xf32>
      %58 = tpu.matmul %57, %7, %cst_52 {dimension_numbers = #tpu.dot_dimension_numbers<[1], [0], [0], [1], [0, 0, 1, 1], [], []>} : vector<4x8xf32>, vector<8x16xf32>, vector<4x16xf32> -> vector<4x16xf32>
      %cst_53 = arith.constant dense<0.000000e+00> : vector<4x16xf32>
      %59 = tpu.matmul %arg22, %9, %cst_53 {dimension_numbers = #tpu.dot_dimension_numbers<[1], [0], [0], [1], [0, 0, 1, 1], [], []>} : vector<4x4xf32>, vector<4x16xf32>, vector<4x16xf32> -> vector<4x16xf32>
      %60 = arith.addf %58, %59 : vector<4x16xf32>
      %61 = vector.broadcast %11 : vector<1x16xf32> to vector<4x16xf32>
      %62 = arith.addf %60, %61 : vector<4x16xf32>
      %63 = vector.extract_strided_slice %62 {offsets = [0, 0], sizes = [4, 4], strides = [1, 1]} : vector<4x16xf32> to vector<4x4xf32>
      %64 = arith.negf %63 : vector<4x4xf32>
      %65 = math.exp %64 : vector<4x4xf32>
      %cst_54 = arith.constant 1.000000e+00 : f32
      %66 = vector.broadcast %cst_54 : f32 to vector<4x4xf32>
      %67 = arith.addf %66, %65 : vector<4x4xf32>
      %68 = arith.divf %66, %67 : vector<4x4xf32>
      %69 = vector.extract_strided_slice %62 {offsets = [0, 4], sizes = [4, 4], strides = [1, 1]} : vector<4x16xf32> to vector<4x4xf32>
      %70 = arith.negf %69 : vector<4x4xf32>
      %71 = math.exp %70 : vector<4x4xf32>
      %cst_55 = arith.constant 1.000000e+00 : f32
      %72 = vector.broadcast %cst_55 : f32 to vector<4x4xf32>
      %73 = arith.addf %72, %71 : vector<4x4xf32>
      %74 = arith.divf %72, %73 : vector<4x4xf32>
      %75 = vector.extract_strided_slice %62 {offsets = [0, 8], sizes = [4, 4], strides = [1, 1]} : vector<4x16xf32> to vector<4x4xf32>
      %76 = math.tanh %75 : vector<4x4xf32>
      %77 = vector.extract_strided_slice %62 {offsets = [0, 12], sizes = [4, 4], strides = [1, 1]} : vector<4x16xf32> to vector<4x4xf32>
      %78 = arith.negf %77 : vector<4x4xf32>
      %79 = math.exp %78 : vector<4x4xf32>
      %cst_56 = arith.constant 1.000000e+00 : f32
      %80 = vector.broadcast %cst_56 : f32 to vector<4x4xf32>
      %81 = arith.addf %80, %79 : vector<4x4xf32>
      %82 = arith.divf %80, %81 : vector<4x4xf32>
      %83 = arith.mulf %74, %arg23 : vector<4x4xf32>
      %84 = arith.mulf %68, %76 : vector<4x4xf32>
      %85 = arith.addf %83, %84 : vector<4x4xf32>
      %86 = math.tanh %85 : vector<4x4xf32>
      %87 = arith.mulf %82, %86 : vector<4x4xf32>
      %88 = arith.index_cast %50 : i32 to index
      %c0_57 = arith.constant 0 : index
      %c0_58 = arith.constant 0 : index
      %89 = vector.load %arg20[%88, %c0_57, %c0_58] : memref<8x4x8xf32, #tpu.memory_space<vmem>>, vector<1x4x8xf32>
      %90 = vector.shape_cast %89 : vector<1x4x8xf32> to vector<4x8xf32>
      %cst_59 = arith.constant dense<0.000000e+00> : vector<4x16xf32>
      %91 = tpu.matmul %90, %8, %cst_59 {dimension_numbers = #tpu.dot_dimension_numbers<[1], [0], [0], [1], [0, 0, 1, 1], [], []>} : vector<4x8xf32>, vector<8x16xf32>, vector<4x16xf32> -> vector<4x16xf32>
      %cst_60 = arith.constant dense<0.000000e+00> : vector<4x16xf32>
      %92 = tpu.matmul %arg24, %10, %cst_60 {dimension_numbers = #tpu.dot_dimension_numbers<[1], [0], [0], [1], [0, 0, 1, 1], [], []>} : vector<4x4xf32>, vector<4x16xf32>, vector<4x16xf32> -> vector<4x16xf32>
      %93 = arith.addf %91, %92 : vector<4x16xf32>
      %94 = vector.broadcast %12 : vector<1x16xf32> to vector<4x16xf32>
      %95 = arith.addf %93, %94 : vector<4x16xf32>
      %96 = vector.extract_strided_slice %95 {offsets = [0, 0], sizes = [4, 4], strides = [1, 1]} : vector<4x16xf32> to vector<4x4xf32>
      %97 = arith.negf %96 : vector<4x4xf32>
      %98 = math.exp %97 : vector<4x4xf32>
      %cst_61 = arith.constant 1.000000e+00 : f32
      %99 = vector.broadcast %cst_61 : f32 to vector<4x4xf32>
      %100 = arith.addf %99, %98 : vector<4x4xf32>
      %101 = arith.divf %99, %100 : vector<4x4xf32>
      %102 = vector.extract_strided_slice %95 {offsets = [0, 4], sizes = [4, 4], strides = [1, 1]} : vector<4x16xf32> to vector<4x4xf32>
      %103 = arith.negf %102 : vector<4x4xf32>
      %104 = math.exp %103 : vector<4x4xf32>
      %cst_62 = arith.constant 1.000000e+00 : f32
      %105 = vector.broadcast %cst_62 : f32 to vector<4x4xf32>
      %106 = arith.addf %105, %104 : vector<4x4xf32>
      %107 = arith.divf %105, %106 : vector<4x4xf32>
      %108 = vector.extract_strided_slice %95 {offsets = [0, 8], sizes = [4, 4], strides = [1, 1]} : vector<4x16xf32> to vector<4x4xf32>
      %109 = math.tanh %108 : vector<4x4xf32>
      %110 = vector.extract_strided_slice %95 {offsets = [0, 12], sizes = [4, 4], strides = [1, 1]} : vector<4x16xf32> to vector<4x4xf32>
      %111 = arith.negf %110 : vector<4x4xf32>
      %112 = math.exp %111 : vector<4x4xf32>
      %cst_63 = arith.constant 1.000000e+00 : f32
      %113 = vector.broadcast %cst_63 : f32 to vector<4x4xf32>
      %114 = arith.addf %113, %112 : vector<4x4xf32>
      %115 = arith.divf %113, %114 : vector<4x4xf32>
      %116 = arith.mulf %107, %arg25 : vector<4x4xf32>
      %117 = arith.mulf %101, %109 : vector<4x4xf32>
      %118 = arith.addf %116, %117 : vector<4x4xf32>
      %119 = math.tanh %118 : vector<4x4xf32>
      %120 = arith.mulf %115, %119 : vector<4x4xf32>
      %121 = vector.shape_cast %52 : vector<4x1xi1> to vector<4x1xi1>
      %122 = vector.broadcast %121 : vector<4x1xi1> to vector<4x4xi1>
      %123 = arith.select %122, %87, %arg22 : vector<4x4xi1>, vector<4x4xf32>
      %124 = vector.shape_cast %52 : vector<4x1xi1> to vector<4x1xi1>
      %125 = vector.broadcast %124 : vector<4x1xi1> to vector<4x4xi1>
      %126 = arith.select %125, %85, %arg23 : vector<4x4xi1>, vector<4x4xf32>
      %127 = vector.shape_cast %54 : vector<4x1xi1> to vector<4x1xi1>
      %128 = vector.broadcast %127 : vector<4x1xi1> to vector<4x4xi1>
      %129 = arith.select %128, %120, %arg24 : vector<4x4xi1>, vector<4x4xf32>
      %130 = vector.shape_cast %54 : vector<4x1xi1> to vector<4x1xi1>
      %131 = vector.broadcast %130 : vector<4x1xi1> to vector<4x4xi1>
      %132 = arith.select %131, %118, %arg25 : vector<4x4xi1>, vector<4x4xf32>
      scf.yield %123, %126, %129, %132 : vector<4x4xf32>, vector<4x4xf32>, vector<4x4xf32>, vector<4x4xf32>
    }
    %c8_i32_47 = arith.constant 8 : i32
    %48 = tpu.concatenate %15#0, %15#2, %47#0, %47#2 in 1 : vector<4x4xf32>, vector<4x4xf32>, vector<4x4xf32>, vector<4x4xf32> -> vector<4x16xf32>
    %c0_48 = arith.constant 0 : index
    %c0_49 = arith.constant 0 : index
    %49 = vector.load %arg17[%c0_48, %c0_49] : memref<4x16xf32, #tpu.memory_space<vmem>>, vector<4x16xf32>
    tpu.vector_store %arg17[%c0_48, %c0_49], %48 {strides = array<i32>} : memref<4x16xf32, #tpu.memory_space<vmem>>, vector<4x16xf32>,
    return
  }
  func.func @transform_0(%arg0: i32) -> (i32, i32) {
    %c0_i32 = arith.constant 0 : i32
    %c0_i32_0 = arith.constant 0 : i32
    %c0_i32_1 = arith.constant 0 : i32
    return %c0_i32, %c0_i32_0 : i32, i32
  }
  func.func @transform_1(%arg0: i32) -> (i32, i32, i32) {
    %c0_i32 = arith.constant 0 : i32
    %c0_i32_0 = arith.constant 0 : i32
    %c0_i32_1 = arith.constant 0 : i32
    %c0_i32_2 = arith.constant 0 : i32
    return %c0_i32, %c0_i32_0, %c0_i32_1 : i32, i32, i32
  }
  func.func @transform_2(%arg0: i32) -> (i32, i32) {
    %c0_i32 = arith.constant 0 : i32
    %c0_i32_0 = arith.constant 0 : i32
    %c0_i32_1 = arith.constant 0 : i32
    return %c0_i32, %c0_i32_0 : i32, i32
  }
  func.func @transform_3(%arg0: i32) -> (i32, i32) {
    %c0_i32 = arith.constant 0 : i32
    %c0_i32_0 = arith.constant 0 : i32
    %c0_i32_1 = arith.constant 0 : i32
    return %c0_i32, %c0_i32_0 : i32, i32
  }
  func.func @transform_4(%arg0: i32) -> (i32, i32) {
    %c0_i32 = arith.constant 0 : i32
    %c0_i32_0 = arith.constant 0 : i32
    %c0_i32_1 = arith.constant 0 : i32
    return %c0_i32, %c0_i32_0 : i32, i32
  }
  func.func @transform_5(%arg0: i32) -> (i32, i32) {
    %c0_i32 = arith.constant 0 : i32
    %c0_i32_0 = arith.constant 0 : i32
    %c0_i32_1 = arith.constant 0 : i32
    return %c0_i32, %c0_i32_0 : i32, i32
  }
  func.func @transform_6(%arg0: i32) -> (i32, i32) {
    %c0_i32 = arith.constant 0 : i32
    %c0_i32_0 = arith.constant 0 : i32
    %c0_i32_1 = arith.constant 0 : i32
    return %c0_i32, %c0_i32_0 : i32, i32
  }
  func.func @transform_7(%arg0: i32) -> (i32, i32) {
    %c0_i32 = arith.constant 0 : i32
    %c0_i32_0 = arith.constant 0 : i32
    %c0_i32_1 = arith.constant 0 : i32
    return %c0_i32, %c0_i32_0 : i32, i32
  }
  func.func @transform_8(%arg0: i32) -> (i32, i32) {
    %c0_i32 = arith.constant 0 : i32
    %c0_i32_0 = arith.constant 0 : i32
    %c0_i32_1 = arith.constant 0 : i32
    return %c0_i32, %c0_i32_0 : i32, i32
  }
  func.func @transform_9(%arg0: i32) -> (i32, i32) {
    %c0_i32 = arith.constant 0 : i32
    %c0_i32_0 = arith.constant 0 : i32
    %c0_i32_1 = arith.constant 0 : i32
    return %c0_i32, %c0_i32_0 : i32, i32
  }
  func.func @transform_10(%arg0: i32) -> (i32, i32) {
    %c0_i32 = arith.constant 0 : i32
    %c0_i32_0 = arith.constant 0 : i32
    %c0_i32_1 = arith.constant 0 : i32
    return %c0_i32, %c0_i32_0 : i32, i32
  }
  func.func @transform_11(%arg0: i32) -> (i32, i32) {
    %c0_i32 = arith.constant 0 : i32
    %c0_i32_0 = arith.constant 0 : i32
    %c0_i32_1 = arith.constant 0 : i32
    return %c0_i32, %c0_i32_0 : i32, i32
  }
  func.func @transform_12(%arg0: i32) -> (i32, i32) {
    %c0_i32 = arith.constant 0 : i32
    %c0_i32_0 = arith.constant 0 : i32
    %c0_i32_1 = arith.constant 0 : i32
    return %c0_i32, %c0_i32_0 : i32, i32
  }
  func.func @transform_13(%arg0: i32) -> (i32, i32) {
    %c0_i32 = arith.constant 0 : i32
    %c0_i32_0 = arith.constant 0 : i32
    %c0_i32_1 = arith.constant 0 : i32
    return %c0_i32, %c0_i32_0 : i32, i32
  }
  func.func @transform_14(%arg0: i32) -> (i32, i32) {
    %c0_i32 = arith.constant 0 : i32
    %c0_i32_0 = arith.constant 0 : i32
    %c0_i32_1 = arith.constant 0 : i32
    return %c0_i32, %c0_i32_0 : i32, i32
  }
  func.func @transform_15(%arg0: i32) -> (i32, i32) {
    %c0_i32 = arith.constant 0 : i32
    %c0_i32_0 = arith.constant 0 : i32
    %c0_i32_1 = arith.constant 0 : i32
    return %c0_i32, %c0_i32_0 : i32, i32
  }
  func.func @transform_16(%arg0: i32) -> (i32, i32) {
    %c0_i32 = arith.constant 0 : i32
    %c0_i32_0 = arith.constant 0 : i32
    %c0_i32_1 = arith.constant 0 : i32
    return %c0_i32, %c0_i32_0 : i32, i32
  }
}

module attributes {stable_mosaic.version = 11 : i64} {
  func.func @_modality_kernel(%arg0: i32, %arg1: memref<4x1xi32, #tpu.memory_space<vmem>>, %arg2: memref<8x4x12xf32, #tpu.memory_space<vmem>>, %arg3: memref<12x32xf32, #tpu.memory_space<vmem>>, %arg4: memref<12x32xf32, #tpu.memory_space<vmem>>, %arg5: memref<8x32xf32, #tpu.memory_space<vmem>>, %arg6: memref<8x32xf32, #tpu.memory_space<vmem>>, %arg7: memref<1x32xf32, #tpu.memory_space<vmem>>, %arg8: memref<1x32xf32, #tpu.memory_space<vmem>>, %arg9: memref<1x16xf32, #tpu.memory_space<vmem>>, %arg10: memref<1x16xf32, #tpu.memory_space<vmem>>, %arg11: memref<16x32xf32, #tpu.memory_space<vmem>>, %arg12: memref<16x32xf32, #tpu.memory_space<vmem>>, %arg13: memref<8x32xf32, #tpu.memory_space<vmem>>, %arg14: memref<8x32xf32, #tpu.memory_space<vmem>>, %arg15: memref<1x32xf32, #tpu.memory_space<vmem>>, %arg16: memref<1x32xf32, #tpu.memory_space<vmem>>, %arg17: memref<4x32xf32, #tpu.memory_space<vmem>>, %arg18: memref<8x4x8xf32, #tpu.memory_space<vmem>>, %arg19: memref<8x4x8xf32, #tpu.memory_space<vmem>>, %arg20: memref<8x4x16xf32, #tpu.memory_space<vmem>>) attributes {dimension_semantics = [#tpu.dimension_semantics<arbitrary>], iteration_bounds = array<i64: 1>, scalar_prefetch = 0 : i64, scratch_operands = 3 : i64, tpu.core_type = #tpu.core_type<tc>, window_params = [{pipeline_mode = #tpu.pipeline_mode<synchronous>, transform_indices = @transform_0, window_bounds = array<i64: 4, 1>}, {pipeline_mode = #tpu.pipeline_mode<synchronous>, transform_indices = @transform_1, window_bounds = array<i64: 8, 4, 12>}, {pipeline_mode = #tpu.pipeline_mode<synchronous>, transform_indices = @transform_2, window_bounds = array<i64: 12, 32>}, {pipeline_mode = #tpu.pipeline_mode<synchronous>, transform_indices = @transform_3, window_bounds = array<i64: 12, 32>}, {pipeline_mode = #tpu.pipeline_mode<synchronous>, transform_indices = @transform_4, window_bounds = array<i64: 8, 32>}, {pipeline_mode = #tpu.pipeline_mode<synchronous>, transform_indices = @transform_5, window_bounds = array<i64: 8, 32>}, {pipeline_mode = #tpu.pipeline_mode<synchronous>, transform_indices = @transform_6, window_bounds = array<i64: 1, 32>}, {pipeline_mode = #tpu.pipeline_mode<synchronous>, transform_indices = @transform_7, window_bounds = array<i64: 1, 32>}, {pipeline_mode = #tpu.pipeline_mode<synchronous>, transform_indices = @transform_8, window_bounds = array<i64: 1, 16>}, {pipeline_mode = #tpu.pipeline_mode<synchronous>, transform_indices = @transform_9, window_bounds = array<i64: 1, 16>}, {pipeline_mode = #tpu.pipeline_mode<synchronous>, transform_indices = @transform_10, window_bounds = array<i64: 16, 32>}, {pipeline_mode = #tpu.pipeline_mode<synchronous>, transform_indices = @transform_11, window_bounds = array<i64: 16, 32>}, {pipeline_mode = #tpu.pipeline_mode<synchronous>, transform_indices = @transform_12, window_bounds = array<i64: 8, 32>}, {pipeline_mode = #tpu.pipeline_mode<synchronous>, transform_indices = @transform_13, window_bounds = array<i64: 8, 32>}, {pipeline_mode = #tpu.pipeline_mode<synchronous>, transform_indices = @transform_14, window_bounds = array<i64: 1, 32>}, {pipeline_mode = #tpu.pipeline_mode<synchronous>, transform_indices = @transform_15, window_bounds = array<i64: 1, 32>}, {pipeline_mode = #tpu.pipeline_mode<synchronous>, transform_indices = @transform_16, window_bounds = array<i64: 4, 32>}]} {
    %c0 = arith.constant 0 : index
    %c0_0 = arith.constant 0 : index
    %0 = vector.load %arg1[%c0, %c0_0] : memref<4x1xi32, #tpu.memory_space<vmem>>, vector<4x1xi32>
    %c0_1 = arith.constant 0 : index
    %c0_2 = arith.constant 0 : index
    %1 = vector.load %arg3[%c0_1, %c0_2] : memref<12x32xf32, #tpu.memory_space<vmem>>, vector<12x32xf32>
    %c0_3 = arith.constant 0 : index
    %c0_4 = arith.constant 0 : index
    %2 = vector.load %arg4[%c0_3, %c0_4] : memref<12x32xf32, #tpu.memory_space<vmem>>, vector<12x32xf32>
    %c0_5 = arith.constant 0 : index
    %c0_6 = arith.constant 0 : index
    %3 = vector.load %arg5[%c0_5, %c0_6] : memref<8x32xf32, #tpu.memory_space<vmem>>, vector<8x32xf32>
    %c0_7 = arith.constant 0 : index
    %c0_8 = arith.constant 0 : index
    %4 = vector.load %arg6[%c0_7, %c0_8] : memref<8x32xf32, #tpu.memory_space<vmem>>, vector<8x32xf32>
    %c0_9 = arith.constant 0 : index
    %c0_10 = arith.constant 0 : index
    %5 = vector.load %arg7[%c0_9, %c0_10] : memref<1x32xf32, #tpu.memory_space<vmem>>, vector<1x32xf32>
    %c0_11 = arith.constant 0 : index
    %c0_12 = arith.constant 0 : index
    %6 = vector.load %arg8[%c0_11, %c0_12] : memref<1x32xf32, #tpu.memory_space<vmem>>, vector<1x32xf32>
    %c0_13 = arith.constant 0 : index
    %c0_14 = arith.constant 0 : index
    %7 = vector.load %arg11[%c0_13, %c0_14] : memref<16x32xf32, #tpu.memory_space<vmem>>, vector<16x32xf32>
    %c0_15 = arith.constant 0 : index
    %c0_16 = arith.constant 0 : index
    %8 = vector.load %arg12[%c0_15, %c0_16] : memref<16x32xf32, #tpu.memory_space<vmem>>, vector<16x32xf32>
    %c0_17 = arith.constant 0 : index
    %c0_18 = arith.constant 0 : index
    %9 = vector.load %arg13[%c0_17, %c0_18] : memref<8x32xf32, #tpu.memory_space<vmem>>, vector<8x32xf32>
    %c0_19 = arith.constant 0 : index
    %c0_20 = arith.constant 0 : index
    %10 = vector.load %arg14[%c0_19, %c0_20] : memref<8x32xf32, #tpu.memory_space<vmem>>, vector<8x32xf32>
    %c0_21 = arith.constant 0 : index
    %c0_22 = arith.constant 0 : index
    %11 = vector.load %arg15[%c0_21, %c0_22] : memref<1x32xf32, #tpu.memory_space<vmem>>, vector<1x32xf32>
    %c0_23 = arith.constant 0 : index
    %c0_24 = arith.constant 0 : index
    %12 = vector.load %arg16[%c0_23, %c0_24] : memref<1x32xf32, #tpu.memory_space<vmem>>, vector<1x32xf32>
    %cst = arith.constant 0.000000e+00 : f32
    %13 = vector.broadcast %cst : f32 to vector<4x8xf32>
    %c0_i32 = arith.constant 0 : i32
    %c8_i32 = arith.constant 8 : i32
    %14 = arith.addi %c0_i32, %c8_i32 : i32
    %c1_i32 = arith.constant 1 : i32
    %15:4 = scf.for %arg21 = %c0_i32 to %14 step %c1_i32 iter_args(%arg22 = %13, %arg23 = %13, %arg24 = %13, %arg25 = %13) -> (vector<4x8xf32>, vector<4x8xf32>, vector<4x8xf32>, vector<4x8xf32>)  : i32 {
      %c7_i32 = arith.constant 7 : i32
      %50 = arith.subi %c7_i32, %arg21 : i32
      %51 = vector.broadcast %arg21 : i32 to vector<4x1xi32>
      %52 = arith.cmpi slt, %51, %0 : vector<4x1xi32>
      %53 = vector.broadcast %50 : i32 to vector<4x1xi32>
      %54 = arith.cmpi slt, %53, %0 : vector<4x1xi32>
      %55 = arith.index_cast %arg21 : i32 to index
      %c0_50 = arith.constant 0 : index
      %c0_51 = arith.constant 0 : index
      %56 = vector.load %arg2[%55, %c0_50, %c0_51] : memref<8x4x12xf32, #tpu.memory_space<vmem>>, vector<1x4x12xf32>
      %57 = vector.shape_cast %56 : vector<1x4x12xf32> to vector<4x12xf32>
      %cst_52 = arith.constant dense<0.000000e+00> : vector<4x32xf32>
      %58 = tpu.matmul %57, %1, %cst_52 {dimension_numbers = #tpu.dot_dimension_numbers<[1], [0], [0], [1], [0, 0, 1, 1], [], []>} : vector<4x12xf32>, vector<12x32xf32>, vector<4x32xf32> -> vector<4x32xf32>
      %cst_53 = arith.constant dense<0.000000e+00> : vector<4x32xf32>
      %59 = tpu.matmul %arg22, %3, %cst_53 {dimension_numbers = #tpu.dot_dimension_numbers<[1], [0], [0], [1], [0, 0, 1, 1], [], []>} : vector<4x8xf32>, vector<8x32xf32>, vector<4x32xf32> -> vector<4x32xf32>
      %60 = arith.addf %58, %59 : vector<4x32xf32>
      %61 = vector.broadcast %5 : vector<1x32xf32> to vector<4x32xf32>
      %62 = arith.addf %60, %61 : vector<4x32xf32>
      %63 = vector.extract_strided_slice %62 {offsets = [0, 0], sizes = [4, 8], strides = [1, 1]} : vector<4x32xf32> to vector<4x8xf32>
      %64 = arith.negf %63 : vector<4x8xf32>
      %65 = math.exp %64 : vector<4x8xf32>
      %cst_54 = arith.constant 1.000000e+00 : f32
      %66 = vector.broadcast %cst_54 : f32 to vector<4x8xf32>
      %67 = arith.addf %66, %65 : vector<4x8xf32>
      %68 = arith.divf %66, %67 : vector<4x8xf32>
      %69 = vector.extract_strided_slice %62 {offsets = [0, 8], sizes = [4, 8], strides = [1, 1]} : vector<4x32xf32> to vector<4x8xf32>
      %70 = arith.negf %69 : vector<4x8xf32>
      %71 = math.exp %70 : vector<4x8xf32>
      %cst_55 = arith.constant 1.000000e+00 : f32
      %72 = vector.broadcast %cst_55 : f32 to vector<4x8xf32>
      %73 = arith.addf %72, %71 : vector<4x8xf32>
      %74 = arith.divf %72, %73 : vector<4x8xf32>
      %75 = vector.extract_strided_slice %62 {offsets = [0, 16], sizes = [4, 8], strides = [1, 1]} : vector<4x32xf32> to vector<4x8xf32>
      %76 = math.tanh %75 : vector<4x8xf32>
      %77 = vector.extract_strided_slice %62 {offsets = [0, 24], sizes = [4, 8], strides = [1, 1]} : vector<4x32xf32> to vector<4x8xf32>
      %78 = arith.negf %77 : vector<4x8xf32>
      %79 = math.exp %78 : vector<4x8xf32>
      %cst_56 = arith.constant 1.000000e+00 : f32
      %80 = vector.broadcast %cst_56 : f32 to vector<4x8xf32>
      %81 = arith.addf %80, %79 : vector<4x8xf32>
      %82 = arith.divf %80, %81 : vector<4x8xf32>
      %83 = arith.mulf %74, %arg23 : vector<4x8xf32>
      %84 = arith.mulf %68, %76 : vector<4x8xf32>
      %85 = arith.addf %83, %84 : vector<4x8xf32>
      %86 = math.tanh %85 : vector<4x8xf32>
      %87 = arith.mulf %82, %86 : vector<4x8xf32>
      %88 = arith.index_cast %50 : i32 to index
      %c0_57 = arith.constant 0 : index
      %c0_58 = arith.constant 0 : index
      %89 = vector.load %arg2[%88, %c0_57, %c0_58] : memref<8x4x12xf32, #tpu.memory_space<vmem>>, vector<1x4x12xf32>
      %90 = vector.shape_cast %89 : vector<1x4x12xf32> to vector<4x12xf32>
      %cst_59 = arith.constant dense<0.000000e+00> : vector<4x32xf32>
      %91 = tpu.matmul %90, %2, %cst_59 {dimension_numbers = #tpu.dot_dimension_numbers<[1], [0], [0], [1], [0, 0, 1, 1], [], []>} : vector<4x12xf32>, vector<12x32xf32>, vector<4x32xf32> -> vector<4x32xf32>
      %cst_60 = arith.constant dense<0.000000e+00> : vector<4x32xf32>
      %92 = tpu.matmul %arg24, %4, %cst_60 {dimension_numbers = #tpu.dot_dimension_numbers<[1], [0], [0], [1], [0, 0, 1, 1], [], []>} : vector<4x8xf32>, vector<8x32xf32>, vector<4x32xf32> -> vector<4x32xf32>
      %93 = arith.addf %91, %92 : vector<4x32xf32>
      %94 = vector.broadcast %6 : vector<1x32xf32> to vector<4x32xf32>
      %95 = arith.addf %93, %94 : vector<4x32xf32>
      %96 = vector.extract_strided_slice %95 {offsets = [0, 0], sizes = [4, 8], strides = [1, 1]} : vector<4x32xf32> to vector<4x8xf32>
      %97 = arith.negf %96 : vector<4x8xf32>
      %98 = math.exp %97 : vector<4x8xf32>
      %cst_61 = arith.constant 1.000000e+00 : f32
      %99 = vector.broadcast %cst_61 : f32 to vector<4x8xf32>
      %100 = arith.addf %99, %98 : vector<4x8xf32>
      %101 = arith.divf %99, %100 : vector<4x8xf32>
      %102 = vector.extract_strided_slice %95 {offsets = [0, 8], sizes = [4, 8], strides = [1, 1]} : vector<4x32xf32> to vector<4x8xf32>
      %103 = arith.negf %102 : vector<4x8xf32>
      %104 = math.exp %103 : vector<4x8xf32>
      %cst_62 = arith.constant 1.000000e+00 : f32
      %105 = vector.broadcast %cst_62 : f32 to vector<4x8xf32>
      %106 = arith.addf %105, %104 : vector<4x8xf32>
      %107 = arith.divf %105, %106 : vector<4x8xf32>
      %108 = vector.extract_strided_slice %95 {offsets = [0, 16], sizes = [4, 8], strides = [1, 1]} : vector<4x32xf32> to vector<4x8xf32>
      %109 = math.tanh %108 : vector<4x8xf32>
      %110 = vector.extract_strided_slice %95 {offsets = [0, 24], sizes = [4, 8], strides = [1, 1]} : vector<4x32xf32> to vector<4x8xf32>
      %111 = arith.negf %110 : vector<4x8xf32>
      %112 = math.exp %111 : vector<4x8xf32>
      %cst_63 = arith.constant 1.000000e+00 : f32
      %113 = vector.broadcast %cst_63 : f32 to vector<4x8xf32>
      %114 = arith.addf %113, %112 : vector<4x8xf32>
      %115 = arith.divf %113, %114 : vector<4x8xf32>
      %116 = arith.mulf %107, %arg25 : vector<4x8xf32>
      %117 = arith.mulf %101, %109 : vector<4x8xf32>
      %118 = arith.addf %116, %117 : vector<4x8xf32>
      %119 = math.tanh %118 : vector<4x8xf32>
      %120 = arith.mulf %115, %119 : vector<4x8xf32>
      %121 = vector.shape_cast %52 : vector<4x1xi1> to vector<4x1xi1>
      %122 = vector.broadcast %121 : vector<4x1xi1> to vector<4x8xi1>
      %123 = arith.select %122, %87, %arg22 : vector<4x8xi1>, vector<4x8xf32>
      %124 = vector.shape_cast %52 : vector<4x1xi1> to vector<4x1xi1>
      %125 = vector.broadcast %124 : vector<4x1xi1> to vector<4x8xi1>
      %126 = arith.select %125, %85, %arg23 : vector<4x8xi1>, vector<4x8xf32>
      %127 = vector.shape_cast %54 : vector<4x1xi1> to vector<4x1xi1>
      %128 = vector.broadcast %127 : vector<4x1xi1> to vector<4x8xi1>
      %129 = arith.select %128, %120, %arg24 : vector<4x8xi1>, vector<4x8xf32>
      %130 = vector.shape_cast %54 : vector<4x1xi1> to vector<4x1xi1>
      %131 = vector.broadcast %130 : vector<4x1xi1> to vector<4x8xi1>
      %132 = arith.select %131, %118, %arg25 : vector<4x8xi1>, vector<4x8xf32>
      %133 = arith.index_cast %arg21 : i32 to index
      %c0_64 = arith.constant 0 : index
      %c0_65 = arith.constant 0 : index
      %134 = vector.load %arg18[%133, %c0_64, %c0_65] : memref<8x4x8xf32, #tpu.memory_space<vmem>>, vector<1x4x8xf32>
      %135 = vector.shape_cast %134 : vector<1x4x8xf32> to vector<4x8xf32>
      %136 = vector.shape_cast %123 : vector<4x8xf32> to vector<1x4x8xf32>
      tpu.vector_store %arg18[%133, %c0_64, %c0_65], %136 {strides = array<i32>} : memref<8x4x8xf32, #tpu.memory_space<vmem>>, vector<1x4x8xf32>,
      %137 = arith.index_cast %50 : i32 to index
      %c0_66 = arith.constant 0 : index
      %c0_67 = arith.constant 0 : index
      %138 = vector.load %arg19[%137, %c0_66, %c0_67] : memref<8x4x8xf32, #tpu.memory_space<vmem>>, vector<1x4x8xf32>
      %139 = vector.shape_cast %138 : vector<1x4x8xf32> to vector<4x8xf32>
      %140 = vector.shape_cast %129 : vector<4x8xf32> to vector<1x4x8xf32>
      tpu.vector_store %arg19[%137, %c0_66, %c0_67], %140 {strides = array<i32>} : memref<8x4x8xf32, #tpu.memory_space<vmem>>, vector<1x4x8xf32>,
      scf.yield %123, %126, %129, %132 : vector<4x8xf32>, vector<4x8xf32>, vector<4x8xf32>, vector<4x8xf32>
    }
    %c8_i32_25 = arith.constant 8 : i32
    %c0_26 = arith.constant 0 : index
    %c0_27 = arith.constant 0 : index
    %c0_28 = arith.constant 0 : index
    %16 = vector.load %arg18[%c0_26, %c0_27, %c0_28] : memref<8x4x8xf32, #tpu.memory_space<vmem>>, vector<8x4x8xf32>
    %c0_29 = arith.constant 0 : index
    %c0_30 = arith.constant 0 : index
    %c0_31 = arith.constant 0 : index
    %17 = vector.load %arg19[%c0_29, %c0_30, %c0_31] : memref<8x4x8xf32, #tpu.memory_space<vmem>>, vector<8x4x8xf32>
    %18 = tpu.concatenate %16, %17 in 2 : vector<8x4x8xf32>, vector<8x4x8xf32> -> vector<8x4x16xf32>
    %cst_32 = arith.constant dense<0.000000e+00> : vector<8x4xf32>
    %19 = vector.multi_reduction <add>, %18, %cst_32 [2] : vector<8x4x16xf32> to vector<8x4xf32>
    %20 = vector.shape_cast %19 : vector<8x4xf32> to vector<8x4x1xf32>
    %cst_33 = arith.constant 1.600000e+01 : f32
    %21 = vector.broadcast %cst_33 : f32 to vector<8x4x1xf32>
    %22 = arith.divf %20, %21 : vector<8x4x1xf32>
    %23 = vector.broadcast %22 : vector<8x4x1xf32> to vector<8x4x16xf32>
    %24 = arith.subf %18, %23 : vector<8x4x16xf32>
    %25 = arith.mulf %24, %24 : vector<8x4x16xf32>
    %cst_34 = arith.constant dense<0.000000e+00> : vector<8x4xf32>
    %26 = vector.multi_reduction <add>, %25, %cst_34 [2] : vector<8x4x16xf32> to vector<8x4xf32>
    %27 = vector.shape_cast %26 : vector<8x4xf32> to vector<8x4x1xf32>
    %cst_35 = arith.constant 1.600000e+01 : f32
    %28 = vector.broadcast %cst_35 : f32 to vector<8x4x1xf32>
    %29 = arith.divf %27, %28 : vector<8x4x1xf32>
    %30 = vector.broadcast %22 : vector<8x4x1xf32> to vector<8x4x16xf32>
    %31 = arith.subf %18, %30 : vector<8x4x16xf32>
    %cst_36 = arith.constant 9.99999974E-6 : f32
    %32 = vector.broadcast %cst_36 : f32 to vector<8x4x1xf32>
    %33 = arith.addf %29, %32 : vector<8x4x1xf32>
    %34 = math.rsqrt %33 : vector<8x4x1xf32>
    %35 = vector.broadcast %34 : vector<8x4x1xf32> to vector<8x4x16xf32>
    %36 = arith.mulf %31, %35 : vector<8x4x16xf32>
    %c0_37 = arith.constant 0 : index
    %c0_38 = arith.constant 0 : index
    %37 = vector.load %arg9[%c0_37, %c0_38] : memref<1x16xf32, #tpu.memory_space<vmem>>, vector<1x16xf32>
    %38 = vector.shape_cast %37 : vector<1x16xf32> to vector<1x1x16xf32>
    %39 = vector.broadcast %38 : vector<1x1x16xf32> to vector<8x4x16xf32>
    %40 = arith.mulf %36, %39 : vector<8x4x16xf32>
    %c0_39 = arith.constant 0 : index
    %c0_40 = arith.constant 0 : index
    %41 = vector.load %arg10[%c0_39, %c0_40] : memref<1x16xf32, #tpu.memory_space<vmem>>, vector<1x16xf32>
    %42 = vector.shape_cast %41 : vector<1x16xf32> to vector<1x1x16xf32>
    %43 = vector.broadcast %42 : vector<1x1x16xf32> to vector<8x4x16xf32>
    %44 = arith.addf %40, %43 : vector<8x4x16xf32>
    %c0_41 = arith.constant 0 : index
    %c0_42 = arith.constant 0 : index
    %c0_43 = arith.constant 0 : index
    %45 = vector.load %arg20[%c0_41, %c0_42, %c0_43] : memref<8x4x16xf32, #tpu.memory_space<vmem>>, vector<8x4x16xf32>
    tpu.vector_store %arg20[%c0_41, %c0_42, %c0_43], %44 {strides = array<i32>} : memref<8x4x16xf32, #tpu.memory_space<vmem>>, vector<8x4x16xf32>,
    %c0_i32_44 = arith.constant 0 : i32
    %c8_i32_45 = arith.constant 8 : i32
    %46 = arith.addi %c0_i32_44, %c8_i32_45 : i32
    %c1_i32_46 = arith.constant 1 : i32
    %47:4 = scf.for %arg21 = %c0_i32_44 to %46 step %c1_i32_46 iter_args(%arg22 = %13, %arg23 = %13, %arg24 = %13, %arg25 = %13) -> (vector<4x8xf32>, vector<4x8xf32>, vector<4x8xf32>, vector<4x8xf32>)  : i32 {
      %c7_i32 = arith.constant 7 : i32
      %50 = arith.subi %c7_i32, %arg21 : i32
      %51 = vector.broadcast %arg21 : i32 to vector<4x1xi32>
      %52 = arith.cmpi slt, %51, %0 : vector<4x1xi32>
      %53 = vector.broadcast %50 : i32 to vector<4x1xi32>
      %54 = arith.cmpi slt, %53, %0 : vector<4x1xi32>
      %55 = arith.index_cast %arg21 : i32 to index
      %c0_50 = arith.constant 0 : index
      %c0_51 = arith.constant 0 : index
      %56 = vector.load %arg20[%55, %c0_50, %c0_51] : memref<8x4x16xf32, #tpu.memory_space<vmem>>, vector<1x4x16xf32>
      %57 = vector.shape_cast %56 : vector<1x4x16xf32> to vector<4x16xf32>
      %cst_52 = arith.constant dense<0.000000e+00> : vector<4x32xf32>
      %58 = tpu.matmul %57, %7, %cst_52 {dimension_numbers = #tpu.dot_dimension_numbers<[1], [0], [0], [1], [0, 0, 1, 1], [], []>} : vector<4x16xf32>, vector<16x32xf32>, vector<4x32xf32> -> vector<4x32xf32>
      %cst_53 = arith.constant dense<0.000000e+00> : vector<4x32xf32>
      %59 = tpu.matmul %arg22, %9, %cst_53 {dimension_numbers = #tpu.dot_dimension_numbers<[1], [0], [0], [1], [0, 0, 1, 1], [], []>} : vector<4x8xf32>, vector<8x32xf32>, vector<4x32xf32> -> vector<4x32xf32>
      %60 = arith.addf %58, %59 : vector<4x32xf32>
      %61 = vector.broadcast %11 : vector<1x32xf32> to vector<4x32xf32>
      %62 = arith.addf %60, %61 : vector<4x32xf32>
      %63 = vector.extract_strided_slice %62 {offsets = [0, 0], sizes = [4, 8], strides = [1, 1]} : vector<4x32xf32> to vector<4x8xf32>
      %64 = arith.negf %63 : vector<4x8xf32>
      %65 = math.exp %64 : vector<4x8xf32>
      %cst_54 = arith.constant 1.000000e+00 : f32
      %66 = vector.broadcast %cst_54 : f32 to vector<4x8xf32>
      %67 = arith.addf %66, %65 : vector<4x8xf32>
      %68 = arith.divf %66, %67 : vector<4x8xf32>
      %69 = vector.extract_strided_slice %62 {offsets = [0, 8], sizes = [4, 8], strides = [1, 1]} : vector<4x32xf32> to vector<4x8xf32>
      %70 = arith.negf %69 : vector<4x8xf32>
      %71 = math.exp %70 : vector<4x8xf32>
      %cst_55 = arith.constant 1.000000e+00 : f32
      %72 = vector.broadcast %cst_55 : f32 to vector<4x8xf32>
      %73 = arith.addf %72, %71 : vector<4x8xf32>
      %74 = arith.divf %72, %73 : vector<4x8xf32>
      %75 = vector.extract_strided_slice %62 {offsets = [0, 16], sizes = [4, 8], strides = [1, 1]} : vector<4x32xf32> to vector<4x8xf32>
      %76 = math.tanh %75 : vector<4x8xf32>
      %77 = vector.extract_strided_slice %62 {offsets = [0, 24], sizes = [4, 8], strides = [1, 1]} : vector<4x32xf32> to vector<4x8xf32>
      %78 = arith.negf %77 : vector<4x8xf32>
      %79 = math.exp %78 : vector<4x8xf32>
      %cst_56 = arith.constant 1.000000e+00 : f32
      %80 = vector.broadcast %cst_56 : f32 to vector<4x8xf32>
      %81 = arith.addf %80, %79 : vector<4x8xf32>
      %82 = arith.divf %80, %81 : vector<4x8xf32>
      %83 = arith.mulf %74, %arg23 : vector<4x8xf32>
      %84 = arith.mulf %68, %76 : vector<4x8xf32>
      %85 = arith.addf %83, %84 : vector<4x8xf32>
      %86 = math.tanh %85 : vector<4x8xf32>
      %87 = arith.mulf %82, %86 : vector<4x8xf32>
      %88 = arith.index_cast %50 : i32 to index
      %c0_57 = arith.constant 0 : index
      %c0_58 = arith.constant 0 : index
      %89 = vector.load %arg20[%88, %c0_57, %c0_58] : memref<8x4x16xf32, #tpu.memory_space<vmem>>, vector<1x4x16xf32>
      %90 = vector.shape_cast %89 : vector<1x4x16xf32> to vector<4x16xf32>
      %cst_59 = arith.constant dense<0.000000e+00> : vector<4x32xf32>
      %91 = tpu.matmul %90, %8, %cst_59 {dimension_numbers = #tpu.dot_dimension_numbers<[1], [0], [0], [1], [0, 0, 1, 1], [], []>} : vector<4x16xf32>, vector<16x32xf32>, vector<4x32xf32> -> vector<4x32xf32>
      %cst_60 = arith.constant dense<0.000000e+00> : vector<4x32xf32>
      %92 = tpu.matmul %arg24, %10, %cst_60 {dimension_numbers = #tpu.dot_dimension_numbers<[1], [0], [0], [1], [0, 0, 1, 1], [], []>} : vector<4x8xf32>, vector<8x32xf32>, vector<4x32xf32> -> vector<4x32xf32>
      %93 = arith.addf %91, %92 : vector<4x32xf32>
      %94 = vector.broadcast %12 : vector<1x32xf32> to vector<4x32xf32>
      %95 = arith.addf %93, %94 : vector<4x32xf32>
      %96 = vector.extract_strided_slice %95 {offsets = [0, 0], sizes = [4, 8], strides = [1, 1]} : vector<4x32xf32> to vector<4x8xf32>
      %97 = arith.negf %96 : vector<4x8xf32>
      %98 = math.exp %97 : vector<4x8xf32>
      %cst_61 = arith.constant 1.000000e+00 : f32
      %99 = vector.broadcast %cst_61 : f32 to vector<4x8xf32>
      %100 = arith.addf %99, %98 : vector<4x8xf32>
      %101 = arith.divf %99, %100 : vector<4x8xf32>
      %102 = vector.extract_strided_slice %95 {offsets = [0, 8], sizes = [4, 8], strides = [1, 1]} : vector<4x32xf32> to vector<4x8xf32>
      %103 = arith.negf %102 : vector<4x8xf32>
      %104 = math.exp %103 : vector<4x8xf32>
      %cst_62 = arith.constant 1.000000e+00 : f32
      %105 = vector.broadcast %cst_62 : f32 to vector<4x8xf32>
      %106 = arith.addf %105, %104 : vector<4x8xf32>
      %107 = arith.divf %105, %106 : vector<4x8xf32>
      %108 = vector.extract_strided_slice %95 {offsets = [0, 16], sizes = [4, 8], strides = [1, 1]} : vector<4x32xf32> to vector<4x8xf32>
      %109 = math.tanh %108 : vector<4x8xf32>
      %110 = vector.extract_strided_slice %95 {offsets = [0, 24], sizes = [4, 8], strides = [1, 1]} : vector<4x32xf32> to vector<4x8xf32>
      %111 = arith.negf %110 : vector<4x8xf32>
      %112 = math.exp %111 : vector<4x8xf32>
      %cst_63 = arith.constant 1.000000e+00 : f32
      %113 = vector.broadcast %cst_63 : f32 to vector<4x8xf32>
      %114 = arith.addf %113, %112 : vector<4x8xf32>
      %115 = arith.divf %113, %114 : vector<4x8xf32>
      %116 = arith.mulf %107, %arg25 : vector<4x8xf32>
      %117 = arith.mulf %101, %109 : vector<4x8xf32>
      %118 = arith.addf %116, %117 : vector<4x8xf32>
      %119 = math.tanh %118 : vector<4x8xf32>
      %120 = arith.mulf %115, %119 : vector<4x8xf32>
      %121 = vector.shape_cast %52 : vector<4x1xi1> to vector<4x1xi1>
      %122 = vector.broadcast %121 : vector<4x1xi1> to vector<4x8xi1>
      %123 = arith.select %122, %87, %arg22 : vector<4x8xi1>, vector<4x8xf32>
      %124 = vector.shape_cast %52 : vector<4x1xi1> to vector<4x1xi1>
      %125 = vector.broadcast %124 : vector<4x1xi1> to vector<4x8xi1>
      %126 = arith.select %125, %85, %arg23 : vector<4x8xi1>, vector<4x8xf32>
      %127 = vector.shape_cast %54 : vector<4x1xi1> to vector<4x1xi1>
      %128 = vector.broadcast %127 : vector<4x1xi1> to vector<4x8xi1>
      %129 = arith.select %128, %120, %arg24 : vector<4x8xi1>, vector<4x8xf32>
      %130 = vector.shape_cast %54 : vector<4x1xi1> to vector<4x1xi1>
      %131 = vector.broadcast %130 : vector<4x1xi1> to vector<4x8xi1>
      %132 = arith.select %131, %118, %arg25 : vector<4x8xi1>, vector<4x8xf32>
      scf.yield %123, %126, %129, %132 : vector<4x8xf32>, vector<4x8xf32>, vector<4x8xf32>, vector<4x8xf32>
    }
    %c8_i32_47 = arith.constant 8 : i32
    %48 = tpu.concatenate %15#0, %15#2, %47#0, %47#2 in 1 : vector<4x8xf32>, vector<4x8xf32>, vector<4x8xf32>, vector<4x8xf32> -> vector<4x32xf32>
    %c0_48 = arith.constant 0 : index
    %c0_49 = arith.constant 0 : index
    %49 = vector.load %arg17[%c0_48, %c0_49] : memref<4x32xf32, #tpu.memory_space<vmem>>, vector<4x32xf32>
    tpu.vector_store %arg17[%c0_48, %c0_49], %48 {strides = array<i32>} : memref<4x32xf32, #tpu.memory_space<vmem>>, vector<4x32xf32>,
    return
  }
  func.func @transform_0(%arg0: i32) -> (i32, i32) {
    %c0_i32 = arith.constant 0 : i32
    %c0_i32_0 = arith.constant 0 : i32
    %c0_i32_1 = arith.constant 0 : i32
    return %c0_i32, %c0_i32_0 : i32, i32
  }
  func.func @transform_1(%arg0: i32) -> (i32, i32, i32) {
    %c0_i32 = arith.constant 0 : i32
    %c0_i32_0 = arith.constant 0 : i32
    %c0_i32_1 = arith.constant 0 : i32
    %c0_i32_2 = arith.constant 0 : i32
    return %c0_i32, %c0_i32_0, %c0_i32_1 : i32, i32, i32
  }
  func.func @transform_2(%arg0: i32) -> (i32, i32) {
    %c0_i32 = arith.constant 0 : i32
    %c0_i32_0 = arith.constant 0 : i32
    %c0_i32_1 = arith.constant 0 : i32
    return %c0_i32, %c0_i32_0 : i32, i32
  }
  func.func @transform_3(%arg0: i32) -> (i32, i32) {
    %c0_i32 = arith.constant 0 : i32
    %c0_i32_0 = arith.constant 0 : i32
    %c0_i32_1 = arith.constant 0 : i32
    return %c0_i32, %c0_i32_0 : i32, i32
  }
  func.func @transform_4(%arg0: i32) -> (i32, i32) {
    %c0_i32 = arith.constant 0 : i32
    %c0_i32_0 = arith.constant 0 : i32
    %c0_i32_1 = arith.constant 0 : i32
    return %c0_i32, %c0_i32_0 : i32, i32
  }
  func.func @transform_5(%arg0: i32) -> (i32, i32) {
    %c0_i32 = arith.constant 0 : i32
    %c0_i32_0 = arith.constant 0 : i32
    %c0_i32_1 = arith.constant 0 : i32
    return %c0_i32, %c0_i32_0 : i32, i32
  }
  func.func @transform_6(%arg0: i32) -> (i32, i32) {
    %c0_i32 = arith.constant 0 : i32
    %c0_i32_0 = arith.constant 0 : i32
    %c0_i32_1 = arith.constant 0 : i32
    return %c0_i32, %c0_i32_0 : i32, i32
  }
  func.func @transform_7(%arg0: i32) -> (i32, i32) {
    %c0_i32 = arith.constant 0 : i32
    %c0_i32_0 = arith.constant 0 : i32
    %c0_i32_1 = arith.constant 0 : i32
    return %c0_i32, %c0_i32_0 : i32, i32
  }
  func.func @transform_8(%arg0: i32) -> (i32, i32) {
    %c0_i32 = arith.constant 0 : i32
    %c0_i32_0 = arith.constant 0 : i32
    %c0_i32_1 = arith.constant 0 : i32
    return %c0_i32, %c0_i32_0 : i32, i32
  }
  func.func @transform_9(%arg0: i32) -> (i32, i32) {
    %c0_i32 = arith.constant 0 : i32
    %c0_i32_0 = arith.constant 0 : i32
    %c0_i32_1 = arith.constant 0 : i32
    return %c0_i32, %c0_i32_0 : i32, i32
  }
  func.func @transform_10(%arg0: i32) -> (i32, i32) {
    %c0_i32 = arith.constant 0 : i32
    %c0_i32_0 = arith.constant 0 : i32
    %c0_i32_1 = arith.constant 0 : i32
    return %c0_i32, %c0_i32_0 : i32, i32
  }
  func.func @transform_11(%arg0: i32) -> (i32, i32) {
    %c0_i32 = arith.constant 0 : i32
    %c0_i32_0 = arith.constant 0 : i32
    %c0_i32_1 = arith.constant 0 : i32
    return %c0_i32, %c0_i32_0 : i32, i32
  }
  func.func @transform_12(%arg0: i32) -> (i32, i32) {
    %c0_i32 = arith.constant 0 : i32
    %c0_i32_0 = arith.constant 0 : i32
    %c0_i32_1 = arith.constant 0 : i32
    return %c0_i32, %c0_i32_0 : i32, i32
  }
  func.func @transform_13(%arg0: i32) -> (i32, i32) {
    %c0_i32 = arith.constant 0 : i32
    %c0_i32_0 = arith.constant 0 : i32
    %c0_i32_1 = arith.constant 0 : i32
    return %c0_i32, %c0_i32_0 : i32, i32
  }
  func.func @transform_14(%arg0: i32) -> (i32, i32) {
    %c0_i32 = arith.constant 0 : i32
    %c0_i32_0 = arith.constant 0 : i32
    %c0_i32_1 = arith.constant 0 : i32
    return %c0_i32, %c0_i32_0 : i32, i32
  }
  func.func @transform_15(%arg0: i32) -> (i32, i32) {
    %c0_i32 = arith.constant 0 : i32
    %c0_i32_0 = arith.constant 0 : i32
    %c0_i32_1 = arith.constant 0 : i32
    return %c0_i32, %c0_i32_0 : i32, i32
  }
  func.func @transform_16(%arg0: i32) -> (i32, i32) {
    %c0_i32 = arith.constant 0 : i32
    %c0_i32_0 = arith.constant 0 : i32
    %c0_i32_1 = arith.constant 0 : i32
    return %c0_i32, %c0_i32_0 : i32, i32
  }
}

module attributes {stable_mosaic.version = 11 : i64} {
  func.func @_modality_kernel(%arg0: i32, %arg1: memref<4x1xi32, #tpu.memory_space<vmem>>, %arg2: memref<8x4x10xf32, #tpu.memory_space<vmem>>, %arg3: memref<10x24xf32, #tpu.memory_space<vmem>>, %arg4: memref<10x24xf32, #tpu.memory_space<vmem>>, %arg5: memref<6x24xf32, #tpu.memory_space<vmem>>, %arg6: memref<6x24xf32, #tpu.memory_space<vmem>>, %arg7: memref<1x24xf32, #tpu.memory_space<vmem>>, %arg8: memref<1x24xf32, #tpu.memory_space<vmem>>, %arg9: memref<1x12xf32, #tpu.memory_space<vmem>>, %arg10: memref<1x12xf32, #tpu.memory_space<vmem>>, %arg11: memref<12x24xf32, #tpu.memory_space<vmem>>, %arg12: memref<12x24xf32, #tpu.memory_space<vmem>>, %arg13: memref<6x24xf32, #tpu.memory_space<vmem>>, %arg14: memref<6x24xf32, #tpu.memory_space<vmem>>, %arg15: memref<1x24xf32, #tpu.memory_space<vmem>>, %arg16: memref<1x24xf32, #tpu.memory_space<vmem>>, %arg17: memref<4x24xf32, #tpu.memory_space<vmem>>, %arg18: memref<8x4x6xf32, #tpu.memory_space<vmem>>, %arg19: memref<8x4x6xf32, #tpu.memory_space<vmem>>, %arg20: memref<8x4x12xf32, #tpu.memory_space<vmem>>) attributes {dimension_semantics = [#tpu.dimension_semantics<arbitrary>], iteration_bounds = array<i64: 1>, scalar_prefetch = 0 : i64, scratch_operands = 3 : i64, tpu.core_type = #tpu.core_type<tc>, window_params = [{pipeline_mode = #tpu.pipeline_mode<synchronous>, transform_indices = @transform_0, window_bounds = array<i64: 4, 1>}, {pipeline_mode = #tpu.pipeline_mode<synchronous>, transform_indices = @transform_1, window_bounds = array<i64: 8, 4, 10>}, {pipeline_mode = #tpu.pipeline_mode<synchronous>, transform_indices = @transform_2, window_bounds = array<i64: 10, 24>}, {pipeline_mode = #tpu.pipeline_mode<synchronous>, transform_indices = @transform_3, window_bounds = array<i64: 10, 24>}, {pipeline_mode = #tpu.pipeline_mode<synchronous>, transform_indices = @transform_4, window_bounds = array<i64: 6, 24>}, {pipeline_mode = #tpu.pipeline_mode<synchronous>, transform_indices = @transform_5, window_bounds = array<i64: 6, 24>}, {pipeline_mode = #tpu.pipeline_mode<synchronous>, transform_indices = @transform_6, window_bounds = array<i64: 1, 24>}, {pipeline_mode = #tpu.pipeline_mode<synchronous>, transform_indices = @transform_7, window_bounds = array<i64: 1, 24>}, {pipeline_mode = #tpu.pipeline_mode<synchronous>, transform_indices = @transform_8, window_bounds = array<i64: 1, 12>}, {pipeline_mode = #tpu.pipeline_mode<synchronous>, transform_indices = @transform_9, window_bounds = array<i64: 1, 12>}, {pipeline_mode = #tpu.pipeline_mode<synchronous>, transform_indices = @transform_10, window_bounds = array<i64: 12, 24>}, {pipeline_mode = #tpu.pipeline_mode<synchronous>, transform_indices = @transform_11, window_bounds = array<i64: 12, 24>}, {pipeline_mode = #tpu.pipeline_mode<synchronous>, transform_indices = @transform_12, window_bounds = array<i64: 6, 24>}, {pipeline_mode = #tpu.pipeline_mode<synchronous>, transform_indices = @transform_13, window_bounds = array<i64: 6, 24>}, {pipeline_mode = #tpu.pipeline_mode<synchronous>, transform_indices = @transform_14, window_bounds = array<i64: 1, 24>}, {pipeline_mode = #tpu.pipeline_mode<synchronous>, transform_indices = @transform_15, window_bounds = array<i64: 1, 24>}, {pipeline_mode = #tpu.pipeline_mode<synchronous>, transform_indices = @transform_16, window_bounds = array<i64: 4, 24>}]} {
    %c0 = arith.constant 0 : index
    %c0_0 = arith.constant 0 : index
    %0 = vector.load %arg1[%c0, %c0_0] : memref<4x1xi32, #tpu.memory_space<vmem>>, vector<4x1xi32>
    %c0_1 = arith.constant 0 : index
    %c0_2 = arith.constant 0 : index
    %1 = vector.load %arg3[%c0_1, %c0_2] : memref<10x24xf32, #tpu.memory_space<vmem>>, vector<10x24xf32>
    %c0_3 = arith.constant 0 : index
    %c0_4 = arith.constant 0 : index
    %2 = vector.load %arg4[%c0_3, %c0_4] : memref<10x24xf32, #tpu.memory_space<vmem>>, vector<10x24xf32>
    %c0_5 = arith.constant 0 : index
    %c0_6 = arith.constant 0 : index
    %3 = vector.load %arg5[%c0_5, %c0_6] : memref<6x24xf32, #tpu.memory_space<vmem>>, vector<6x24xf32>
    %c0_7 = arith.constant 0 : index
    %c0_8 = arith.constant 0 : index
    %4 = vector.load %arg6[%c0_7, %c0_8] : memref<6x24xf32, #tpu.memory_space<vmem>>, vector<6x24xf32>
    %c0_9 = arith.constant 0 : index
    %c0_10 = arith.constant 0 : index
    %5 = vector.load %arg7[%c0_9, %c0_10] : memref<1x24xf32, #tpu.memory_space<vmem>>, vector<1x24xf32>
    %c0_11 = arith.constant 0 : index
    %c0_12 = arith.constant 0 : index
    %6 = vector.load %arg8[%c0_11, %c0_12] : memref<1x24xf32, #tpu.memory_space<vmem>>, vector<1x24xf32>
    %c0_13 = arith.constant 0 : index
    %c0_14 = arith.constant 0 : index
    %7 = vector.load %arg11[%c0_13, %c0_14] : memref<12x24xf32, #tpu.memory_space<vmem>>, vector<12x24xf32>
    %c0_15 = arith.constant 0 : index
    %c0_16 = arith.constant 0 : index
    %8 = vector.load %arg12[%c0_15, %c0_16] : memref<12x24xf32, #tpu.memory_space<vmem>>, vector<12x24xf32>
    %c0_17 = arith.constant 0 : index
    %c0_18 = arith.constant 0 : index
    %9 = vector.load %arg13[%c0_17, %c0_18] : memref<6x24xf32, #tpu.memory_space<vmem>>, vector<6x24xf32>
    %c0_19 = arith.constant 0 : index
    %c0_20 = arith.constant 0 : index
    %10 = vector.load %arg14[%c0_19, %c0_20] : memref<6x24xf32, #tpu.memory_space<vmem>>, vector<6x24xf32>
    %c0_21 = arith.constant 0 : index
    %c0_22 = arith.constant 0 : index
    %11 = vector.load %arg15[%c0_21, %c0_22] : memref<1x24xf32, #tpu.memory_space<vmem>>, vector<1x24xf32>
    %c0_23 = arith.constant 0 : index
    %c0_24 = arith.constant 0 : index
    %12 = vector.load %arg16[%c0_23, %c0_24] : memref<1x24xf32, #tpu.memory_space<vmem>>, vector<1x24xf32>
    %cst = arith.constant 0.000000e+00 : f32
    %13 = vector.broadcast %cst : f32 to vector<4x6xf32>
    %c0_i32 = arith.constant 0 : i32
    %c8_i32 = arith.constant 8 : i32
    %14 = arith.addi %c0_i32, %c8_i32 : i32
    %c1_i32 = arith.constant 1 : i32
    %15:4 = scf.for %arg21 = %c0_i32 to %14 step %c1_i32 iter_args(%arg22 = %13, %arg23 = %13, %arg24 = %13, %arg25 = %13) -> (vector<4x6xf32>, vector<4x6xf32>, vector<4x6xf32>, vector<4x6xf32>)  : i32 {
      %c7_i32 = arith.constant 7 : i32
      %50 = arith.subi %c7_i32, %arg21 : i32
      %51 = vector.broadcast %arg21 : i32 to vector<4x1xi32>
      %52 = arith.cmpi slt, %51, %0 : vector<4x1xi32>
      %53 = vector.broadcast %50 : i32 to vector<4x1xi32>
      %54 = arith.cmpi slt, %53, %0 : vector<4x1xi32>
      %55 = arith.index_cast %arg21 : i32 to index
      %c0_50 = arith.constant 0 : index
      %c0_51 = arith.constant 0 : index
      %56 = vector.load %arg2[%55, %c0_50, %c0_51] : memref<8x4x10xf32, #tpu.memory_space<vmem>>, vector<1x4x10xf32>
      %57 = vector.shape_cast %56 : vector<1x4x10xf32> to vector<4x10xf32>
      %cst_52 = arith.constant dense<0.000000e+00> : vector<4x24xf32>
      %58 = tpu.matmul %57, %1, %cst_52 {dimension_numbers = #tpu.dot_dimension_numbers<[1], [0], [0], [1], [0, 0, 1, 1], [], []>} : vector<4x10xf32>, vector<10x24xf32>, vector<4x24xf32> -> vector<4x24xf32>
      %cst_53 = arith.constant dense<0.000000e+00> : vector<4x24xf32>
      %59 = tpu.matmul %arg22, %3, %cst_53 {dimension_numbers = #tpu.dot_dimension_numbers<[1], [0], [0], [1], [0, 0, 1, 1], [], []>} : vector<4x6xf32>, vector<6x24xf32>, vector<4x24xf32> -> vector<4x24xf32>
      %60 = arith.addf %58, %59 : vector<4x24xf32>
      %61 = vector.broadcast %5 : vector<1x24xf32> to vector<4x24xf32>
      %62 = arith.addf %60, %61 : vector<4x24xf32>
      %63 = vector.extract_strided_slice %62 {offsets = [0, 0], sizes = [4, 6], strides = [1, 1]} : vector<4x24xf32> to vector<4x6xf32>
      %64 = arith.negf %63 : vector<4x6xf32>
      %65 = math.exp %64 : vector<4x6xf32>
      %cst_54 = arith.constant 1.000000e+00 : f32
      %66 = vector.broadcast %cst_54 : f32 to vector<4x6xf32>
      %67 = arith.addf %66, %65 : vector<4x6xf32>
      %68 = arith.divf %66, %67 : vector<4x6xf32>
      %69 = vector.extract_strided_slice %62 {offsets = [0, 6], sizes = [4, 6], strides = [1, 1]} : vector<4x24xf32> to vector<4x6xf32>
      %70 = arith.negf %69 : vector<4x6xf32>
      %71 = math.exp %70 : vector<4x6xf32>
      %cst_55 = arith.constant 1.000000e+00 : f32
      %72 = vector.broadcast %cst_55 : f32 to vector<4x6xf32>
      %73 = arith.addf %72, %71 : vector<4x6xf32>
      %74 = arith.divf %72, %73 : vector<4x6xf32>
      %75 = vector.extract_strided_slice %62 {offsets = [0, 12], sizes = [4, 6], strides = [1, 1]} : vector<4x24xf32> to vector<4x6xf32>
      %76 = math.tanh %75 : vector<4x6xf32>
      %77 = vector.extract_strided_slice %62 {offsets = [0, 18], sizes = [4, 6], strides = [1, 1]} : vector<4x24xf32> to vector<4x6xf32>
      %78 = arith.negf %77 : vector<4x6xf32>
      %79 = math.exp %78 : vector<4x6xf32>
      %cst_56 = arith.constant 1.000000e+00 : f32
      %80 = vector.broadcast %cst_56 : f32 to vector<4x6xf32>
      %81 = arith.addf %80, %79 : vector<4x6xf32>
      %82 = arith.divf %80, %81 : vector<4x6xf32>
      %83 = arith.mulf %74, %arg23 : vector<4x6xf32>
      %84 = arith.mulf %68, %76 : vector<4x6xf32>
      %85 = arith.addf %83, %84 : vector<4x6xf32>
      %86 = math.tanh %85 : vector<4x6xf32>
      %87 = arith.mulf %82, %86 : vector<4x6xf32>
      %88 = arith.index_cast %50 : i32 to index
      %c0_57 = arith.constant 0 : index
      %c0_58 = arith.constant 0 : index
      %89 = vector.load %arg2[%88, %c0_57, %c0_58] : memref<8x4x10xf32, #tpu.memory_space<vmem>>, vector<1x4x10xf32>
      %90 = vector.shape_cast %89 : vector<1x4x10xf32> to vector<4x10xf32>
      %cst_59 = arith.constant dense<0.000000e+00> : vector<4x24xf32>
      %91 = tpu.matmul %90, %2, %cst_59 {dimension_numbers = #tpu.dot_dimension_numbers<[1], [0], [0], [1], [0, 0, 1, 1], [], []>} : vector<4x10xf32>, vector<10x24xf32>, vector<4x24xf32> -> vector<4x24xf32>
      %cst_60 = arith.constant dense<0.000000e+00> : vector<4x24xf32>
      %92 = tpu.matmul %arg24, %4, %cst_60 {dimension_numbers = #tpu.dot_dimension_numbers<[1], [0], [0], [1], [0, 0, 1, 1], [], []>} : vector<4x6xf32>, vector<6x24xf32>, vector<4x24xf32> -> vector<4x24xf32>
      %93 = arith.addf %91, %92 : vector<4x24xf32>
      %94 = vector.broadcast %6 : vector<1x24xf32> to vector<4x24xf32>
      %95 = arith.addf %93, %94 : vector<4x24xf32>
      %96 = vector.extract_strided_slice %95 {offsets = [0, 0], sizes = [4, 6], strides = [1, 1]} : vector<4x24xf32> to vector<4x6xf32>
      %97 = arith.negf %96 : vector<4x6xf32>
      %98 = math.exp %97 : vector<4x6xf32>
      %cst_61 = arith.constant 1.000000e+00 : f32
      %99 = vector.broadcast %cst_61 : f32 to vector<4x6xf32>
      %100 = arith.addf %99, %98 : vector<4x6xf32>
      %101 = arith.divf %99, %100 : vector<4x6xf32>
      %102 = vector.extract_strided_slice %95 {offsets = [0, 6], sizes = [4, 6], strides = [1, 1]} : vector<4x24xf32> to vector<4x6xf32>
      %103 = arith.negf %102 : vector<4x6xf32>
      %104 = math.exp %103 : vector<4x6xf32>
      %cst_62 = arith.constant 1.000000e+00 : f32
      %105 = vector.broadcast %cst_62 : f32 to vector<4x6xf32>
      %106 = arith.addf %105, %104 : vector<4x6xf32>
      %107 = arith.divf %105, %106 : vector<4x6xf32>
      %108 = vector.extract_strided_slice %95 {offsets = [0, 12], sizes = [4, 6], strides = [1, 1]} : vector<4x24xf32> to vector<4x6xf32>
      %109 = math.tanh %108 : vector<4x6xf32>
      %110 = vector.extract_strided_slice %95 {offsets = [0, 18], sizes = [4, 6], strides = [1, 1]} : vector<4x24xf32> to vector<4x6xf32>
      %111 = arith.negf %110 : vector<4x6xf32>
      %112 = math.exp %111 : vector<4x6xf32>
      %cst_63 = arith.constant 1.000000e+00 : f32
      %113 = vector.broadcast %cst_63 : f32 to vector<4x6xf32>
      %114 = arith.addf %113, %112 : vector<4x6xf32>
      %115 = arith.divf %113, %114 : vector<4x6xf32>
      %116 = arith.mulf %107, %arg25 : vector<4x6xf32>
      %117 = arith.mulf %101, %109 : vector<4x6xf32>
      %118 = arith.addf %116, %117 : vector<4x6xf32>
      %119 = math.tanh %118 : vector<4x6xf32>
      %120 = arith.mulf %115, %119 : vector<4x6xf32>
      %121 = vector.shape_cast %52 : vector<4x1xi1> to vector<4x1xi1>
      %122 = vector.broadcast %121 : vector<4x1xi1> to vector<4x6xi1>
      %123 = arith.select %122, %87, %arg22 : vector<4x6xi1>, vector<4x6xf32>
      %124 = vector.shape_cast %52 : vector<4x1xi1> to vector<4x1xi1>
      %125 = vector.broadcast %124 : vector<4x1xi1> to vector<4x6xi1>
      %126 = arith.select %125, %85, %arg23 : vector<4x6xi1>, vector<4x6xf32>
      %127 = vector.shape_cast %54 : vector<4x1xi1> to vector<4x1xi1>
      %128 = vector.broadcast %127 : vector<4x1xi1> to vector<4x6xi1>
      %129 = arith.select %128, %120, %arg24 : vector<4x6xi1>, vector<4x6xf32>
      %130 = vector.shape_cast %54 : vector<4x1xi1> to vector<4x1xi1>
      %131 = vector.broadcast %130 : vector<4x1xi1> to vector<4x6xi1>
      %132 = arith.select %131, %118, %arg25 : vector<4x6xi1>, vector<4x6xf32>
      %133 = arith.index_cast %arg21 : i32 to index
      %c0_64 = arith.constant 0 : index
      %c0_65 = arith.constant 0 : index
      %134 = vector.load %arg18[%133, %c0_64, %c0_65] : memref<8x4x6xf32, #tpu.memory_space<vmem>>, vector<1x4x6xf32>
      %135 = vector.shape_cast %134 : vector<1x4x6xf32> to vector<4x6xf32>
      %136 = vector.shape_cast %123 : vector<4x6xf32> to vector<1x4x6xf32>
      tpu.vector_store %arg18[%133, %c0_64, %c0_65], %136 {strides = array<i32>} : memref<8x4x6xf32, #tpu.memory_space<vmem>>, vector<1x4x6xf32>,
      %137 = arith.index_cast %50 : i32 to index
      %c0_66 = arith.constant 0 : index
      %c0_67 = arith.constant 0 : index
      %138 = vector.load %arg19[%137, %c0_66, %c0_67] : memref<8x4x6xf32, #tpu.memory_space<vmem>>, vector<1x4x6xf32>
      %139 = vector.shape_cast %138 : vector<1x4x6xf32> to vector<4x6xf32>
      %140 = vector.shape_cast %129 : vector<4x6xf32> to vector<1x4x6xf32>
      tpu.vector_store %arg19[%137, %c0_66, %c0_67], %140 {strides = array<i32>} : memref<8x4x6xf32, #tpu.memory_space<vmem>>, vector<1x4x6xf32>,
      scf.yield %123, %126, %129, %132 : vector<4x6xf32>, vector<4x6xf32>, vector<4x6xf32>, vector<4x6xf32>
    }
    %c8_i32_25 = arith.constant 8 : i32
    %c0_26 = arith.constant 0 : index
    %c0_27 = arith.constant 0 : index
    %c0_28 = arith.constant 0 : index
    %16 = vector.load %arg18[%c0_26, %c0_27, %c0_28] : memref<8x4x6xf32, #tpu.memory_space<vmem>>, vector<8x4x6xf32>
    %c0_29 = arith.constant 0 : index
    %c0_30 = arith.constant 0 : index
    %c0_31 = arith.constant 0 : index
    %17 = vector.load %arg19[%c0_29, %c0_30, %c0_31] : memref<8x4x6xf32, #tpu.memory_space<vmem>>, vector<8x4x6xf32>
    %18 = tpu.concatenate %16, %17 in 2 : vector<8x4x6xf32>, vector<8x4x6xf32> -> vector<8x4x12xf32>
    %cst_32 = arith.constant dense<0.000000e+00> : vector<8x4xf32>
    %19 = vector.multi_reduction <add>, %18, %cst_32 [2] : vector<8x4x12xf32> to vector<8x4xf32>
    %20 = vector.shape_cast %19 : vector<8x4xf32> to vector<8x4x1xf32>
    %cst_33 = arith.constant 1.200000e+01 : f32
    %21 = vector.broadcast %cst_33 : f32 to vector<8x4x1xf32>
    %22 = arith.divf %20, %21 : vector<8x4x1xf32>
    %23 = vector.broadcast %22 : vector<8x4x1xf32> to vector<8x4x12xf32>
    %24 = arith.subf %18, %23 : vector<8x4x12xf32>
    %25 = arith.mulf %24, %24 : vector<8x4x12xf32>
    %cst_34 = arith.constant dense<0.000000e+00> : vector<8x4xf32>
    %26 = vector.multi_reduction <add>, %25, %cst_34 [2] : vector<8x4x12xf32> to vector<8x4xf32>
    %27 = vector.shape_cast %26 : vector<8x4xf32> to vector<8x4x1xf32>
    %cst_35 = arith.constant 1.200000e+01 : f32
    %28 = vector.broadcast %cst_35 : f32 to vector<8x4x1xf32>
    %29 = arith.divf %27, %28 : vector<8x4x1xf32>
    %30 = vector.broadcast %22 : vector<8x4x1xf32> to vector<8x4x12xf32>
    %31 = arith.subf %18, %30 : vector<8x4x12xf32>
    %cst_36 = arith.constant 9.99999974E-6 : f32
    %32 = vector.broadcast %cst_36 : f32 to vector<8x4x1xf32>
    %33 = arith.addf %29, %32 : vector<8x4x1xf32>
    %34 = math.rsqrt %33 : vector<8x4x1xf32>
    %35 = vector.broadcast %34 : vector<8x4x1xf32> to vector<8x4x12xf32>
    %36 = arith.mulf %31, %35 : vector<8x4x12xf32>
    %c0_37 = arith.constant 0 : index
    %c0_38 = arith.constant 0 : index
    %37 = vector.load %arg9[%c0_37, %c0_38] : memref<1x12xf32, #tpu.memory_space<vmem>>, vector<1x12xf32>
    %38 = vector.shape_cast %37 : vector<1x12xf32> to vector<1x1x12xf32>
    %39 = vector.broadcast %38 : vector<1x1x12xf32> to vector<8x4x12xf32>
    %40 = arith.mulf %36, %39 : vector<8x4x12xf32>
    %c0_39 = arith.constant 0 : index
    %c0_40 = arith.constant 0 : index
    %41 = vector.load %arg10[%c0_39, %c0_40] : memref<1x12xf32, #tpu.memory_space<vmem>>, vector<1x12xf32>
    %42 = vector.shape_cast %41 : vector<1x12xf32> to vector<1x1x12xf32>
    %43 = vector.broadcast %42 : vector<1x1x12xf32> to vector<8x4x12xf32>
    %44 = arith.addf %40, %43 : vector<8x4x12xf32>
    %c0_41 = arith.constant 0 : index
    %c0_42 = arith.constant 0 : index
    %c0_43 = arith.constant 0 : index
    %45 = vector.load %arg20[%c0_41, %c0_42, %c0_43] : memref<8x4x12xf32, #tpu.memory_space<vmem>>, vector<8x4x12xf32>
    tpu.vector_store %arg20[%c0_41, %c0_42, %c0_43], %44 {strides = array<i32>} : memref<8x4x12xf32, #tpu.memory_space<vmem>>, vector<8x4x12xf32>,
    %c0_i32_44 = arith.constant 0 : i32
    %c8_i32_45 = arith.constant 8 : i32
    %46 = arith.addi %c0_i32_44, %c8_i32_45 : i32
    %c1_i32_46 = arith.constant 1 : i32
    %47:4 = scf.for %arg21 = %c0_i32_44 to %46 step %c1_i32_46 iter_args(%arg22 = %13, %arg23 = %13, %arg24 = %13, %arg25 = %13) -> (vector<4x6xf32>, vector<4x6xf32>, vector<4x6xf32>, vector<4x6xf32>)  : i32 {
      %c7_i32 = arith.constant 7 : i32
      %50 = arith.subi %c7_i32, %arg21 : i32
      %51 = vector.broadcast %arg21 : i32 to vector<4x1xi32>
      %52 = arith.cmpi slt, %51, %0 : vector<4x1xi32>
      %53 = vector.broadcast %50 : i32 to vector<4x1xi32>
      %54 = arith.cmpi slt, %53, %0 : vector<4x1xi32>
      %55 = arith.index_cast %arg21 : i32 to index
      %c0_50 = arith.constant 0 : index
      %c0_51 = arith.constant 0 : index
      %56 = vector.load %arg20[%55, %c0_50, %c0_51] : memref<8x4x12xf32, #tpu.memory_space<vmem>>, vector<1x4x12xf32>
      %57 = vector.shape_cast %56 : vector<1x4x12xf32> to vector<4x12xf32>
      %cst_52 = arith.constant dense<0.000000e+00> : vector<4x24xf32>
      %58 = tpu.matmul %57, %7, %cst_52 {dimension_numbers = #tpu.dot_dimension_numbers<[1], [0], [0], [1], [0, 0, 1, 1], [], []>} : vector<4x12xf32>, vector<12x24xf32>, vector<4x24xf32> -> vector<4x24xf32>
      %cst_53 = arith.constant dense<0.000000e+00> : vector<4x24xf32>
      %59 = tpu.matmul %arg22, %9, %cst_53 {dimension_numbers = #tpu.dot_dimension_numbers<[1], [0], [0], [1], [0, 0, 1, 1], [], []>} : vector<4x6xf32>, vector<6x24xf32>, vector<4x24xf32> -> vector<4x24xf32>
      %60 = arith.addf %58, %59 : vector<4x24xf32>
      %61 = vector.broadcast %11 : vector<1x24xf32> to vector<4x24xf32>
      %62 = arith.addf %60, %61 : vector<4x24xf32>
      %63 = vector.extract_strided_slice %62 {offsets = [0, 0], sizes = [4, 6], strides = [1, 1]} : vector<4x24xf32> to vector<4x6xf32>
      %64 = arith.negf %63 : vector<4x6xf32>
      %65 = math.exp %64 : vector<4x6xf32>
      %cst_54 = arith.constant 1.000000e+00 : f32
      %66 = vector.broadcast %cst_54 : f32 to vector<4x6xf32>
      %67 = arith.addf %66, %65 : vector<4x6xf32>
      %68 = arith.divf %66, %67 : vector<4x6xf32>
      %69 = vector.extract_strided_slice %62 {offsets = [0, 6], sizes = [4, 6], strides = [1, 1]} : vector<4x24xf32> to vector<4x6xf32>
      %70 = arith.negf %69 : vector<4x6xf32>
      %71 = math.exp %70 : vector<4x6xf32>
      %cst_55 = arith.constant 1.000000e+00 : f32
      %72 = vector.broadcast %cst_55 : f32 to vector<4x6xf32>
      %73 = arith.addf %72, %71 : vector<4x6xf32>
      %74 = arith.divf %72, %73 : vector<4x6xf32>
      %75 = vector.extract_strided_slice %62 {offsets = [0, 12], sizes = [4, 6], strides = [1, 1]} : vector<4x24xf32> to vector<4x6xf32>
      %76 = math.tanh %75 : vector<4x6xf32>
      %77 = vector.extract_strided_slice %62 {offsets = [0, 18], sizes = [4, 6], strides = [1, 1]} : vector<4x24xf32> to vector<4x6xf32>
      %78 = arith.negf %77 : vector<4x6xf32>
      %79 = math.exp %78 : vector<4x6xf32>
      %cst_56 = arith.constant 1.000000e+00 : f32
      %80 = vector.broadcast %cst_56 : f32 to vector<4x6xf32>
      %81 = arith.addf %80, %79 : vector<4x6xf32>
      %82 = arith.divf %80, %81 : vector<4x6xf32>
      %83 = arith.mulf %74, %arg23 : vector<4x6xf32>
      %84 = arith.mulf %68, %76 : vector<4x6xf32>
      %85 = arith.addf %83, %84 : vector<4x6xf32>
      %86 = math.tanh %85 : vector<4x6xf32>
      %87 = arith.mulf %82, %86 : vector<4x6xf32>
      %88 = arith.index_cast %50 : i32 to index
      %c0_57 = arith.constant 0 : index
      %c0_58 = arith.constant 0 : index
      %89 = vector.load %arg20[%88, %c0_57, %c0_58] : memref<8x4x12xf32, #tpu.memory_space<vmem>>, vector<1x4x12xf32>
      %90 = vector.shape_cast %89 : vector<1x4x12xf32> to vector<4x12xf32>
      %cst_59 = arith.constant dense<0.000000e+00> : vector<4x24xf32>
      %91 = tpu.matmul %90, %8, %cst_59 {dimension_numbers = #tpu.dot_dimension_numbers<[1], [0], [0], [1], [0, 0, 1, 1], [], []>} : vector<4x12xf32>, vector<12x24xf32>, vector<4x24xf32> -> vector<4x24xf32>
      %cst_60 = arith.constant dense<0.000000e+00> : vector<4x24xf32>
      %92 = tpu.matmul %arg24, %10, %cst_60 {dimension_numbers = #tpu.dot_dimension_numbers<[1], [0], [0], [1], [0, 0, 1, 1], [], []>} : vector<4x6xf32>, vector<6x24xf32>, vector<4x24xf32> -> vector<4x24xf32>
      %93 = arith.addf %91, %92 : vector<4x24xf32>
      %94 = vector.broadcast %12 : vector<1x24xf32> to vector<4x24xf32>
      %95 = arith.addf %93, %94 : vector<4x24xf32>
      %96 = vector.extract_strided_slice %95 {offsets = [0, 0], sizes = [4, 6], strides = [1, 1]} : vector<4x24xf32> to vector<4x6xf32>
      %97 = arith.negf %96 : vector<4x6xf32>
      %98 = math.exp %97 : vector<4x6xf32>
      %cst_61 = arith.constant 1.000000e+00 : f32
      %99 = vector.broadcast %cst_61 : f32 to vector<4x6xf32>
      %100 = arith.addf %99, %98 : vector<4x6xf32>
      %101 = arith.divf %99, %100 : vector<4x6xf32>
      %102 = vector.extract_strided_slice %95 {offsets = [0, 6], sizes = [4, 6], strides = [1, 1]} : vector<4x24xf32> to vector<4x6xf32>
      %103 = arith.negf %102 : vector<4x6xf32>
      %104 = math.exp %103 : vector<4x6xf32>
      %cst_62 = arith.constant 1.000000e+00 : f32
      %105 = vector.broadcast %cst_62 : f32 to vector<4x6xf32>
      %106 = arith.addf %105, %104 : vector<4x6xf32>
      %107 = arith.divf %105, %106 : vector<4x6xf32>
      %108 = vector.extract_strided_slice %95 {offsets = [0, 12], sizes = [4, 6], strides = [1, 1]} : vector<4x24xf32> to vector<4x6xf32>
      %109 = math.tanh %108 : vector<4x6xf32>
      %110 = vector.extract_strided_slice %95 {offsets = [0, 18], sizes = [4, 6], strides = [1, 1]} : vector<4x24xf32> to vector<4x6xf32>
      %111 = arith.negf %110 : vector<4x6xf32>
      %112 = math.exp %111 : vector<4x6xf32>
      %cst_63 = arith.constant 1.000000e+00 : f32
      %113 = vector.broadcast %cst_63 : f32 to vector<4x6xf32>
      %114 = arith.addf %113, %112 : vector<4x6xf32>
      %115 = arith.divf %113, %114 : vector<4x6xf32>
      %116 = arith.mulf %107, %arg25 : vector<4x6xf32>
      %117 = arith.mulf %101, %109 : vector<4x6xf32>
      %118 = arith.addf %116, %117 : vector<4x6xf32>
      %119 = math.tanh %118 : vector<4x6xf32>
      %120 = arith.mulf %115, %119 : vector<4x6xf32>
      %121 = vector.shape_cast %52 : vector<4x1xi1> to vector<4x1xi1>
      %122 = vector.broadcast %121 : vector<4x1xi1> to vector<4x6xi1>
      %123 = arith.select %122, %87, %arg22 : vector<4x6xi1>, vector<4x6xf32>
      %124 = vector.shape_cast %52 : vector<4x1xi1> to vector<4x1xi1>
      %125 = vector.broadcast %124 : vector<4x1xi1> to vector<4x6xi1>
      %126 = arith.select %125, %85, %arg23 : vector<4x6xi1>, vector<4x6xf32>
      %127 = vector.shape_cast %54 : vector<4x1xi1> to vector<4x1xi1>
      %128 = vector.broadcast %127 : vector<4x1xi1> to vector<4x6xi1>
      %129 = arith.select %128, %120, %arg24 : vector<4x6xi1>, vector<4x6xf32>
      %130 = vector.shape_cast %54 : vector<4x1xi1> to vector<4x1xi1>
      %131 = vector.broadcast %130 : vector<4x1xi1> to vector<4x6xi1>
      %132 = arith.select %131, %118, %arg25 : vector<4x6xi1>, vector<4x6xf32>
      scf.yield %123, %126, %129, %132 : vector<4x6xf32>, vector<4x6xf32>, vector<4x6xf32>, vector<4x6xf32>
    }
    %c8_i32_47 = arith.constant 8 : i32
    %48 = tpu.concatenate %15#0, %15#2, %47#0, %47#2 in 1 : vector<4x6xf32>, vector<4x6xf32>, vector<4x6xf32>, vector<4x6xf32> -> vector<4x24xf32>
    %c0_48 = arith.constant 0 : index
    %c0_49 = arith.constant 0 : index
    %49 = vector.load %arg17[%c0_48, %c0_49] : memref<4x24xf32, #tpu.memory_space<vmem>>, vector<4x24xf32>
    tpu.vector_store %arg17[%c0_48, %c0_49], %48 {strides = array<i32>} : memref<4x24xf32, #tpu.memory_space<vmem>>, vector<4x24xf32>,
    return
  }
  func.func @transform_0(%arg0: i32) -> (i32, i32) {
    %c0_i32 = arith.constant 0 : i32
    %c0_i32_0 = arith.constant 0 : i32
    %c0_i32_1 = arith.constant 0 : i32
    return %c0_i32, %c0_i32_0 : i32, i32
  }
  func.func @transform_1(%arg0: i32) -> (i32, i32, i32) {
    %c0_i32 = arith.constant 0 : i32
    %c0_i32_0 = arith.constant 0 : i32
    %c0_i32_1 = arith.constant 0 : i32
    %c0_i32_2 = arith.constant 0 : i32
    return %c0_i32, %c0_i32_0, %c0_i32_1 : i32, i32, i32
  }
  func.func @transform_2(%arg0: i32) -> (i32, i32) {
    %c0_i32 = arith.constant 0 : i32
    %c0_i32_0 = arith.constant 0 : i32
    %c0_i32_1 = arith.constant 0 : i32
    return %c0_i32, %c0_i32_0 : i32, i32
  }
  func.func @transform_3(%arg0: i32) -> (i32, i32) {
    %c0_i32 = arith.constant 0 : i32
    %c0_i32_0 = arith.constant 0 : i32
    %c0_i32_1 = arith.constant 0 : i32
    return %c0_i32, %c0_i32_0 : i32, i32
  }
  func.func @transform_4(%arg0: i32) -> (i32, i32) {
    %c0_i32 = arith.constant 0 : i32
    %c0_i32_0 = arith.constant 0 : i32
    %c0_i32_1 = arith.constant 0 : i32
    return %c0_i32, %c0_i32_0 : i32, i32
  }
  func.func @transform_5(%arg0: i32) -> (i32, i32) {
    %c0_i32 = arith.constant 0 : i32
    %c0_i32_0 = arith.constant 0 : i32
    %c0_i32_1 = arith.constant 0 : i32
    return %c0_i32, %c0_i32_0 : i32, i32
  }
  func.func @transform_6(%arg0: i32) -> (i32, i32) {
    %c0_i32 = arith.constant 0 : i32
    %c0_i32_0 = arith.constant 0 : i32
    %c0_i32_1 = arith.constant 0 : i32
    return %c0_i32, %c0_i32_0 : i32, i32
  }
  func.func @transform_7(%arg0: i32) -> (i32, i32) {
    %c0_i32 = arith.constant 0 : i32
    %c0_i32_0 = arith.constant 0 : i32
    %c0_i32_1 = arith.constant 0 : i32
    return %c0_i32, %c0_i32_0 : i32, i32
  }
  func.func @transform_8(%arg0: i32) -> (i32, i32) {
    %c0_i32 = arith.constant 0 : i32
    %c0_i32_0 = arith.constant 0 : i32
    %c0_i32_1 = arith.constant 0 : i32
    return %c0_i32, %c0_i32_0 : i32, i32
  }
  func.func @transform_9(%arg0: i32) -> (i32, i32) {
    %c0_i32 = arith.constant 0 : i32
    %c0_i32_0 = arith.constant 0 : i32
    %c0_i32_1 = arith.constant 0 : i32
    return %c0_i32, %c0_i32_0 : i32, i32
  }
  func.func @transform_10(%arg0: i32) -> (i32, i32) {
    %c0_i32 = arith.constant 0 : i32
    %c0_i32_0 = arith.constant 0 : i32
    %c0_i32_1 = arith.constant 0 : i32
    return %c0_i32, %c0_i32_0 : i32, i32
  }
  func.func @transform_11(%arg0: i32) -> (i32, i32) {
    %c0_i32 = arith.constant 0 : i32
    %c0_i32_0 = arith.constant 0 : i32
    %c0_i32_1 = arith.constant 0 : i32
    return %c0_i32, %c0_i32_0 : i32, i32
  }
  func.func @transform_12(%arg0: i32) -> (i32, i32) {
    %c0_i32 = arith.constant 0 : i32
    %c0_i32_0 = arith.constant 0 : i32
    %c0_i32_1 = arith.constant 0 : i32
    return %c0_i32, %c0_i32_0 : i32, i32
  }
  func.func @transform_13(%arg0: i32) -> (i32, i32) {
    %c0_i32 = arith.constant 0 : i32
    %c0_i32_0 = arith.constant 0 : i32
    %c0_i32_1 = arith.constant 0 : i32
    return %c0_i32, %c0_i32_0 : i32, i32
  }
  func.func @transform_14(%arg0: i32) -> (i32, i32) {
    %c0_i32 = arith.constant 0 : i32
    %c0_i32_0 = arith.constant 0 : i32
    %c0_i32_1 = arith.constant 0 : i32
    return %c0_i32, %c0_i32_0 : i32, i32
  }
  func.func @transform_15(%arg0: i32) -> (i32, i32) {
    %c0_i32 = arith.constant 0 : i32
    %c0_i32_0 = arith.constant 0 : i32
    %c0_i32_1 = arith.constant 0 : i32
    return %c0_i32, %c0_i32_0 : i32, i32
  }
  func.func @transform_16(%arg0: i32) -> (i32, i32) {
    %c0_i32 = arith.constant 0 : i32
    %c0_i32_0 = arith.constant 0 : i32
    %c0_i32_1 = arith.constant 0 : i32
    return %c0_i32, %c0_i32_0 : i32, i32
  }
}

module attributes {stable_mosaic.version = 11 : i64} {
  func.func @_head_kernel(%arg0: i32, %arg1: memref<4x72xf32, #tpu.memory_space<vmem>>, %arg2: memref<72x32xf32, #tpu.memory_space<vmem>>, %arg3: memref<1x32xf32, #tpu.memory_space<vmem>>, %arg4: memref<32x2xf32, #tpu.memory_space<vmem>>, %arg5: memref<1x2xf32, #tpu.memory_space<vmem>>, %arg6: memref<4x2xf32, #tpu.memory_space<vmem>>) attributes {dimension_semantics = [#tpu.dimension_semantics<arbitrary>], iteration_bounds = array<i64: 1>, scalar_prefetch = 0 : i64, scratch_operands = 0 : i64, tpu.core_type = #tpu.core_type<tc>, window_params = [{pipeline_mode = #tpu.pipeline_mode<synchronous>, transform_indices = @transform_0, window_bounds = array<i64: 4, 72>}, {pipeline_mode = #tpu.pipeline_mode<synchronous>, transform_indices = @transform_1, window_bounds = array<i64: 72, 32>}, {pipeline_mode = #tpu.pipeline_mode<synchronous>, transform_indices = @transform_2, window_bounds = array<i64: 1, 32>}, {pipeline_mode = #tpu.pipeline_mode<synchronous>, transform_indices = @transform_3, window_bounds = array<i64: 32, 2>}, {pipeline_mode = #tpu.pipeline_mode<synchronous>, transform_indices = @transform_4, window_bounds = array<i64: 1, 2>}, {pipeline_mode = #tpu.pipeline_mode<synchronous>, transform_indices = @transform_5, window_bounds = array<i64: 4, 2>}]} {
    %c0 = arith.constant 0 : index
    %c0_0 = arith.constant 0 : index
    %0 = vector.load %arg1[%c0, %c0_0] : memref<4x72xf32, #tpu.memory_space<vmem>>, vector<4x72xf32>
    %c0_1 = arith.constant 0 : index
    %c0_2 = arith.constant 0 : index
    %1 = vector.load %arg2[%c0_1, %c0_2] : memref<72x32xf32, #tpu.memory_space<vmem>>, vector<72x32xf32>
    %cst = arith.constant dense<0.000000e+00> : vector<4x32xf32>
    %2 = tpu.matmul %0, %1, %cst {dimension_numbers = #tpu.dot_dimension_numbers<[1], [0], [0], [1], [0, 0, 1, 1], [], []>} : vector<4x72xf32>, vector<72x32xf32>, vector<4x32xf32> -> vector<4x32xf32>
    %c0_3 = arith.constant 0 : index
    %c0_4 = arith.constant 0 : index
    %3 = vector.load %arg3[%c0_3, %c0_4] : memref<1x32xf32, #tpu.memory_space<vmem>>, vector<1x32xf32>
    %4 = vector.broadcast %3 : vector<1x32xf32> to vector<4x32xf32>
    %5 = arith.addf %2, %4 : vector<4x32xf32>
    %cst_5 = arith.constant 0.000000e+00 : f32
    %6 = vector.broadcast %cst_5 : f32 to vector<4x32xf32>
    %7 = arith.maximumf %5, %6 : vector<4x32xf32>
    %c0_6 = arith.constant 0 : index
    %c0_7 = arith.constant 0 : index
    %8 = vector.load %arg4[%c0_6, %c0_7] : memref<32x2xf32, #tpu.memory_space<vmem>>, vector<32x2xf32>
    %cst_8 = arith.constant dense<0.000000e+00> : vector<4x2xf32>
    %9 = tpu.matmul %7, %8, %cst_8 {dimension_numbers = #tpu.dot_dimension_numbers<[1], [0], [0], [1], [0, 0, 1, 1], [], []>} : vector<4x32xf32>, vector<32x2xf32>, vector<4x2xf32> -> vector<4x2xf32>
    %c0_9 = arith.constant 0 : index
    %c0_10 = arith.constant 0 : index
    %10 = vector.load %arg5[%c0_9, %c0_10] : memref<1x2xf32, #tpu.memory_space<vmem>>, vector<1x2xf32>
    %11 = vector.broadcast %10 : vector<1x2xf32> to vector<4x2xf32>
    %12 = arith.addf %9, %11 : vector<4x2xf32>
    %c0_11 = arith.constant 0 : index
    %c0_12 = arith.constant 0 : index
    %13 = vector.load %arg6[%c0_11, %c0_12] : memref<4x2xf32, #tpu.memory_space<vmem>>, vector<4x2xf32>
    tpu.vector_store %arg6[%c0_11, %c0_12], %12 {strides = array<i32>} : memref<4x2xf32, #tpu.memory_space<vmem>>, vector<4x2xf32>,
    return
  }
  func.func @transform_0(%arg0: i32) -> (i32, i32) {
    %c0_i32 = arith.constant 0 : i32
    %c0_i32_0 = arith.constant 0 : i32
    %c0_i32_1 = arith.constant 0 : i32
    return %c0_i32, %c0_i32_0 : i32, i32
  }
  func.func @transform_1(%arg0: i32) -> (i32, i32) {
    %c0_i32 = arith.constant 0 : i32
    %c0_i32_0 = arith.constant 0 : i32
    %c0_i32_1 = arith.constant 0 : i32
    return %c0_i32, %c0_i32_0 : i32, i32
  }
  func.func @transform_2(%arg0: i32) -> (i32, i32) {
    %c0_i32 = arith.constant 0 : i32
    %c0_i32_0 = arith.constant 0 : i32
    %c0_i32_1 = arith.constant 0 : i32
    return %c0_i32, %c0_i32_0 : i32, i32
  }
  func.func @transform_3(%arg0: i32) -> (i32, i32) {
    %c0_i32 = arith.constant 0 : i32
    %c0_i32_0 = arith.constant 0 : i32
    %c0_i32_1 = arith.constant 0 : i32
    return %c0_i32, %c0_i32_0 : i32, i32
  }
  func.func @transform_4(%arg0: i32) -> (i32, i32) {
    %c0_i32 = arith.constant 0 : i32
    %c0_i32_0 = arith.constant 0 : i32
    %c0_i32_1 = arith.constant 0 : i32
    return %c0_i32, %c0_i32_0 : i32, i32
  }
  func.func @transform_5(%arg0: i32) -> (i32, i32) {
    %c0_i32 = arith.constant 0 : i32
    %c0_i32_0 = arith.constant 0 : i32
    %c0_i32_1 = arith.constant 0 : i32
    return %c0_i32, %c0_i32_0 : i32, i32
  }
}

</mosaic_0001>

<bundles_post_ra>
// kernel: lflstm_forward.4
= control target key start
LH: loop header
LB: loop body
LE: loop exit
PB: predicated region body
PF: predicated region fallthrough
CT: control target
= control target key end

     0   :  { %v1679_v17 = vmov 0.0   ;;  %v1681_v18 = vmov 0.0   ;;  %v1683_v19 = vmov 0.0   ;;  %v1685_v20 = vmov 0.0   ;;  %s1936_s0 = inlined_call_operand.vmem [shape: s32[4,1], index: 0, kind: input, shape index: {}]   ;;  %s1937_s1 = inlined_call_operand.vmem [shape: f32[8,4,12], index: 1, kind: input, shape index: {}]   ;;  %s1938_s2 = inlined_call_operand.vmem [shape: f32[12,32], index: 2, kind: input, shape index: {}]   ;;  %s1939_s3 = inlined_call_operand.vmem [shape: f32[12,32], index: 3, kind: input, shape index: {}]   ;;  %s1940_s4 = inlined_call_operand.vmem [shape: f32[8,32], index: 4, kind: input, shape index: {}]   ;;  %s1941_s5 = inlined_call_operand.vmem [shape: f32[8,32], index: 5, kind: input, shape index: {}]   ;;  %s1942_s6 = inlined_call_operand.vmem [shape: f32[1,32], index: 6, kind: input, shape index: {}]   ;;  %s1943_s7 = inlined_call_operand.vmem [shape: f32[1,32], index: 7, kind: input, shape index: {}]   ;;  %s1944_s8 = inlined_call_operand.vmem [shape: f32[1,16], index: 8, kind: input, shape index: {}]   ;;  %s1945_s9 = inlined_call_operand.vmem [shape: f32[1,16], index: 9, kind: input, shape index: {}]   ;;  %s1946_s16 = inlined_call_operand.vmem [shape: f32[4,32], index: 16, kind: output, shape index: {}]   ;;  %s1947_s10 = inlined_call_operand.vmem [shape: f32[16,32], index: 10, kind: input, shape index: {}]   ;;  %s1948_s11 = inlined_call_operand.vmem [shape: f32[16,32], index: 11, kind: input, shape index: {}]   ;;  %s1949_s12 = inlined_call_operand.vmem [shape: f32[8,32], index: 12, kind: input, shape index: {}]   ;;  %s1950_s13 = inlined_call_operand.vmem [shape: f32[8,32], index: 13, kind: input, shape index: {}]   ;;  %s1951_s14 = inlined_call_operand.vmem [shape: f32[1,32], index: 14, kind: input, shape index: {}]   ;;  %s1952_s15 = inlined_call_operand.vmem [shape: f32[1,32], index: 15, kind: input, shape index: {}]  }
   0x1   :  { %1953 = sst [smem:[#allocation5_spill]] %s1936_s0  ;;  %v1602_v1 = vld [vmem:[%s1938_s2] sm:$0xff]  ;;  %v1607_v2 = vld [vmem:[%s1938_s2 + $0x8] sm:$0xf] }
   0x2   :  { %s1954_s23 = sld [smem:[#allocation5_spill]]  ;;  %v1612_v3 = vld [vmem:[%s1939_s3] sm:$0xff]  ;;  %v1617_v4 = vld [vmem:[%s1939_s3 + $0x8] sm:$0xf] }
   0x3   :  { %v1622_v5 = vld [vmem:[%s1940_s4] sm:$0xff]  ;;  %v1647_v10 = vld [vmem:[%s1947_s10 + $0x8] sm:$0xff] }
   0x4   :  { %v1627_v6 = vld [vmem:[%s1941_s5] sm:$0xff]  ;;  %v1657_v12 = vld [vmem:[%s1948_s11 + $0x8] sm:$0xff] }
   0x5   :  { %v1632_v7 = vld [vmem:[%s1942_s6] ss:$0 sm:$0xff] }
   0x6   :  { %v1637_v8 = vld [vmem:[%s1943_s7] ss:$0 sm:$0xff] }
   0x7   :  { %v1642_v9 = vld [vmem:[%s1947_s10] sm:$0xff] }
   0x8   :  { %v1597_v0 = vld [vmem:[%s1954_s23] sm:$0xf] }
   0x9   :  { %v1652_v11 = vld [vmem:[%s1948_s11] sm:$0xff]  ;;  %s1687_s11 = smov 0  }
   0xa   :  { %v1662_v13 = vld [vmem:[%s1949_s12] sm:$0xff] }
   0xb   :  { %v1667_v14 = vld [vmem:[%s1950_s13] sm:$0xff] }
   0xc   :  { %v1672_v15 = vld [vmem:[%s1951_s14] ss:$0 sm:$0xff] }
   0xd   :  { %v1677_v16 = vld [vmem:[%s1952_s15] ss:$0 sm:$0xff] }
   0xe LB: > { %vm168_vm0 = vcmask 1043456   ;;  %v1488_v21 = vmov 0.0|0.0   ;;  %v1242_v22 = vpack.c.bf16 %v1607_v2, %v1602_v1  ;;  %s1489_s12 = smov 104   ;;  %vm1490_vm1 = vmmov 1   ;;  %s1149_s13 = sshll.u32 %s1466_s11, 2  ;;  %s1466_s11 = sphi %s1687_s11, %s75_s11   ;;  %v1462_v20 = vphi %v1685_v20, %v1960_v20   ;;  %v1458_v19 = vphi %v1683_v19, %v464_v19   ;;  %v1454_v18 = vphi %v1681_v18, %v1959_v18   ;;  %v1450_v17 = vphi %v1679_v17, %v471_v17  }
   0xf   : > { %1241 = vmatprep.subr.bf16.mxu1 %v1488_v21  ;;  %89 = vrot.lane.b32.xlu0 %v1462_v20, %s1489_s12  ;;  %vm1708_vm2 = vmpackc.low %vm168_vm0, %vm1490_vm1  ;;  %s80_s14 = ssub.s32 7, %s1466_s11  ;;  %v1491_v24 = vmov 0.0   ;;  %s86_s20 = scalar_lea.vmem %s1937_s1, %s1149_s13  ;;  %vm164_vm3 = vcmask 97280   ;;  %vm1492_vm4 = vmmov 0   ;;  %v1246_v26 = vpack.c.bf16 %v1617_v4, %v1612_v3 }
  0x10   : > { %1244 = vmatpush3.bf16.msk.msra.mxu1 %vm1708_vm2, %v1242_v22  ;;  %1193 = vmatprep.subr.mxu0 %v1491_v24  ;;  %s1723_s2 = sshll.u32 %s80_s14, 2  ;;  %v87_v25 = vld [vmem:[%s86_s20] sm:$0xf]  ;;  %vm91_vm5 = vcmask 64512   ;;  %v1493_v42 = vmov 0   ;;  %s1494_s3 = smov 112   ;;  %v81_v51 = vstv %s1466_s11  ;;  %v83_v55 = vstv %s80_s14 }
  0x11   : > { %1194 = vmatpush3.msra.mxu0 %v1622_v5  ;;  %1202 = vmatprep.mubr.msk.f32.mxu1 %vm1492_vm4, %v1491_v24  ;;  %s274_s23 = scalar_lea.vmem %s1937_s1, %s1723_s2  ;;  %vm82_vm6 = vcmp.lt.s32.totalorder %v81_v51, %v1597_v0  ;;  %s1495_s24 = smov 8   ;;  %vm84_vm7 = vcmp.lt.s32.totalorder %v83_v55, %v1597_v0  ;;  %vm477_vm10 = vcmask 60416  }
  0x12   : > { %1195 = vmatprep.mubr.msk.f32.mxu0 %vm1492_vm4, %v1491_v24  ;;  %1205 = vmatprep.subr.mxu0 %v1491_v24  ;;  %v275_v27 = vld [vmem:[%s274_s23] sm:$0xf]  ;;  %v458_v58 = vsel %vm82_vm6, 1, %v1493_v42  ;;  %v465_v60 = vsel %vm84_vm7, 1, %v1493_v42  ;;  %s1496_s4 = smov 16   ;;  %s476_s25 = scalar_lea.vmem [#allocation2], %s1149_s13 }
  0x13   : > { %277 = vrot.lane.b32.xlu0 %v1454_v18, %s1489_s12  ;;  %1203 = vmatmul.mubr.msk.f32.vlgmr.msra.gmra.mrb[0].mxu1 %vm164_vm3, %v87_v25  ;;  %s483_s5 = scalar_lea.vmem [#allocation3], %s1723_s2  ;;  %s75_s11 = sadd.s32 1, %s1466_s11  }
  0x14   : > { %1245 = vmatprep.subr.bf16.mxu1 %v1488_v21  ;;  %1214 = vmatprep.mubr.msk.f32.mxu1 %vm1492_vm4, %v1491_v24  ;;  %p72_p0 = scmp.ge.s32.totalorder %s75_s11, 8  }
  0x15   : > { %1248 = vmatpush3.bf16.msk.msra.mxu1 %vm1708_vm2, %v1246_v26  ;;  %1356 = vset.pattern.permute.xlu0 %v1493_v42  ;;  %s1497_s26 = smov (%p72_p0), 8   ;;  %vm542_vm11 = vcmask (%p72_p0), 125952  }
  0x16   : > { %1357 = vset.pattern.permute.xlu1 %v1493_v42 }
  0x18   : > { %1215 = vmatmul.mubr.msk.f32.vlgmr.msra.gmra.mrb[2].mxu1 %vm164_vm3, %v275_v27 }
  0x81   : > { %v90_v28 = vpop.permute.xlu0 %89 }
  0x82   : > { %1196 = vmatmul.mubr.msk.f32.vlgmr.msra.gmra.mrb[0].mxu0 %vm91_vm5, %v90_v28 }
  0x83   : > { %1206 = vmatpush3.msra.mxu0 %v1627_v6  ;;  %1207 = vmatprep.mubr.msk.f32.mxu0 %vm1492_vm4, %v1491_v24 }
  0x85   : > { %v278_v29 = vpop.permute.xlu0 %277 }
  0x86   : > { %1208 = vmatmul.mubr.msk.f32.vlgmr.msra.gmra.mrb[2].mxu0 %vm91_vm5, %v278_v29 }
  0xe6   : > { %v238_v30 = vpop.f32.mrb[0].mxu1 }
  0xe7   : > { %v1204_v31 = vpop.f32.mrb[1].mxu1 }
  0xeb   : > { %v423_v32 = vpop.f32.mrb[2].mxu1 }
  0xec   : > { %v1216_v33 = vpop.f32.mrb[3].mxu1 }
 0x155   : > { %v160_v34 = vpop.f32.mrb[0].mxu0 }
 0x156   : > { %v239_v35 = vadd.f32 %v238_v30, %v160_v34  ;;  %v1197_v36 = vpop.f32.mrb[1].mxu0 }
 0x158   : > { %v248_v37 = vadd.f32 %v1632_v7, %v239_v35 }
 0x159   : > { %v347_v38 = vpop.f32.mrb[2].mxu0 }
 0x15a   : > { %1358 = vtanh.f32 %v248_v37  ;;  %v424_v39 = vadd.f32 %v423_v32, %v347_v38  ;;  %v1209_v40 = vpop.f32.mrb[3].mxu0  ;;  %v1154_v45 = vmul.f32 -1.442695, %v248_v37 }
 0x15c   : > { %v433_v41 = vadd.f32 %v1637_v8, %v424_v39 }
 0x15e   : > { %1360 = vtanh.f32 %v433_v41  ;;  %v1160_v46 = vmul.f32 -1.442695, %v433_v41 }
 0x15f   : > { %1362 = vpow2.f32 %v1154_v45 }
 0x160   : > { %1364 = vpow2.f32 %v1160_v46 }
 0x164   : > { %v1359_v43 = vpop.eup %1358 }
 0x165   : > { %258 = vrot.lane.b32.xlu1 %v1359_v43, %s1494_s3 }
 0x168   : > { %v1361_v44 = vpop.eup %1360 }
 0x169   : > { %443 = vrot.lane.b32.xlu1 %v1361_v44, %s1494_s3  ;;  %v1363_v47 = vpop.eup %1362 }
 0x16a   : > { %v252_v48 = vadd.f32 1.0, %v1363_v47  ;;  %v1365_v49 = vpop.eup %1364 }
 0x16b   : > { %v437_v50 = vadd.f32 1.0, %v1365_v49 }
 0x16c   : > { %1366 = vrcp.f32 %v252_v48 }
 0x16d   : > { %1368 = vrcp.f32 %v437_v50 }
 0x176   : > { %v1367_v52 = vpop.eup %1366 }
 0x177   : > { %v1369_v56 = vpop.eup %1368  ;;  %v256_v61 = vmul.f32 %v1458_v19, %v1367_v52 }
 0x178   : > { %v441_v21 = vmul.f32 %v1450_v17, %v1369_v56 }
 0x1d7   : > { %v259_v53 = vpop.permute.xlu1 %258 }
 0x1d8   : > { %v261_v54 = vmul.f32 %v1367_v52, %v259_v53 }
 0x1da   : > { %263 = vrot.lane.b32.xlu0 %v261_v54, %s1495_s24 }
 0x1db   : > { %v444_v57 = vpop.permute.xlu1 %443 }
 0x1dc   : > { %v446_v59 = vmul.f32 %v1369_v56, %v444_v57 }
 0x1de   : > { %460 = vperm.xlu0 %1356, %v458_v58   ;;  %448 = vrot.lane.b32.xlu1 %v446_v59, %s1495_s24 }
 0x1e2   : > { %467 = vperm.xlu1 %1357, %v465_v60  }
 0x24c   : > { %v264_v62 = vpop.permute.xlu0 %263 }
 0x24d   : > { %v266_v63 = vadd.f32 %v264_v62, %v256_v61 }
 0x24f   : > { %1370 = vtanh.f32 %v266_v63 }
 0x250   : > { %v449_v22 = vpop.permute.xlu1 %448 }
 0x251   : > { %v451_v23 = vadd.f32 %v449_v22, %v441_v21 }
 0x253   : > { %1372 = vtanh.f32 %v451_v23 }
 0x259   : > { %v1371_v24 = vpop.eup %1370 }
 0x25a   : > { %269 = vrot.lane.b32.xlu1 %v1371_v24, %s1496_s4 }
 0x25d   : > { %v1373_v25 = vpop.eup %1372  ;;  %v461_v26 = vpop.permute.xlu0 %460 }
 0x25e   : > { %vm462_vm8 = vcmp.eq.s32.totalorder %v461_v26, 1  ;;  %454 = vrot.lane.b32.xlu0 %v1373_v25, %s1496_s4 }
 0x25f   : > { %v464_v19 = vsel %vm462_vm8, %v266_v63, %v1458_v19  }
 0x261   : > { %v468_v27 = vpop.permute.xlu1 %467 }
 0x262   : > { %vm469_vm9 = vcmp.eq.s32.totalorder %v468_v27, 1 }
 0x263   : > { %v471_v17 = vsel %vm469_vm9, %v451_v23, %v1450_v17  }
 0x2cc   : > { %v270_v28 = vpop.permute.xlu1 %269 }
 0x2cd   : > { %v272_v29 = vmul.f32 %v1367_v52, %v270_v28 }
 0x2cf   : > { %v1757_v20 = vsel %vm462_vm8, %v272_v29, %v1462_v20  }
 0x2d0   : > { %v1957_v30 = vmov %v1757_v20  ;;  %v455_v31 = vpop.permute.xlu0 %454 }
 0x2d1   : > { %473 = vrot.lane.b32.xlu1 %v1957_v30, %s1489_s12  ;;  %v457_v32 = vmul.f32 %v1369_v56, %v455_v31  ;;  %v1960_v20 = vmov %v1957_v30 }
 0x2d3   : > { %v1762_v18 = vsel %vm469_vm9, %v457_v32, %v1454_v18  }
 0x2d4   : > { %v1958_v33 = vmov %v1762_v18 }
 0x2d5   : > { %480 = vrot.lane.b32.xlu0 %v1958_v33, %s1489_s12  ;;  %v1959_v18 = vmov %v1958_v33 }
 0x342   :  { %74 = sbr.rel (!%p72_p0) target bundleno = 14 (0xe), region = 104 }
 0x343   : > { %v474_v34 = vpop.permute.xlu1 %473 }
 0x344   : > { %478 = vst.msk [vmem:[%s476_s25] sm:$0xf] %vm477_vm10, %v474_v34 }
 0x347   : > { %v481_v35 = vpop.permute.xlu0 %480 }
 0x348   : > { %484 = vst.msk [vmem:[%s483_s5] sm:$0xf] %vm477_vm10, %v481_v35 }
 0x34b   :  { %v485_v43 = vld [vmem:[#allocation2] sm:$0xf]  ;;  %v487_v44 = vld [vmem:[#allocation2 + $0x8] sm:$0xf]  ;;  %v486_v6 = vld [vmem:[#allocation2 + $0x4] sm:$0xf] }
 0x34c   :  { %v488_v7 = vld [vmem:[#allocation2 + $0xc] sm:$0xf]  ;;  %v489_v47 = vld [vmem:[#allocation2 + $0x10] sm:$0xf]  ;;  %v490_v48 = vld [vmem:[#allocation2 + $0x14] sm:$0xf] }
 0x34d   :  { %v491_v55 = vld [vmem:[#allocation2 + $0x18] sm:$0xf]  ;;  %v492_v56 = vld [vmem:[#allocation2 + $0x1c] sm:$0xf] }
 0x34f   :  { %v493_v20 = vld [vmem:[#allocation3] sm:$0xf]  ;;  %v495_v36 = vld [vmem:[#allocation3 + $0x8] sm:$0xf]  ;;  %v494_v37 = vld [vmem:[#allocation3 + $0x4] sm:$0xf] }
 0x350   :  { %509 = vrot.lane.b32.xlu0 %v493_v20, %s1497_s26  ;;  %513 = vrot.lane.b32.xlu1 %v495_v36, %s1497_s26  ;;  %v496_v38 = vld [vmem:[#allocation3 + $0xc] sm:$0xf]  ;;  %v497_v39 = vld [vmem:[#allocation3 + $0x10] sm:$0xf]  ;;  %v498_v40 = vld [vmem:[#allocation3 + $0x14] sm:$0xf] }
 0x351   :  { %v499_v41 = vld [vmem:[#allocation3 + $0x18] sm:$0xf]  ;;  %v500_v42 = vld [vmem:[#allocation3 + $0x1c] sm:$0xf] }
 0x354   :  { %511 = vrot.lane.b32.xlu0 %v494_v37, %s1497_s26  ;;  %515 = vrot.lane.b32.xlu1 %v496_v38, %s1497_s26 }
 0x358   :  { %517 = vrot.lane.b32.xlu0 %v497_v39, %s1497_s26  ;;  %519 = vrot.lane.b32.xlu1 %v498_v40, %s1497_s26 }
 0x35c   :  { %521 = vrot.lane.b32.xlu0 %v499_v41, %s1497_s26  ;;  %523 = vrot.lane.b32.xlu1 %v500_v42, %s1497_s26 }
 0x3c2   :  { %v510_v1 = vpop.permute.xlu0 %509  ;;  %v514_v2 = vpop.permute.xlu1 %513 }
 0x3c3   :  { %v534_v3 = vsel %vm91_vm5, %v485_v43, %v510_v1  ;;  %v536_v4 = vsel %vm91_vm5, %v487_v44, %v514_v2 }
 0x3c4   :  { %v543_v5 = vsel %vm542_vm11, %v534_v3, 0.0  ;;  %v549_v17 = vsel %vm542_vm11, %v536_v4, 0.0 }
 0x3c5   :  { %544 = vadd.xlane.f32.xlu0 %v543_v5 }
 0x3c6   :  { %v512_v8 = vpop.permute.xlu0 %511  ;;  %v516_v18 = vpop.permute.xlu1 %515 }
 0x3c7   :  { %v535_v19 = vsel %vm91_vm5, %v486_v6, %v512_v8  ;;  %v537_v45 = vsel %vm91_vm5, %v488_v7, %v516_v18 }
 0x3c8   :  { %v546_v46 = vsel %vm542_vm11, %v535_v19, 0.0  ;;  %v552_v50 = vsel %vm542_vm11, %v537_v45, 0.0 }
 0x3c9   :  { %547 = vadd.xlane.f32.xlu1 %v546_v46  ;;  %550 = vadd.xlane.f32.xlu0 %v549_v17 }
 0x3ca   :  { %v518_v49 = vpop.permute.xlu0 %517  ;;  %v520_v51 = vpop.permute.xlu1 %519 }
 0x3cb   :  { %v538_v52 = vsel %vm91_vm5, %v489_v47, %v518_v49  ;;  %v539_v53 = vsel %vm91_vm5, %v490_v48, %v520_v51 }
 0x3cc   :  { %v555_v54 = vsel %vm542_vm11, %v538_v52, 0.0  ;;  %v558_v58 = vsel %vm542_vm11, %v539_v53, 0.0 }
 0x3cd   :  { %556 = vadd.xlane.f32.xlu1 %v555_v54  ;;  %553 = vadd.xlane.f32.xlu0 %v552_v50 }
 0x3ce   :  { %v522_v57 = vpop.permute.xlu0 %521  ;;  %v524_v59 = vpop.permute.xlu1 %523 }
 0x3cf   :  { %v540_v60 = vsel %vm91_vm5, %v491_v55, %v522_v57  ;;  %v541_v61 = vsel %vm91_vm5, %v492_v56, %v524_v59 }
 0x3d0   :  { %v561_v62 = vsel %vm542_vm11, %v540_v60, 0.0  ;;  %v564_v63 = vsel %vm542_vm11, %v541_v61, 0.0 }
 0x3d1   :  { %562 = vadd.xlane.f32.xlu1 %v561_v62  ;;  %559 = vadd.xlane.f32.xlu0 %v558_v58 }
 0x3d5   :  { %565 = vadd.xlane.f32.xlu0 %v564_v63 }
 0x452   :  { %v545_v21 = vpop.xlane.xlu0 %544 }
 0x453   :  { %v568_v22 = vmul.f32 0.0625, %v545_v21 }
 0x455   :  { %v1798_v23 = vsub.f32 %v534_v3, %v568_v22 }
 0x456   :  { %v548_v24 = vpop.xlane.xlu1 %547  ;;  %v551_v25 = vpop.xlane.xlu0 %550 }
 0x457   :  { %v569_v26 = vmul.f32 0.0625, %v548_v24  ;;  %v570_v27 = vmul.f32 0.0625, %v551_v25  ;;  %v584_v28 = vmul.f32 %v1798_v23, %v1798_v23 }
 0x459   :  { %v1802_v29 = vsub.f32 %v535_v19, %v569_v26  ;;  %v1804_v31 = vsub.f32 %v536_v4, %v570_v27  ;;  %v592_v32 = vsel %vm542_vm11, %v584_v28, 0.0 }
 0x45a   :  { %v557_v34 = vpop.xlane.xlu1 %556  ;;  %593 = vadd.xlane.f32.xlu1 %v592_v32  ;;  %v554_v35 = vpop.xlane.xlu0 %553  ;;  %v1161_v32 = vld [vmem:[%s1944_s8] ss:$0 sm:$0xff]  ;;  %s1868_s8 = smov 0  }
 0x45b   :  { %v572_v20 = vmul.f32 0.0625, %v557_v34  ;;  %v571_v36 = vmul.f32 0.0625, %v554_v35  ;;  %v585_v37 = vmul.f32 %v1802_v29, %v1802_v29  ;;  %v586_v38 = vmul.f32 %v1804_v31, %v1804_v31 }
 0x45d   :  { %v1811_v39 = vsub.f32 %v538_v52, %v572_v20  ;;  %v1813_v40 = vsub.f32 %v537_v45, %v571_v36  ;;  %v595_v41 = vsel %vm542_vm11, %v585_v37, 0.0  ;;  %v598_v42 = vsel %vm542_vm11, %v586_v38, 0.0  ;;  %v1162_v37 = vld [vmem:[%s1945_s9] ss:$0 sm:$0xff] }
 0x45e   :  { %v563_v43 = vpop.xlane.xlu1 %562  ;;  %596 = vadd.xlane.f32.xlu0 %v595_v41  ;;  %599 = vadd.xlane.f32.xlu1 %v598_v42  ;;  %v560_v44 = vpop.xlane.xlu0 %559 }
 0x45f   :  { %v574_v1 = vmul.f32 0.0625, %v563_v43  ;;  %v573_v2 = vmul.f32 0.0625, %v560_v44  ;;  %v588_v3 = vmul.f32 %v1811_v39, %v1811_v39  ;;  %v587_v4 = vmul.f32 %v1813_v40, %v1813_v40 }
 0x461   :  { %v1821_v5 = vsub.f32 %v540_v60, %v574_v1  ;;  %v1823_v6 = vsub.f32 %v539_v53, %v573_v2  ;;  %v604_v7 = vsel %vm542_vm11, %v588_v3, 0.0  ;;  %v601_v8 = vsel %vm542_vm11, %v587_v4, 0.0 }
 0x462   :  { %605 = vadd.xlane.f32.xlu1 %v604_v7  ;;  %602 = vadd.xlane.f32.xlu0 %v601_v8  ;;  %v566_v17 = vpop.xlane.xlu0 %565 }
 0x463   :  { %v575_v18 = vmul.f32 0.0625, %v566_v17  ;;  %v590_v19 = vmul.f32 %v1821_v5, %v1821_v5  ;;  %v589_v45 = vmul.f32 %v1823_v6, %v1823_v6 }
 0x465   :  { %v1831_v46 = vsub.f32 %v541_v61, %v575_v18  ;;  %v610_v47 = vsel %vm542_vm11, %v590_v19, 0.0  ;;  %v607_v48 = vsel %vm542_vm11, %v589_v45, 0.0 }
 0x466   :  { %611 = vadd.xlane.f32.xlu1 %v610_v47  ;;  %608 = vadd.xlane.f32.xlu0 %v607_v48 }
 0x467   :  { %v591_v49 = vmul.f32 %v1831_v46, %v1831_v46 }
 0x469   :  { %v613_v50 = vsel %vm542_vm11, %v591_v49, 0.0 }
 0x46a   :  { %614 = vadd.xlane.f32.xlu0 %v613_v50 }
 0x4e7   :  { %v594_v51 = vpop.xlane.xlu1 %593 }
 0x4e8   :  { %v616_v52 = vmul.f32 0.0625, %v594_v51 }
 0x4ea   :  { %v624_v53 = vadd.f32 1e-05, %v616_v52 }
 0x4eb   :  { %v600_v54 = vpop.xlane.xlu1 %599  ;;  %v597_v55 = vpop.xlane.xlu0 %596 }
 0x4ec   :  { %1374 = vrsqrt.f32 %v624_v53  ;;  %v618_v56 = vmul.f32 0.0625, %v600_v54  ;;  %v617_v57 = vmul.f32 0.0625, %v597_v55 }
 0x4ee   :  { %v626_v58 = vadd.f32 1e-05, %v618_v56  ;;  %v625_v59 = vadd.f32 1e-05, %v617_v57 }
 0x4ef   :  { %v606_v60 = vpop.xlane.xlu1 %605  ;;  %v603_v61 = vpop.xlane.xlu0 %602 }
 0x4f0   :  { %1376 = vrsqrt.f32 %v626_v58  ;;  %v620_v62 = vmul.f32 0.0625, %v606_v60  ;;  %v619_v63 = vmul.f32 0.0625, %v603_v61  ;;  %v1862_v58 = vmov 0.0  }
 0x4f1   :  { %1378 = vrsqrt.f32 %v625_v59  ;;  %v1864_v59 = vmov 0.0   ;;  %v1866_v60 = vmov 0.0  }
 0x4f2   :  { %v628_v21 = vadd.f32 1e-05, %v620_v62  ;;  %v627_v22 = vadd.f32 1e-05, %v619_v63 }
 0x4f3   :  { %v612_v24 = vpop.xlane.xlu1 %611  ;;  %v609_v25 = vpop.xlane.xlu0 %608 }
 0x4f4   :  { %1380 = vrsqrt.f32 %v628_v21  ;;  %v622_v26 = vmul.f32 0.0625, %v612_v24  ;;  %v621_v27 = vmul.f32 0.0625, %v609_v25 }
 0x4f5   :  { %1382 = vrsqrt.f32 %v627_v22 }
 0x4f6   :  { %v1375_v28 = vpop.eup %1374  ;;  %v630_v34 = vadd.f32 1e-05, %v622_v26  ;;  %v629_v35 = vadd.f32 1e-05, %v621_v27 }
 0x4f7   :  { %v640_v20 = vmul.f32 %v1375_v28, %v1798_v23  ;;  %v615_v36 = vpop.xlane.xlu0 %614 }
 0x4f8   :  { %1384 = vrsqrt.f32 %v630_v34  ;;  %v623_v38 = vmul.f32 0.0625, %v615_v36 }
 0x4f9   :  { %v655_v41 = vmul.f32 %v1161_v32, %v640_v20  ;;  %1386 = vrsqrt.f32 %v629_v35 }
 0x4fa   :  { %v1377_v42 = vpop.eup %1376  ;;  %v631_v43 = vadd.f32 1e-05, %v623_v38 }
 0x4fb   :  { %v1379_v44 = vpop.eup %1378  ;;  %v670_v1 = vadd.f32 %v1162_v37, %v655_v41  ;;  %v642_v2 = vmul.f32 %v1377_v42, %v1804_v31 }
 0x4fc   :  { %v641_v3 = vmul.f32 %v1379_v44, %v1802_v29  ;;  %1388 = vrsqrt.f32 %v631_v43 }
 0x4fd   :  { %678 = vst.msk [vmem:[#allocation4] sm:$0xf] %vm542_vm11, %v670_v1  ;;  %v657_v23 = vmul.f32 %v1161_v32, %v642_v2 }
 0x4fe   :  { %v1381_v4 = vpop.eup %1380  ;;  %v656_v7 = vmul.f32 %v1161_v32, %v641_v3 }
 0x4ff   :  { %v1383_v8 = vpop.eup %1382  ;;  %v672_v17 = vadd.f32 %v1162_v37, %v657_v23  ;;  %v644_v18 = vmul.f32 %v1381_v4, %v1811_v39 }
 0x500   :  { %v671_v19 = vadd.f32 %v1162_v37, %v656_v7  ;;  %v643_v45 = vmul.f32 %v1383_v8, %v1813_v40 }
 0x501   :  { %680 = vst.msk [vmem:[#allocation4 + $0x8] sm:$0xf] %vm542_vm11, %v672_v17  ;;  %v659_v47 = vmul.f32 %v1161_v32, %v644_v18 }
 0x502   :  { %v1385_v48 = vpop.eup %1384  ;;  %679 = vst.msk [vmem:[#allocation4 + $0x4] sm:$0xf] %vm542_vm11, %v671_v19  ;;  %v658_v29 = vmul.f32 %v1161_v32, %v643_v45 }
 0x503   :  { %v1387_v31 = vpop.eup %1386  ;;  %v674_v49 = vadd.f32 %v1162_v37, %v659_v47  ;;  %v646_v50 = vmul.f32 %v1385_v48, %v1821_v5 }
 0x504   :  { %v673_v51 = vadd.f32 %v1162_v37, %v658_v29  ;;  %v645_v52 = vmul.f32 %v1387_v31, %v1823_v6  ;;  %v1860_v6 = vmov 0.0  }
 0x505   :  { %682 = vst.msk [vmem:[#allocation4 + $0x10] sm:$0xf] %vm542_vm11, %v674_v49  ;;  %v661_v39 = vmul.f32 %v1161_v32, %v646_v50 }
 0x506   :  { %v1389_v53 = vpop.eup %1388  ;;  %681 = vst.msk [vmem:[#allocation4 + $0xc] sm:$0xf] %vm542_vm11, %v673_v51  ;;  %v660_v40 = vmul.f32 %v1161_v32, %v645_v52 }
 0x507   :  { %v676_v54 = vadd.f32 %v1162_v37, %v661_v39  ;;  %v647_v55 = vmul.f32 %v1389_v53, %v1831_v46 }
 0x508   :  { %v675_v56 = vadd.f32 %v1162_v37, %v660_v40 }
 0x509   :  { %684 = vst.msk [vmem:[#allocation4 + $0x18] sm:$0xf] %vm542_vm11, %v676_v54  ;;  %v662_v57 = vmul.f32 %v1161_v32, %v647_v55 }
 0x50a   :  { %683 = vst.msk [vmem:[#allocation4 + $0x14] sm:$0xf] %vm542_vm11, %v675_v56 }
 0x50b   :  { %v677_v5 = vadd.f32 %v1162_v37, %v662_v57 }
 0x50d   :  { %685 = vst.msk [vmem:[#allocation4 + $0x1c] sm:$0xf] %vm542_vm11, %v677_v5 }
 0x50e LB: > { %v1250_v46 = vpack.c.bf16 %v1647_v10, %v1642_v9  ;;  %v1498_v61 = vmov 0.0|0.0   ;;  %s1499_s9 = smov 104   ;;  %s1163_s28 = sshll.u32 %s1486_s8, 2  ;;  %vm779_vm12 = vcmask 130048   ;;  %v1500_v62 = vmov 0.0   ;;  %s1486_s8 = sphi %s1868_s8, %s691_s8   ;;  %v1482_v60 = vphi %v1866_v60, %v1962_v60   ;;  %v1478_v59 = vphi %v1864_v59, %v1072_v59   ;;  %v1474_v58 = vphi %v1862_v58, %v1961_v58   ;;  %v1470_v6 = vphi %v1860_v6, %v1079_v6  }
 0x50f   : > { %1249 = vmatprep.subr.bf16.mxu1 %v1498_v61  ;;  %705 = vrot.lane.b32.xlu0 %v1482_v60, %s1499_s9  ;;  %s696_s29 = ssub.s32 7, %s1486_s8  ;;  %vm1501_vm13 = vmmov 0   ;;  %v1253_v63 = vpack.c.bf16 %v1657_v12, %v1652_v11  ;;  %s702_s10 = scalar_lea.vmem [#allocation4], %s1163_s28  ;;  %v1502_v43 = vmov 0   ;;  %v697_v17 = vstv %s1486_s8 }
 0x510   : > { %1251 = vmatpush3.bf16.msra.mxu1 %v1250_v46  ;;  %1217 = vmatprep.subr.mxu0 %v1500_v62  ;;  %s1168_s30 = sshll.u32 %s696_s29, 2  ;;  %s1503_s17 = smov 112   ;;  %vm698_vm14 = vcmp.lt.s32.totalorder %v697_v17, %v1597_v0  ;;  %v699_v47 = vstv %s696_s29 }
 0x511   : > { %1226 = vmatprep.mubr.msk.f32.mxu1 %vm1501_vm13, %v1500_v62  ;;  %1218 = vmatpush3.msra.mxu0 %v1662_v13  ;;  %s885_s0 = scalar_lea.vmem [#allocation4], %s1168_s30  ;;  %s1504_s18 = smov 8   ;;  %v1066_v31 = vsel %vm698_vm14, 1, %v1502_v43  ;;  %vm700_vm15 = vcmp.lt.s32.totalorder %v699_v47, %v1597_v0 }
 0x512   : > { %1219 = vmatprep.mubr.msk.f32.mxu0 %vm1501_vm13, %v1500_v62  ;;  %1229 = vmatprep.subr.mxu0 %v1500_v62  ;;  %v1073_v50 = vsel %vm700_vm15, 1, %v1502_v43  ;;  %s1505_s11 = smov 16   ;;  %s691_s8 = sadd.s32 1, %s1486_s8  }
 0x513   : > { %888 = vrot.lane.b32.xlu0 %v1474_v58, %s1499_s9  ;;  %1252 = vmatprep.subr.bf16.mxu1 %v1498_v61  ;;  %p688_p1 = scmp.ge.s32.totalorder %s691_s8, 8  }
 0x514   : > { %v703_v21 = vld [vmem:[%s702_s10] sm:$0xf]  ;;  %1390 = vset.pattern.permute.xlu0 %v1502_v43  ;;  %1391 = vset.pattern.permute.xlu1 %v1502_v43  ;;  %s1506_s12 = smov (%p688_p1), 104   ;;  %s1507_s13 = smov (%p688_p1), 120   ;;  %vm1095_vm2 = vcmask (%p688_p1), 195584   ;;  %vm1097_vm3 = vcmask (%p688_p1), 257024  }
 0x515   : > { %1227 = vmatmul.mubr.msk.f32.vlgmr.msra.gmra.mrb[0].mxu1 %vm779_vm12, %v703_v21  ;;  %v886_v22 = vld [vmem:[%s885_s0] sm:$0xf]  ;;  %s1508_s14 = smov (%p688_p1), 112  }
 0x516   : > { %1254 = vmatpush3.bf16.msra.mxu1 %v1253_v63  ;;  %1238 = vmatprep.mubr.msk.f32.mxu1 %vm1501_vm13, %v1500_v62 }
 0x519   : > { %1239 = vmatmul.mubr.msk.f32.vlgmr.msra.gmra.mrb[2].mxu1 %vm779_vm12, %v886_v22 }
 0x581   : > { %v706_v24 = vpop.permute.xlu0 %705 }
 0x582   : > { %1220 = vmatmul.mubr.msk.f32.vlgmr.msra.gmra.mrb[0].mxu0 %vm91_vm5, %v706_v24 }
 0x583   : > { %1230 = vmatpush3.msra.mxu0 %v1667_v14  ;;  %1231 = vmatprep.mubr.msk.f32.mxu0 %vm1501_vm13, %v1500_v62 }
 0x585   : > { %v889_v25 = vpop.permute.xlu0 %888 }
 0x586   : > { %1232 = vmatmul.mubr.msk.f32.vlgmr.msra.gmra.mrb[2].mxu0 %vm91_vm5, %v889_v25 }
 0x5e8   : > { %v849_v26 = vpop.f32.mrb[0].mxu1 }
 0x5e9   : > { %v1228_v27 = vpop.f32.mrb[1].mxu1 }
 0x5ec   : > { %v1031_v28 = vpop.f32.mrb[2].mxu1 }
 0x5ed   : > { %v1240_v32 = vpop.f32.mrb[3].mxu1 }
 0x655   : > { %v775_v34 = vpop.f32.mrb[0].mxu0 }
 0x656   : > { %v850_v35 = vadd.f32 %v849_v26, %v775_v34  ;;  %v1221_v20 = vpop.f32.mrb[1].mxu0 }
 0x658   : > { %v859_v36 = vadd.f32 %v1672_v15, %v850_v35 }
 0x659   : > { %v958_v37 = vpop.f32.mrb[2].mxu0 }
 0x65a   : > { %1392 = vtanh.f32 %v859_v36  ;;  %v1032_v38 = vadd.f32 %v1031_v28, %v958_v37  ;;  %v1233_v41 = vpop.f32.mrb[3].mxu0  ;;  %v1167_v2 = vmul.f32 -1.442695, %v859_v36 }
 0x65c   : > { %v1041_v42 = vadd.f32 %v1677_v16, %v1032_v38 }
 0x65e   : > { %1394 = vtanh.f32 %v1041_v42  ;;  %v1172_v3 = vmul.f32 -1.442695, %v1041_v42 }
 0x65f   : > { %1396 = vpow2.f32 %v1167_v2 }
 0x660   : > { %1398 = vpow2.f32 %v1172_v3 }
 0x664   : > { %v1393_v44 = vpop.eup %1392 }
 0x665   : > { %869 = vrot.lane.b32.xlu1 %v1393_v44, %s1503_s17 }
 0x668   : > { %v1395_v1 = vpop.eup %1394 }
 0x669   : > { %1051 = vrot.lane.b32.xlu1 %v1395_v1, %s1503_s17  ;;  %v1397_v23 = vpop.eup %1396 }
 0x66a   : > { %v863_v4 = vadd.f32 1.0, %v1397_v23  ;;  %v1399_v7 = vpop.eup %1398 }
 0x66b   : > { %v1045_v8 = vadd.f32 1.0, %v1399_v7 }
 0x66c   : > { %1400 = vrcp.f32 %v863_v4 }
 0x66d   : > { %1402 = vrcp.f32 %v1045_v8 }
 0x676   : > { %v1401_v18 = vpop.eup %1400 }
 0x677   : > { %v1403_v48 = vpop.eup %1402  ;;  %v867_v51 = vmul.f32 %v1478_v59, %v1401_v18 }
 0x678   : > { %v1049_v53 = vmul.f32 %v1470_v6, %v1403_v48 }
 0x6d7   : > { %v870_v19 = vpop.permute.xlu1 %869 }
 0x6d8   : > { %v872_v45 = vmul.f32 %v1401_v18, %v870_v19 }
 0x6da   : > { %874 = vrot.lane.b32.xlu0 %v872_v45, %s1504_s18 }
 0x6db   : > { %v1052_v29 = vpop.permute.xlu1 %1051 }
 0x6dc   : > { %v1054_v49 = vmul.f32 %v1403_v48, %v1052_v29 }
 0x6de   : > { %1068 = vperm.xlu0 %1390, %v1066_v31   ;;  %1056 = vrot.lane.b32.xlu1 %v1054_v49, %s1504_s18 }
 0x6e2   : > { %1075 = vperm.xlu1 %1391, %v1073_v50  }
 0x74c   : > { %v875_v52 = vpop.permute.xlu0 %874 }
 0x74d   : > { %v877_v39 = vadd.f32 %v875_v52, %v867_v51 }
 0x74f   : > { %1404 = vtanh.f32 %v877_v39 }
 0x750   : > { %v1057_v40 = vpop.permute.xlu1 %1056 }
 0x751   : > { %v1059_v54 = vadd.f32 %v1057_v40, %v1049_v53 }
 0x753   : > { %1406 = vtanh.f32 %v1059_v54 }
 0x759   : > { %v1405_v55 = vpop.eup %1404 }
 0x75a   : > { %880 = vrot.lane.b32.xlu1 %v1405_v55, %s1505_s11 }
 0x75d   : > { %v1407_v56 = vpop.eup %1406  ;;  %v1069_v57 = vpop.permute.xlu0 %1068 }
 0x75e   : > { %vm1070_vm0 = vcmp.eq.s32.totalorder %v1069_v57, 1  ;;  %1062 = vrot.lane.b32.xlu0 %v1407_v56, %s1505_s11 }
 0x75f   : > { %v1072_v59 = vsel %vm1070_vm0, %v877_v39, %v1478_v59  }
 0x761   : > { %v1076_v5 = vpop.permute.xlu1 %1075 }
 0x762   : > { %vm1077_vm1 = vcmp.eq.s32.totalorder %v1076_v5, 1  ;;  %1081 = vrot.lane.b32.xlu0 (%p688_p1), %v1957_v30, %s1506_s12 }
 0x763   : > { %v1079_v6 = vsel %vm1077_vm1, %v1059_v54, %v1470_v6  }
 0x766   :  { %1085 = vrot.lane.b32.xlu0 (%p688_p1), %v1958_v33, %s1508_s14 }
 0x7cc   : > { %v881_v46 = vpop.permute.xlu1 %880 }
 0x7cd   : > { %v883_v61 = vmul.f32 %v1401_v18, %v881_v46 }
 0x7ce   :  { %690 = sbr.rel (!%p688_p1) target bundleno = 1294 (0x50e), region = 115 }
 0x7cf   : > { %v1071_v62 = vsel %vm1070_vm0, %v883_v61, %v1482_v60  }
 0x7d0   : > { %v1063_v63 = vpop.permute.xlu0 %1062  ;;  %v1962_v60 = vmov %v1071_v62  ;;  %1089 = vrot.lane.b32.xlu1 (%p688_p1), %v1071_v62, %s1507_s13 }
 0x7d1   : > { %v1065_v21 = vmul.f32 %v1403_v48, %v1063_v63 }
 0x7d3   : > { %v1078_v22 = vsel %vm1077_vm1, %v1065_v21, %v1474_v58  }
 0x7d4   : > { %v1961_v58 = vmov %v1078_v22  ;;  %v1082_v60 = vpop.permute.xlu0 (%p688_p1), %1081 }
 0x7d8   :  { %v1086_v25 = vpop.permute.xlu0 %1085 }
 0x7d9   :  { %v1092_v26 = vsel %vm91_vm5, %v1082_v60, %v1086_v25 }
 0x842   :  { %v1090_v24 = vpop.permute.xlu1 %1089 }
 0x843   :  { %v1094_v27 = vsel %vm779_vm12, %v1092_v26, %v1090_v24 }
 0x844   :  { %v1096_v28 = vsel %vm1095_vm2, %v1094_v27, %v1078_v22 }
 0x845   :  { %1098 = vst.msk [vmem:[%s1946_s16] sm:$0xf] %vm1097_vm3, %v1096_v28 }

// kernel: lflstm_forward.7
= control target key start
LH: loop header
LB: loop body
LE: loop exit
PB: predicated region body
PF: predicated region fallthrough
CT: control target
= control target key end

     0   :  { %v275_v0 = vmov 0.0|0.0   ;;  %vm276_vm0 = vmmov 0   ;;  %v277_v4 = vmov 0.0   ;;  %vm37_vm1 = vcmask 588800   ;;  %s359_s1 = inlined_call_operand.vmem [shape: f32[72,32], index: 1, kind: input, shape index: {}]   ;;  %s360_s3 = inlined_call_operand.vmem [shape: f32[32,2], index: 3, kind: input, shape index: {}]   ;;  %s361_s0 = inlined_call_operand.vmem [shape: f32[4,72], index: 0, kind: input, shape index: {}]   ;;  %s362_s2 = inlined_call_operand.vmem [shape: f32[1,32], index: 2, kind: input, shape index: {}]   ;;  %s363_s4 = inlined_call_operand.vmem [shape: f32[1,2], index: 4, kind: input, shape index: {}]   ;;  %s364_s5 = inlined_call_operand.vmem [shape: f32[4,2], index: 5, kind: output, shape index: {}]  }
   0x1   :  { %254 = vmatprep.subr.bf16.mxu0 %v275_v0  ;;  %v21_v1 = vld [vmem:[%s359_s1] sm:$0xff]  ;;  %v22_v2 = vld [vmem:[%s359_s1 + $0x8] sm:$0xff]  ;;  %v23_v3 = vld [vmem:[%s359_s1 + $0x10] sm:$0xff]  ;;  %240 = vmatprep.mubr.msk.f32.mxu0 %vm276_vm0, %v277_v4  ;;  %vm123_vm2 = vcmask 261120   ;;  %vm197_vm3 = vcmask 11264  }
   0x2   :  { %v255_v5 = vpack.c.bf16 %v22_v2, %v21_v1  ;;  %v24_v6 = vld [vmem:[%s359_s1 + $0x18] sm:$0xff]  ;;  %266 = vmatprep.subr.bf16.mxu1 %v275_v0  ;;  %251 = vmatprep.mubr.msk.f32.mxu1 %vm276_vm0, %v277_v4  ;;  %v112_v8 = vld [vmem:[%s360_s3] sm:$0xff]  ;;  %v113_v9 = vld [vmem:[%s360_s3 + $0x8] sm:$0xff] }
   0x3   :  { %v258_v7 = vpack.c.bf16 %v24_v6, %v23_v3  ;;  %v25_v10 = vld [vmem:[%s359_s1 + $0x20] sm:$0xff]  ;;  %v26_v11 = vld [vmem:[%s359_s1 + $0x28] sm:$0xff]  ;;  %v267_v12 = vpack.c.bf16 %v113_v9, %v112_v8  ;;  %v27_v14 = vld [vmem:[%s359_s1 + $0x30] sm:$0xff] }
   0x4   :  { %256 = vmatpush3.bf16.msra.mxu0 %v255_v5  ;;  %v261_v13 = vpack.c.bf16 %v26_v11, %v25_v10  ;;  %v28_v15 = vld [vmem:[%s359_s1 + $0x38] sm:$0xff]  ;;  %v29_v17 = vld [vmem:[%s359_s1 + $0x40] sm:$0xff]  ;;  %v114_v19 = vld [vmem:[%s360_s3 + $0x10] sm:$0xff] }
   0x5   :  { %257 = vmatprep.subr.bf16.mxu0 %v275_v0  ;;  %268 = vmatpush3.bf16.msra.mxu1 %v267_v12  ;;  %v264_v16 = vpack.c.bf16 %v28_v15, %v27_v14  ;;  %v20_v18 = vld [vmem:[%s361_s0] sm:$0xf]  ;;  %v115_v20 = vld [vmem:[%s360_s3 + $0x18] sm:$0xff] }
   0x6   :  { %269 = vmatprep.subr.bf16.mxu1 %v275_v0  ;;  %v270_v21 = vpack.c.bf16 %v115_v20, %v114_v19  ;;  %v203_v22 = vld [vmem:[%s362_s2] ss:$0 sm:$0xff] }
   0x7   :  { %v205_v27 = vld [vmem:[%s363_s4] ss:$0 sm:$0xff] }
   0x8   :  { %259 = vmatpush3.bf16.msra.mxu0 %v258_v7 }
   0x9   :  { %260 = vmatprep.subr.bf16.mxu0 %v275_v0  ;;  %271 = vmatpush3.bf16.msra.mxu1 %v270_v21 }
   0xc   :  { %262 = vmatpush3.bf16.msra.mxu0 %v261_v13 }
   0xd   :  { %263 = vmatprep.subr.bf16.mxu0 %v275_v0 }
  0x10   :  { %265 = vmatpush3.bf16.msra.mxu0 %v264_v16 }
  0x11   :  { %238 = vmatprep.subr.mxu0 %v277_v4 }
  0x14   :  { %239 = vmatpush3.msra.mxu0 %v29_v17 }
  0x15   :  { %241 = vmatmul.mubr.msk.f32.vlgmr.msra.gmra.mrb[0].mxu0 %vm37_vm1, %v20_v18 }
  0xe8   :  { %v107_v23 = vpop.f32.mrb[0].mxu0 }
  0xe9   :  { %v108_v24 = vadd.f32 %v203_v22, %v107_v23  ;;  %v242_v25 = vpop.f32.mrb[1].mxu0 }
  0xeb   :  { %v111_v26 = vmax.f32 %v108_v24, 0.0 }
  0xed   :  { %252 = vmatmul.mubr.msk.f32.vlgmr.msra.gmra.mrb[0].mxu1 %vm123_vm2, %v111_v26 }
 0x1c0   :  { %v193_v28 = vpop.f32.mrb[0].mxu1 }
 0x1c1   :  { %v194_v29 = vadd.f32 %v205_v27, %v193_v28  ;;  %v253_v30 = vpop.f32.mrb[1].mxu1 }
 0x1c3   :  { %198 = vst.msk [vmem:[%s364_s5] sm:$0xf] %vm197_vm3, %v194_v29 }

// kernel: lflstm_forward.6
= control target key start
LH: loop header
LB: loop body
LE: loop exit
PB: predicated region body
PF: predicated region fallthrough
CT: control target
= control target key end

     0   :  { %s2162_s0 = inlined_call_operand.vmem [shape: s32[4,1], index: 0, kind: input, shape index: {}]   ;;  %s2163_s1 = inlined_call_operand.vmem [shape: f32[8,4,14], index: 1, kind: input, shape index: {}]   ;;  %s2164_s2 = inlined_call_operand.vmem [shape: f32[14,16], index: 2, kind: input, shape index: {}]   ;;  %s2165_s3 = inlined_call_operand.vmem [shape: f32[14,16], index: 3, kind: input, shape index: {}]   ;;  %s2166_s4 = inlined_call_operand.hbm [shape: f32[4,16], index: 4, kind: input, shape index: {}]   ;;  %s2167_s5 = inlined_call_operand.hbm [shape: f32[4,16], index: 5, kind: input, shape index: {}]   ;;  %s2168_s6 = inlined_call_operand.vmem [shape: f32[1,16], index: 6, kind: input, shape index: {}]   ;;  %s2169_s7 = inlined_call_operand.vmem [shape: f32[1,16], index: 7, kind: input, shape index: {}]   ;;  %s2170_s8 = inlined_call_operand.hbm [shape: f32[1,8], index: 8, kind: input, shape index: {}]   ;;  %s2171_s9 = inlined_call_operand.hbm [shape: f32[1,8], index: 9, kind: input, shape index: {}]   ;;  %s2172_s10 = inlined_call_operand.vmem [shape: f32[8,16], index: 10, kind: input, shape index: {}]   ;;  %s2173_s11 = inlined_call_operand.vmem [shape: f32[8,16], index: 11, kind: input, shape index: {}]   ;;  %s2174_s12 = inlined_call_operand.vmem [shape: f32[4,16], index: 12, kind: input, shape index: {}]   ;;  %s2175_s13 = inlined_call_operand.vmem [shape: f32[4,16], index: 13, kind: input, shape index: {}]   ;;  %s2176_s14 = inlined_call_operand.vmem [shape: f32[1,16], index: 14, kind: input, shape index: {}]   ;;  %s2177_s15 = inlined_call_operand.hbm [shape: f32[1,16], index: 15, kind: input, shape index: {}]   ;;  %s2178_s16 = inlined_call_operand.vmem [shape: f32[4,16], index: 16, kind: output, shape index: {}]  }
   0x1   :  { %2179 = sst [smem:[#allocation16_spill]] %s2162_s0 }
   0x2   :  { %21 = vsyncpa [#allocation6], 0 }
   0x3   :  { %22 = vsyncpa [#allocation8], 0 }
   0x4   :  { %23 = vsyncpa [#allocation11], 0  ;;  %s1673_s21 = smov [#allocation7]   ;;  %s1674_s23 = smov [#allocation10]  }
   0x5   :  { %s48_s22 = sshll.u32 %s1673_s21, 4  ;;  %s72_s24 = sshll.u32 %s1674_s23, 4  ;;  %s49_s22 = int_to_ptr.vmem [resolvable:$true] %s48_s22  ;;  %s73_s24 = int_to_ptr.vmem [resolvable:$true] %s72_s24 }
   0x6   :  { %s1477_s27 = scalar_lea.hbm %s2167_s5, 64 }
   0x7   :  { %p1478_p0 = scmp.ne.s32.totalorder %s2167_s5, %s1477_s27  ;;  %p1481_p1 = scmp.lt.u32.totalorder %s1477_s27, %s2167_s5 }
   0x9   :  { %p1483_p2 = pnand %p1481_p1, %p1478_p0 }
   0xb   :  { %1486 = shalt.err (!%p1483_p2)
}
   0xc   :  { %s1487_s17 = scalar_lea.vmem %s49_s22, 64  ;;  %p1492_p4 = scmp.lt.s32.totalorder %s49_s22, %s49_s22 }
   0xd   :  { %p1488_p3 = scmp.ne.s32.totalorder %s49_s22, %s1487_s17  ;;  %p1493_p5 = scmp.lt.s32.totalorder %s1487_s17, %s1487_s17 }
   0xf   :  { %p1494_p6 = por %p1493_p5, %p1492_p4 }
  0x11   :  { %p1495_p7 = pnand %p1494_p6, %p1488_p3 }
  0x13   :  { %1498 = shalt.err (!%p1495_p7)
}
  0x14   :  { %51 = dma.hbm_to_vmem [thread:$0]  %s2167_s5, 64, %s49_s22, [#allocation8]  }
  0x15   :  { %s1499_s23 = scalar_lea.hbm %s2171_s9, 16 }
  0x16   :  { %p1500_p8 = scmp.ne.s32.totalorder %s2171_s9, %s1499_s23  ;;  %p1503_p9 = scmp.lt.u32.totalorder %s1499_s23, %s2171_s9 }
  0x18   :  { %p1505_p10 = pnand %p1503_p9, %p1500_p8 }
  0x1a   :  { %1508 = shalt.err (!%p1505_p10)
}
  0x1b   :  { %s1509_s29 = scalar_lea.vmem %s73_s24, 16  ;;  %s1513_s30 = scalar_lea.vmem %s73_s24, 32 }
  0x1c   :  { %p1510_p11 = scmp.ne.s32.totalorder %s73_s24, %s1509_s29  ;;  %p1514_p12 = scmp.lt.s32.totalorder %s73_s24, %s73_s24 }
  0x1d   :  { %p1515_p13 = scmp.lt.s32.totalorder %s1513_s30, %s1509_s29 }
  0x1f   :  { %p1516_p0 = por %p1515_p13, %p1514_p12 }
  0x21   :  { %p1517_p1 = pnand %p1516_p0, %p1510_p11 }
  0x23   :  { %1520 = shalt.err (!%p1517_p1)
}
  0x24   :  { %75 = dma.hbm_to_vmem [thread:$0]  %s2171_s9, 16, %s73_s24, [#allocation11]  }
  0x25   :  { %s1675_s0 = smov [#allocation5]   ;;  %s1676_s18 = smov [#allocation9]  }
  0x26   :  { %s38_s17 = sshll.u32 %s1675_s0, 4  ;;  %s62_s19 = sshll.u32 %s1676_s18, 4  ;;  %s39_s17 = int_to_ptr.vmem [resolvable:$true] %s38_s17  ;;  %s63_s19 = int_to_ptr.vmem [resolvable:$true] %s62_s19 }
  0x27   :  { %s1521_s23 = scalar_lea.hbm %s2166_s4, 64 }
  0x28   :  { %p1522_p2 = scmp.ne.s32.totalorder %s2166_s4, %s1521_s23  ;;  %p1525_p3 = scmp.lt.u32.totalorder %s1521_s23, %s2166_s4 }
  0x2a   :  { %p1527_p4 = pnand %p1525_p3, %p1522_p2 }
  0x2c   :  { %1530 = shalt.err (!%p1527_p4)
}
  0x2d   :  { %s1531_s9 = scalar_lea.vmem %s39_s17, 64  ;;  %p1536_p6 = scmp.lt.s32.totalorder %s39_s17, %s39_s17 }
  0x2e   :  { %p1532_p5 = scmp.ne.s32.totalorder %s39_s17, %s1531_s9  ;;  %p1537_p7 = scmp.lt.s32.totalorder %s1531_s9, %s1531_s9 }
  0x30   :  { %p1538_p8 = por %p1537_p7, %p1536_p6 }
  0x32   :  { %p1539_p9 = pnand %p1538_p8, %p1532_p5 }
  0x34   :  { %1542 = shalt.err (!%p1539_p9)
}
  0x35   :  { %41 = dma.hbm_to_vmem [thread:$0]  %s2166_s4, 64, %s39_s17, [#allocation6]  }
  0x36   :  { %s1543_s22 = scalar_lea.hbm %s2170_s8, 16 }
  0x37   :  { %p1544_p10 = scmp.ne.s32.totalorder %s2170_s8, %s1543_s22  ;;  %p1547_p11 = scmp.lt.u32.totalorder %s1543_s22, %s2170_s8 }
  0x39   :  { %p1549_p12 = pnand %p1547_p11, %p1544_p10 }
  0x3b   :  { %1552 = shalt.err (!%p1549_p12)
}
  0x3c   :  { %s1553_s23 = scalar_lea.vmem %s63_s19, 16  ;;  %s1557_s25 = scalar_lea.vmem %s63_s19, 32 }
  0x3d   :  { %p1554_p13 = scmp.ne.s32.totalorder %s63_s19, %s1553_s23  ;;  %p1558_p0 = scmp.lt.s32.totalorder %s63_s19, %s63_s19 }
  0x3e   :  { %p1559_p1 = scmp.lt.s32.totalorder %s1557_s25, %s1553_s23 }
  0x40   :  { %p1560_p2 = por %p1559_p1, %p1558_p0 }
  0x42   :  { %p1561_p3 = pnand %p1560_p2, %p1554_p13 }
  0x44   :  { %1564 = shalt.err (!%p1561_p3)
}
  0x45   :  { %65 = dma.hbm_to_vmem [thread:$0]  %s2170_s8, 16, %s63_s19, [#allocation8]  }
  0x46   :  { %s1677_s26 = smov [#allocation12]   ;;  %s1565_s24 = scalar_lea.hbm %s2177_s15, 16 }
  0x47   :  { %s92_s27 = sshll.u32 %s1677_s26, 4  ;;  %p1566_p4 = scmp.ne.s32.totalorder %s2177_s15, %s1565_s24  ;;  %s93_s27 = int_to_ptr.vmem [resolvable:$true] %s92_s27 }
  0x48   :  { %p1569_p5 = scmp.lt.u32.totalorder %s1565_s24, %s2177_s15 }
  0x4a   :  { %p1571_p6 = pnand %p1569_p5, %p1566_p4 }
  0x4c   :  { %1574 = shalt.err (!%p1571_p6)
}
  0x4d   :  { %s1575_s0 = scalar_lea.vmem %s93_s27, 16  ;;  %s1579_s8 = scalar_lea.vmem %s93_s27, 32 }
  0x4e   :  { %p1576_p7 = scmp.ne.s32.totalorder %s93_s27, %s1575_s0  ;;  %p1580_p8 = scmp.lt.s32.totalorder %s93_s27, %s93_s27 }
  0x4f   :  { %p1581_p9 = scmp.lt.s32.totalorder %s1579_s8, %s1575_s0 }
  0x51   :  { %p1582_p10 = por %p1581_p9, %p1580_p8 }
  0x53   :  { %p1583_p11 = pnand %p1582_p10, %p1576_p7 }
  0x55   :  { %1586 = shalt.err (!%p1583_p11)
}
  0x56   :  { %95 = dma.hbm_to_vmem [thread:$0]  %s2177_s15, 16, %s93_s27, [#allocation11]  }
  0x57   :  { %1627 = dma.done.wait [#allocation6], 64  }
  0x58   :  { %1628 = vsyncadd [#allocation6], 4294967232 }
  0x59   :  { %1629 = dma.done.wait [#allocation8], 80  }
  0x5a   :  { %1630 = vsyncadd [#allocation8], 4294967216 }
  0x5b   :  { %1631 = dma.done.wait [#allocation11], 32  }
  0x5c   :  { %1632 = vsyncadd [#allocation11], 4294967264  ;;  %s2180_s23 = sld [smem:[#allocation16_spill]]  ;;  %v1851_v1 = vld [vmem:[%s2164_s2] sm:$0xff]  ;;  %v1856_v2 = vld [vmem:[%s2164_s2 + $0x8] sm:$0x3f] }
  0x5d   :  { %v1861_v3 = vld [vmem:[%s2165_s3] sm:$0xff]  ;;  %v1866_v4 = vld [vmem:[%s2165_s3 + $0x8] sm:$0x3f]  ;;  %v1909_v15 = vmov 0.0   ;;  %v1911_v16 = vmov 0.0   ;;  %v1913_v17 = vmov 0.0  }
  0x5e   :  { %v1868_v5 = vld [vmem:[#allocation5] sm:$0xf]  ;;  %v1870_v6 = vld [vmem:[#allocation7] sm:$0xf]  ;;  %v1907_v14 = vld [vmem:[#allocation12] ss:$0 sm:$0xff] }
  0x5f   :  { %v1875_v7 = vld [vmem:[%s2168_s6] ss:$0 sm:$0xff]  ;;  %v1915_v18 = vmov 0.0  }
  0x60   :  { %v1880_v8 = vld [vmem:[%s2169_s7] ss:$0 sm:$0xff] }
  0x61   :  { %v1885_v9 = vld [vmem:[%s2172_s10] sm:$0xff]  ;;  %s1917_s10 = smov 0  }
  0x62   :  { %v1846_v0 = vld [vmem:[%s2180_s23] sm:$0xf] }
  0x63   :  { %v1890_v10 = vld [vmem:[%s2173_s11] sm:$0xff] }
  0x64   :  { %v1895_v11 = vld [vmem:[%s2174_s12] sm:$0xf] }
  0x65   :  { %v1900_v12 = vld [vmem:[%s2175_s13] sm:$0xf] }
  0x66   :  { %v1905_v13 = vld [vmem:[%s2176_s14] ss:$0 sm:$0xff] }
  0x67 LB: > { %vm228_vm0 = vcmask 1045504   ;;  %v1678_v19 = vmov 0.0|0.0   ;;  %v1313_v20 = vpack.c.bf16 %v1856_v2, %v1851_v1  ;;  %s1679_s11 = smov 116   ;;  %vm1680_vm1 = vmmov 1   ;;  %s1222_s12 = sshll.u32 %s1651_s10, 2  ;;  %s1651_s10 = sphi %s1917_s10, %s131_s10   ;;  %v1647_v18 = vphi %v1915_v18, %v2186_v18   ;;  %v1643_v17 = vphi %v1913_v17, %v527_v17   ;;  %v1639_v16 = vphi %v1911_v16, %v2185_v16   ;;  %v1635_v15 = vphi %v1909_v15, %v534_v15  }
  0x68   : > { %1312 = vmatprep.subr.bf16.mxu1 %v1678_v19  ;;  %145 = vrot.lane.b32.xlu0 %v1647_v18, %s1679_s11  ;;  %vm1938_vm2 = vmpackc.low %vm228_vm0, %vm1680_vm1  ;;  %vm150_vm3 = vcmask 1043456   ;;  %s136_s13 = ssub.s32 7, %s1651_s10  ;;  %v1681_v22 = vmov 0.0   ;;  %s142_s23 = scalar_lea.vmem %s2163_s1, %s1222_s12  ;;  %vm224_vm4 = vcmask 113664   ;;  %vm1682_vm5 = vmmov 0  }
  0x69   : > { %1315 = vmatpush3.bf16.msk.msra.mxu1 %vm1938_vm2, %v1313_v20  ;;  %1268 = vmatprep.subr.mxu0 %v1681_v22  ;;  %s1953_s25 = sshll.u32 %s136_s13, 2  ;;  %v143_v23 = vld [vmem:[%s142_s23] sm:$0xf]  ;;  %v1317_v24 = vpack.c.bf16 %v1866_v4, %v1861_v3  ;;  %vm147_vm6 = vcmask 31744   ;;  %v1683_v40 = vmov 0   ;;  %s1684_s15 = smov 120   ;;  %v137_v49 = vstv %s1651_s10 }
  0x6a   : > { %1269 = vmatpush3.msk.msra.mxu0 %vm150_vm3, %v1868_v5  ;;  %1277 = vmatprep.mubr.msk.f32.mxu1 %vm1682_vm5, %v1681_v22  ;;  %s334_s26 = scalar_lea.vmem %s2163_s1, %s1953_s25  ;;  %vm138_vm7 = vcmp.lt.s32.totalorder %v137_v49, %v1846_v0  ;;  %v139_v53 = vstv %s136_s13  ;;  %s1685_s27 = smov 4   ;;  %vm540_vm11 = vcmask 27648  }
  0x6b   : > { %1270 = vmatprep.mubr.msk.f32.mxu0 %vm1682_vm5, %v1681_v22  ;;  %1280 = vmatprep.subr.mxu0 %v1681_v22  ;;  %v335_v25 = vld [vmem:[%s334_s26] sm:$0xf]  ;;  %v521_v56 = vsel %vm138_vm7, 1, %v1683_v40  ;;  %vm140_vm8 = vcmp.lt.s32.totalorder %v139_v53, %v1846_v0  ;;  %s1686_s28 = smov 8   ;;  %s539_s9 = scalar_lea.vmem [#allocation2], %s1222_s12 }
  0x6c   : > { %337 = vrot.lane.b32.xlu0 %v1639_v16, %s1679_s11  ;;  %1278 = vmatmul.mubr.msk.f32.vlgmr.msra.gmra.mrb[0].mxu1 %vm224_vm4, %v143_v23  ;;  %v528_v58 = vsel %vm140_vm8, 1, %v1683_v40  ;;  %s546_s24 = scalar_lea.vmem [#allocation3], %s1953_s25  ;;  %s131_s10 = sadd.s32 1, %s1651_s10  }
  0x6d   : > { %1316 = vmatprep.subr.bf16.mxu1 %v1678_v19  ;;  %1289 = vmatprep.mubr.msk.f32.mxu1 %vm1682_vm5, %v1681_v22  ;;  %p128_p12 = scmp.ge.s32.totalorder %s131_s10, 8  }
  0x6e   : > { %1319 = vmatpush3.bf16.msk.msra.mxu1 %vm1938_vm2, %v1317_v24  ;;  %1425 = vset.pattern.permute.xlu0 %v1683_v40  ;;  %s1687_s29 = smov (%p128_p12), 4   ;;  %vm605_vm12 = vcmask (%p128_p12), 60416   ;;  %s2094_s1 = smov (%p128_p12), 0  }
  0x6f   : > { %1426 = vset.pattern.permute.xlu1 %v1683_v40 }
  0x71   : > { %1290 = vmatmul.mubr.msk.f32.vlgmr.msra.gmra.mrb[2].mxu1 %vm224_vm4, %v335_v25 }
  0xda   : > { %v146_v26 = vpop.permute.xlu0 %145 }
  0xdb   : > { %1271 = vmatmul.mubr.msk.f32.vlgmr.msra.gmra.mrb[0].mxu0 %vm147_vm6, %v146_v26 }
  0xdc   : > { %1281 = vmatpush3.msk.msra.mxu0 %vm150_vm3, %v1870_v6  ;;  %1282 = vmatprep.mubr.msk.f32.mxu0 %vm1682_vm5, %v1681_v22 }
  0xde   : > { %v338_v27 = vpop.permute.xlu0 %337 }
  0xdf   : > { %1283 = vmatmul.mubr.msk.f32.vlgmr.msra.gmra.mrb[2].mxu0 %vm147_vm6, %v338_v27 }
 0x13f   : > { %v298_v28 = vpop.f32.mrb[0].mxu1 }
 0x140   : > { %v1279_v29 = vpop.f32.mrb[1].mxu1 }
 0x144   : > { %v486_v30 = vpop.f32.mrb[2].mxu1 }
 0x145   : > { %v1291_v31 = vpop.f32.mrb[3].mxu1 }
 0x1ae   : > { %v220_v32 = vpop.f32.mrb[0].mxu0 }
 0x1af   : > { %v299_v33 = vadd.f32 %v298_v28, %v220_v32  ;;  %v1272_v34 = vpop.f32.mrb[1].mxu0 }
 0x1b1   : > { %v308_v35 = vadd.f32 %v1875_v7, %v299_v33 }
 0x1b2   : > { %v410_v36 = vpop.f32.mrb[2].mxu0 }
 0x1b3   : > { %1427 = vtanh.f32 %v308_v35  ;;  %v487_v37 = vadd.f32 %v486_v30, %v410_v36  ;;  %v1284_v38 = vpop.f32.mrb[3].mxu0  ;;  %v1228_v43 = vmul.f32 -1.442695, %v308_v35 }
 0x1b5   : > { %v496_v39 = vadd.f32 %v1880_v8, %v487_v37 }
 0x1b7   : > { %1429 = vtanh.f32 %v496_v39  ;;  %v1235_v44 = vmul.f32 -1.442695, %v496_v39 }
 0x1b8   : > { %1431 = vpow2.f32 %v1228_v43 }
 0x1b9   : > { %1433 = vpow2.f32 %v1235_v44 }
 0x1bd   : > { %v1428_v41 = vpop.eup %1427 }
 0x1be   : > { %318 = vrot.lane.b32.xlu1 %v1428_v41, %s1684_s15 }
 0x1c1   : > { %v1430_v42 = vpop.eup %1429 }
 0x1c2   : > { %506 = vrot.lane.b32.xlu1 %v1430_v42, %s1684_s15  ;;  %v1432_v45 = vpop.eup %1431 }
 0x1c3   : > { %v312_v46 = vadd.f32 1.0, %v1432_v45  ;;  %v1434_v47 = vpop.eup %1433 }
 0x1c4   : > { %v500_v48 = vadd.f32 1.0, %v1434_v47 }
 0x1c5   : > { %1435 = vrcp.f32 %v312_v46 }
 0x1c6   : > { %1437 = vrcp.f32 %v500_v48 }
 0x1cf   : > { %v1436_v50 = vpop.eup %1435 }
 0x1d0   : > { %v1438_v54 = vpop.eup %1437  ;;  %v316_v59 = vmul.f32 %v1643_v17, %v1436_v50 }
 0x1d1   : > { %v504_v62 = vmul.f32 %v1635_v15, %v1438_v54 }
 0x230   : > { %v319_v51 = vpop.permute.xlu1 %318 }
 0x231   : > { %v321_v52 = vmul.f32 %v1436_v50, %v319_v51 }
 0x233   : > { %323 = vrot.lane.b32.xlu0 %v321_v52, %s1685_s27 }
 0x234   : > { %v507_v55 = vpop.permute.xlu1 %506 }
 0x235   : > { %v509_v57 = vmul.f32 %v1438_v54, %v507_v55 }
 0x237   : > { %523 = vperm.xlu0 %1425, %v521_v56   ;;  %511 = vrot.lane.b32.xlu1 %v509_v57, %s1685_s27 }
 0x23b   : > { %530 = vperm.xlu1 %1426, %v528_v58  }
 0x2a5   : > { %v324_v60 = vpop.permute.xlu0 %323 }
 0x2a6   : > { %v326_v61 = vadd.f32 %v324_v60, %v316_v59 }
 0x2a8   : > { %1439 = vtanh.f32 %v326_v61 }
 0x2a9   : > { %v512_v63 = vpop.permute.xlu1 %511 }
 0x2aa   : > { %v514_v19 = vadd.f32 %v512_v63, %v504_v62 }
 0x2ac   : > { %1441 = vtanh.f32 %v514_v19 }
 0x2b2   : > { %v1440_v20 = vpop.eup %1439 }
 0x2b3   : > { %329 = vrot.lane.b32.xlu1 %v1440_v20, %s1686_s28 }
 0x2b6   : > { %v1442_v21 = vpop.eup %1441  ;;  %v524_v22 = vpop.permute.xlu0 %523 }
 0x2b7   : > { %vm525_vm9 = vcmp.eq.s32.totalorder %v524_v22, 1  ;;  %517 = vrot.lane.b32.xlu0 %v1442_v21, %s1686_s28 }
 0x2b8   : > { %v527_v17 = vsel %vm525_vm9, %v326_v61, %v1643_v17  }
 0x2ba   : > { %v531_v23 = vpop.permute.xlu1 %530 }
 0x2bb   : > { %vm532_vm10 = vcmp.eq.s32.totalorder %v531_v23, 1 }
 0x2bc   : > { %v534_v15 = vsel %vm532_vm10, %v514_v19, %v1635_v15  }
 0x325   : > { %v330_v24 = vpop.permute.xlu1 %329 }
 0x326   : > { %v332_v25 = vmul.f32 %v1436_v50, %v330_v24 }
 0x328   : > { %v1989_v18 = vsel %vm525_vm9, %v332_v25, %v1647_v18  }
 0x329   : > { %v2183_v26 = vmov %v1989_v18  ;;  %v518_v27 = vpop.permute.xlu0 %517 }
 0x32a   : > { %536 = vrot.lane.b32.xlu1 %v2183_v26, %s1679_s11  ;;  %v520_v28 = vmul.f32 %v1438_v54, %v518_v27  ;;  %v2186_v18 = vmov %v2183_v26 }
 0x32c   : > { %v1994_v16 = vsel %vm532_vm10, %v520_v28, %v1639_v16  }
 0x32d   : > { %v2184_v29 = vmov %v1994_v16 }
 0x32e   : > { %543 = vrot.lane.b32.xlu0 %v2184_v29, %s1679_s11  ;;  %v2185_v16 = vmov %v2184_v29 }
 0x39b   :  { %130 = sbr.rel (!%p128_p12) target bundleno = 103 (0x67), region = 124 }
 0x39c   : > { %v537_v30 = vpop.permute.xlu1 %536 }
 0x39d   : > { %541 = vst.msk [vmem:[%s539_s9] sm:$0xf] %vm540_vm11, %v537_v30 }
 0x3a0   : > { %v544_v31 = vpop.permute.xlu0 %543 }
 0x3a1   : > { %547 = vst.msk [vmem:[%s546_s24] sm:$0xf] %vm540_vm11, %v544_v31 }
 0x3a4   :  { %v548_v39 = vld [vmem:[#allocation2] sm:$0xf]  ;;  %v550_v40 = vld [vmem:[#allocation2 + $0x8] sm:$0xf]  ;;  %v549_v6 = vld [vmem:[#allocation2 + $0x4] sm:$0xf] }
 0x3a5   :  { %v551_v7 = vld [vmem:[#allocation2 + $0xc] sm:$0xf]  ;;  %v552_v43 = vld [vmem:[#allocation2 + $0x10] sm:$0xf]  ;;  %v553_v44 = vld [vmem:[#allocation2 + $0x14] sm:$0xf] }
 0x3a6   :  { %v554_v51 = vld [vmem:[#allocation2 + $0x18] sm:$0xf]  ;;  %v555_v52 = vld [vmem:[#allocation2 + $0x1c] sm:$0xf] }
 0x3a8   :  { %v556_v18 = vld [vmem:[#allocation3] sm:$0xf]  ;;  %v558_v32 = vld [vmem:[#allocation3 + $0x8] sm:$0xf]  ;;  %v557_v33 = vld [vmem:[#allocation3 + $0x4] sm:$0xf] }
 0x3a9   :  { %572 = vrot.lane.b32.xlu0 %v556_v18, %s1687_s29  ;;  %576 = vrot.lane.b32.xlu1 %v558_v32, %s1687_s29  ;;  %v559_v34 = vld [vmem:[#allocation3 + $0xc] sm:$0xf]  ;;  %v560_v35 = vld [vmem:[#allocation3 + $0x10] sm:$0xf]  ;;  %v561_v36 = vld [vmem:[#allocation3 + $0x14] sm:$0xf] }
 0x3aa   :  { %v562_v37 = vld [vmem:[#allocation3 + $0x18] sm:$0xf]  ;;  %v563_v38 = vld [vmem:[#allocation3 + $0x1c] sm:$0xf] }
 0x3ad   :  { %574 = vrot.lane.b32.xlu0 %v557_v33, %s1687_s29  ;;  %578 = vrot.lane.b32.xlu1 %v559_v34, %s1687_s29 }
 0x3b1   :  { %580 = vrot.lane.b32.xlu0 %v560_v35, %s1687_s29  ;;  %582 = vrot.lane.b32.xlu1 %v561_v36, %s1687_s29 }
 0x3b5   :  { %584 = vrot.lane.b32.xlu0 %v562_v37, %s1687_s29  ;;  %586 = vrot.lane.b32.xlu1 %v563_v38, %s1687_s29 }
 0x41b   :  { %v573_v1 = vpop.permute.xlu0 %572  ;;  %v577_v2 = vpop.permute.xlu1 %576 }
 0x41c   :  { %v597_v3 = vsel %vm147_vm6, %v548_v39, %v573_v1  ;;  %v599_v4 = vsel %vm147_vm6, %v550_v40, %v577_v2 }
 0x41d   :  { %v606_v5 = vsel %vm605_vm12, %v597_v3, 0.0  ;;  %v612_v15 = vsel %vm605_vm12, %v599_v4, 0.0 }
 0x41e   :  { %607 = vadd.xlane.f32.xlu0 %v606_v5 }
 0x41f   :  { %v575_v8 = vpop.permute.xlu0 %574  ;;  %v579_v16 = vpop.permute.xlu1 %578 }
 0x420   :  { %v598_v17 = vsel %vm147_vm6, %v549_v6, %v575_v8  ;;  %v600_v41 = vsel %vm147_vm6, %v551_v7, %v579_v16 }
 0x421   :  { %v609_v42 = vsel %vm605_vm12, %v598_v17, 0.0  ;;  %v615_v46 = vsel %vm605_vm12, %v600_v41, 0.0 }
 0x422   :  { %610 = vadd.xlane.f32.xlu1 %v609_v42  ;;  %613 = vadd.xlane.f32.xlu0 %v612_v15 }
 0x423   :  { %v581_v45 = vpop.permute.xlu0 %580  ;;  %v583_v47 = vpop.permute.xlu1 %582 }
 0x424   :  { %v601_v48 = vsel %vm147_vm6, %v552_v43, %v581_v45  ;;  %v602_v49 = vsel %vm147_vm6, %v553_v44, %v583_v47 }
 0x425   :  { %v618_v50 = vsel %vm605_vm12, %v601_v48, 0.0  ;;  %v621_v54 = vsel %vm605_vm12, %v602_v49, 0.0 }
 0x426   :  { %619 = vadd.xlane.f32.xlu1 %v618_v50  ;;  %616 = vadd.xlane.f32.xlu0 %v615_v46 }
 0x427   :  { %v585_v53 = vpop.permute.xlu0 %584  ;;  %v587_v55 = vpop.permute.xlu1 %586 }
 0x428   :  { %v603_v56 = vsel %vm147_vm6, %v554_v51, %v585_v53  ;;  %v604_v57 = vsel %vm147_vm6, %v555_v52, %v587_v55 }
 0x429   :  { %v624_v58 = vsel %vm605_vm12, %v603_v56, 0.0  ;;  %v627_v59 = vsel %vm605_vm12, %v604_v57, 0.0 }
 0x42a   :  { %625 = vadd.xlane.f32.xlu1 %v624_v58  ;;  %622 = vadd.xlane.f32.xlu0 %v621_v54 }
 0x42e   :  { %628 = vadd.xlane.f32.xlu0 %v627_v59 }
 0x4ab   :  { %v608_v60 = vpop.xlane.xlu0 %607 }
 0x4ac   :  { %v631_v61 = vmul.f32 0.125, %v608_v60 }
 0x4ae   :  { %v2030_v62 = vsub.f32 %v597_v3, %v631_v61 }
 0x4af   :  { %v611_v63 = vpop.xlane.xlu1 %610  ;;  %v614_v19 = vpop.xlane.xlu0 %613 }
 0x4b0   :  { %v632_v20 = vmul.f32 0.125, %v611_v63  ;;  %v633_v21 = vmul.f32 0.125, %v614_v19  ;;  %v647_v22 = vmul.f32 %v2030_v62, %v2030_v62 }
 0x4b2   :  { %v2034_v23 = vsub.f32 %v598_v17, %v632_v20  ;;  %v2036_v24 = vsub.f32 %v599_v4, %v633_v21  ;;  %v655_v25 = vsel %vm605_vm12, %v647_v22, 0.0  ;;  %v1236_v21 = vld [vmem:[#allocation9] ss:$0 sm:$0xff] }
 0x4b3   :  { %v620_v27 = vpop.xlane.xlu1 %619  ;;  %656 = vadd.xlane.f32.xlu1 %v655_v25  ;;  %v617_v28 = vpop.xlane.xlu0 %616 }
 0x4b4   :  { %v635_v30 = vmul.f32 0.125, %v620_v27  ;;  %v634_v31 = vmul.f32 0.125, %v617_v28  ;;  %v648_v18 = vmul.f32 %v2034_v23, %v2034_v23  ;;  %v649_v32 = vmul.f32 %v2036_v24, %v2036_v24 }
 0x4b6   :  { %v2043_v33 = vsub.f32 %v601_v48, %v635_v30  ;;  %v2045_v34 = vsub.f32 %v600_v41, %v634_v31  ;;  %v658_v35 = vsel %vm605_vm12, %v648_v18, 0.0  ;;  %v661_v36 = vsel %vm605_vm12, %v649_v32, 0.0  ;;  %v1237_v30 = vld [vmem:[#allocation10] ss:$0 sm:$0xff] }
 0x4b7   :  { %v626_v37 = vpop.xlane.xlu1 %625  ;;  %659 = vadd.xlane.f32.xlu0 %v658_v35  ;;  %662 = vadd.xlane.f32.xlu1 %v661_v36  ;;  %v623_v38 = vpop.xlane.xlu0 %622 }
 0x4b8   :  { %v637_v39 = vmul.f32 0.125, %v626_v37  ;;  %v636_v40 = vmul.f32 0.125, %v623_v38  ;;  %v651_v1 = vmul.f32 %v2043_v33, %v2043_v33  ;;  %v650_v2 = vmul.f32 %v2045_v34, %v2045_v34 }
 0x4ba   :  { %v2053_v3 = vsub.f32 %v603_v56, %v637_v39  ;;  %v2055_v4 = vsub.f32 %v602_v49, %v636_v40  ;;  %v667_v5 = vsel %vm605_vm12, %v651_v1, 0.0  ;;  %v664_v6 = vsel %vm605_vm12, %v650_v2, 0.0 }
 0x4bb   :  { %668 = vadd.xlane.f32.xlu1 %v667_v5  ;;  %665 = vadd.xlane.f32.xlu0 %v664_v6  ;;  %v629_v7 = vpop.xlane.xlu0 %628 }
 0x4bc   :  { %v638_v8 = vmul.f32 0.125, %v629_v7  ;;  %v653_v15 = vmul.f32 %v2053_v3, %v2053_v3  ;;  %v652_v16 = vmul.f32 %v2055_v4, %v2055_v4 }
 0x4be   :  { %v2063_v17 = vsub.f32 %v604_v57, %v638_v8  ;;  %v673_v41 = vsel %vm605_vm12, %v653_v15, 0.0  ;;  %v670_v42 = vsel %vm605_vm12, %v652_v16, 0.0 }
 0x4bf   :  { %674 = vadd.xlane.f32.xlu1 %v673_v41  ;;  %671 = vadd.xlane.f32.xlu0 %v670_v42 }
 0x4c0   :  { %v654_v43 = vmul.f32 %v2063_v17, %v2063_v17 }
 0x4c2   :  { %v676_v44 = vsel %vm605_vm12, %v654_v43, 0.0 }
 0x4c3   :  { %677 = vadd.xlane.f32.xlu0 %v676_v44 }
 0x540   :  { %v657_v45 = vpop.xlane.xlu1 %656 }
 0x541   :  { %v679_v46 = vmul.f32 0.125, %v657_v45 }
 0x543   :  { %v687_v47 = vadd.f32 1e-05, %v679_v46 }
 0x544   :  { %v663_v48 = vpop.xlane.xlu1 %662  ;;  %v660_v49 = vpop.xlane.xlu0 %659 }
 0x545   :  { %1443 = vrsqrt.f32 %v687_v47  ;;  %v681_v50 = vmul.f32 0.125, %v663_v48  ;;  %v680_v51 = vmul.f32 0.125, %v660_v49 }
 0x547   :  { %v689_v52 = vadd.f32 1e-05, %v681_v50  ;;  %v688_v53 = vadd.f32 1e-05, %v680_v51  ;;  %v2088_v50 = vmov 0.0   ;;  %v2090_v51 = vmov 0.0  }
 0x548   :  { %v669_v54 = vpop.xlane.xlu1 %668  ;;  %v666_v55 = vpop.xlane.xlu0 %665 }
 0x549   :  { %1445 = vrsqrt.f32 %v689_v52  ;;  %v683_v56 = vmul.f32 0.125, %v669_v54  ;;  %v682_v57 = vmul.f32 0.125, %v666_v55  ;;  %v2092_v52 = vmov 0.0  }
 0x54a   :  { %1447 = vrsqrt.f32 %v688_v53 }
 0x54b   :  { %v691_v58 = vadd.f32 1e-05, %v683_v56  ;;  %v690_v59 = vadd.f32 1e-05, %v682_v57 }
 0x54c   :  { %v675_v60 = vpop.xlane.xlu1 %674  ;;  %v672_v61 = vpop.xlane.xlu0 %671 }
 0x54d   :  { %1449 = vrsqrt.f32 %v691_v58  ;;  %v685_v63 = vmul.f32 0.125, %v675_v60  ;;  %v684_v19 = vmul.f32 0.125, %v672_v61 }
 0x54e   :  { %1451 = vrsqrt.f32 %v690_v59 }
 0x54f   :  { %v1444_v20 = vpop.eup %1443  ;;  %v693_v22 = vadd.f32 1e-05, %v685_v63  ;;  %v692_v25 = vadd.f32 1e-05, %v684_v19 }
 0x550   :  { %v703_v27 = vmul.f32 %v1444_v20, %v2030_v62  ;;  %v678_v28 = vpop.xlane.xlu0 %677 }
 0x551   :  { %1453 = vrsqrt.f32 %v693_v22  ;;  %v686_v31 = vmul.f32 0.125, %v678_v28 }
 0x552   :  { %v718_v18 = vmul.f32 %v1236_v21, %v703_v27  ;;  %1455 = vrsqrt.f32 %v692_v25 }
 0x553   :  { %v1446_v32 = vpop.eup %1445  ;;  %v694_v35 = vadd.f32 1e-05, %v686_v31 }
 0x554   :  { %v1448_v36 = vpop.eup %1447  ;;  %v733_v37 = vadd.f32 %v1237_v30, %v718_v18  ;;  %v705_v38 = vmul.f32 %v1446_v32, %v2036_v24 }
 0x555   :  { %v704_v39 = vmul.f32 %v1448_v36, %v2034_v23  ;;  %1457 = vrsqrt.f32 %v694_v35 }
 0x556   :  { %741 = vst.msk [vmem:[#allocation4] sm:$0xf] %vm605_vm12, %v733_v37  ;;  %v720_v40 = vmul.f32 %v1236_v21, %v705_v38 }
 0x557   :  { %v1450_v1 = vpop.eup %1449  ;;  %v719_v62 = vmul.f32 %v1236_v21, %v704_v39 }
 0x558   :  { %v1452_v2 = vpop.eup %1451  ;;  %v735_v5 = vadd.f32 %v1237_v30, %v720_v40  ;;  %v707_v6 = vmul.f32 %v1450_v1, %v2043_v33 }
 0x559   :  { %v734_v7 = vadd.f32 %v1237_v30, %v719_v62  ;;  %v706_v8 = vmul.f32 %v1452_v2, %v2045_v34 }
 0x55a   :  { %743 = vst.msk [vmem:[#allocation4 + $0x8] sm:$0xf] %vm605_vm12, %v735_v5  ;;  %v722_v15 = vmul.f32 %v1236_v21, %v707_v6 }
 0x55b   :  { %v1454_v16 = vpop.eup %1453  ;;  %742 = vst.msk [vmem:[#allocation4 + $0x4] sm:$0xf] %vm605_vm12, %v734_v7  ;;  %v721_v23 = vmul.f32 %v1236_v21, %v706_v8 }
 0x55c   :  { %v1456_v24 = vpop.eup %1455  ;;  %v737_v41 = vadd.f32 %v1237_v30, %v722_v15  ;;  %v709_v42 = vmul.f32 %v1454_v16, %v2053_v3 }
 0x55d   :  { %v736_v43 = vadd.f32 %v1237_v30, %v721_v23  ;;  %v708_v44 = vmul.f32 %v1456_v24, %v2055_v4  ;;  %v2086_v4 = vmov 0.0  }
 0x55e   :  { %745 = vst.msk [vmem:[#allocation4 + $0x10] sm:$0xf] %vm605_vm12, %v737_v41  ;;  %v724_v33 = vmul.f32 %v1236_v21, %v709_v42 }
 0x55f   :  { %v1458_v45 = vpop.eup %1457  ;;  %744 = vst.msk [vmem:[#allocation4 + $0xc] sm:$0xf] %vm605_vm12, %v736_v43  ;;  %v723_v34 = vmul.f32 %v1236_v21, %v708_v44 }
 0x560   :  { %v739_v46 = vadd.f32 %v1237_v30, %v724_v33  ;;  %v710_v47 = vmul.f32 %v1458_v45, %v2063_v17 }
 0x561   :  { %v738_v48 = vadd.f32 %v1237_v30, %v723_v34 }
 0x562   :  { %747 = vst.msk [vmem:[#allocation4 + $0x18] sm:$0xf] %vm605_vm12, %v739_v46  ;;  %v725_v49 = vmul.f32 %v1236_v21, %v710_v47 }
 0x563   :  { %746 = vst.msk [vmem:[#allocation4 + $0x14] sm:$0xf] %vm605_vm12, %v738_v48 }
 0x564   :  { %v740_v3 = vadd.f32 %v1237_v30, %v725_v49 }
 0x566   :  { %748 = vst.msk [vmem:[#allocation4 + $0x1c] sm:$0xf] %vm605_vm12, %v740_v3 }
 0x567 LB: > { %v1688_v17 = vmov 0.0   ;;  %s1689_s2 = smov 116   ;;  %s1238_s30 = sshll.u32 %s1671_s1, 2  ;;  %vm846_vm13 = vcmask 64512   ;;  %vm1690_vm14 = vmmov 0   ;;  %v1691_v28 = vmov 0   ;;  %s1671_s1 = sphi %s2094_s1, %s754_s1   ;;  %v1667_v52 = vphi %v2092_v52, %v2188_v52   ;;  %v1663_v51 = vphi %v2090_v51, %v1142_v51   ;;  %v1659_v50 = vphi %v2088_v50, %v2187_v50   ;;  %v1655_v4 = vphi %v2086_v4, %v1149_v4  }
 0x568   : > { %1292 = vmatprep.subr.mxu0 %v1688_v17  ;;  %1297 = vmatprep.subr.mxu1 %v1688_v17  ;;  %s759_s5 = ssub.s32 7, %s1671_s1  ;;  %s765_s3 = scalar_lea.vmem [#allocation4], %s1238_s30  ;;  %v760_v39 = vstv %s1671_s1 }
 0x569   : > { %768 = vrot.lane.b32.xlu0 %v1667_v52, %s1689_s2  ;;  %1293 = vmatpush3.msk.msra.mxu0 %vm150_vm3, %v1895_v11  ;;  %s1244_s22 = sshll.u32 %s759_s5, 2  ;;  %s1692_s8 = smov 120   ;;  %vm761_vm15 = vcmp.lt.s32.totalorder %v760_v39, %v1846_v0  ;;  %v762_v2 = vstv %s759_s5 }
 0x56a   : > { %1298 = vmatpush3.msra.mxu1 %v1885_v9  ;;  %1299 = vmatprep.mubr.msk.f32.mxu1 %vm1690_vm14, %v1688_v17  ;;  %s952_s0 = scalar_lea.vmem [#allocation4], %s1244_s22  ;;  %s1693_s19 = smov 4   ;;  %v1136_v7 = vsel %vm761_vm15, 1, %v1691_v28  ;;  %vm763_vm0 = vcmp.lt.s32.totalorder %v762_v2, %v1846_v0 }
 0x56b   : > { %1294 = vmatprep.mubr.msk.f32.mxu0 %vm1690_vm14, %v1688_v17  ;;  %1302 = vmatprep.subr.mxu0 %v1688_v17  ;;  %v1143_v15 = vsel %vm763_vm0, 1, %v1691_v28  ;;  %s1694_s6 = smov 8   ;;  %s754_s1 = sadd.s32 1, %s1671_s1  }
 0x56c   : > { %1307 = vmatprep.subr.mxu1 %v1688_v17  ;;  %1459 = vset.pattern.permute.xlu0 %v1691_v28  ;;  %p751_p13 = scmp.ge.s32.totalorder %s754_s1, 8  }
 0x56d   : > { %v766_v53 = vld [vmem:[%s765_s3] sm:$0xf]  ;;  %955 = vrot.lane.b32.xlu0 %v1659_v50, %s1689_s2  ;;  %1460 = vset.pattern.permute.xlu1 %v1691_v28  ;;  %s1695_s18 = smov (%p751_p13), 116   ;;  %s1696_s7 = smov (%p751_p13), 124   ;;  %vm1165_vm4 = vcmask (%p751_p13), 97280   ;;  %vm1167_vm5 = vcmask (%p751_p13), 125952  }
 0x56e   : > { %1300 = vmatmul.mubr.msk.f32.vlgmr.msra.gmra.mrb[0].mxu1 %vm846_vm13, %v766_v53  ;;  %v953_v54 = vld [vmem:[%s952_s0] sm:$0xf]  ;;  %s1697_s20 = smov (%p751_p13), 120  }
 0x56f   : > { %1308 = vmatpush3.msra.mxu1 %v1890_v10  ;;  %1309 = vmatprep.mubr.msk.f32.mxu1 %vm1690_vm14, %v1688_v17 }
 0x572   : > { %1310 = vmatmul.mubr.msk.f32.vlgmr.msra.gmra.mrb[2].mxu1 %vm846_vm13, %v953_v54 }
 0x5db   : > { %v769_v55 = vpop.permute.xlu0 %768 }
 0x5dc   : > { %1295 = vmatmul.mubr.msk.f32.vlgmr.msra.gmra.mrb[0].mxu0 %vm147_vm6, %v769_v55 }
 0x5dd   : > { %1303 = vmatpush3.msk.msra.mxu0 %vm150_vm3, %v1900_v12  ;;  %1304 = vmatprep.mubr.msk.f32.mxu0 %vm1690_vm14, %v1688_v17 }
 0x5df   : > { %v956_v56 = vpop.permute.xlu0 %955 }
 0x5e0   : > { %1305 = vmatmul.mubr.msk.f32.vlgmr.msra.gmra.mrb[2].mxu0 %vm147_vm6, %v956_v56 }
 0x641   : > { %v916_v57 = vpop.f32.mrb[0].mxu1 }
 0x642   : > { %v1301_v58 = vpop.f32.mrb[1].mxu1 }
 0x645   : > { %v1101_v59 = vpop.f32.mrb[2].mxu1 }
 0x646   : > { %v1311_v60 = vpop.f32.mrb[3].mxu1 }
 0x6af   : > { %v842_v61 = vpop.f32.mrb[0].mxu0 }
 0x6b0   : > { %v917_v63 = vadd.f32 %v916_v57, %v842_v61  ;;  %v1296_v19 = vpop.f32.mrb[1].mxu0 }
 0x6b2   : > { %v926_v20 = vadd.f32 %v1905_v13, %v917_v63 }
 0x6b3   : > { %v1028_v21 = vpop.f32.mrb[2].mxu0 }
 0x6b4   : > { %1461 = vtanh.f32 %v926_v20  ;;  %v1102_v22 = vadd.f32 %v1101_v59, %v1028_v21  ;;  %v1306_v25 = vpop.f32.mrb[3].mxu0  ;;  %v1243_v18 = vmul.f32 -1.442695, %v926_v20 }
 0x6b6   : > { %v1111_v27 = vadd.f32 %v1907_v14, %v1102_v22 }
 0x6b8   : > { %1463 = vtanh.f32 %v1111_v27  ;;  %v1249_v32 = vmul.f32 -1.442695, %v1111_v27 }
 0x6b9   : > { %1465 = vpow2.f32 %v1243_v18 }
 0x6ba   : > { %1467 = vpow2.f32 %v1249_v32 }
 0x6be   : > { %v1462_v30 = vpop.eup %1461 }
 0x6bf   : > { %936 = vrot.lane.b32.xlu1 %v1462_v30, %s1692_s8 }
 0x6c2   : > { %v1464_v31 = vpop.eup %1463 }
 0x6c3   : > { %1121 = vrot.lane.b32.xlu1 %v1464_v31, %s1692_s8  ;;  %v1466_v35 = vpop.eup %1465 }
 0x6c4   : > { %v930_v36 = vadd.f32 1.0, %v1466_v35  ;;  %v1468_v37 = vpop.eup %1467 }
 0x6c5   : > { %v1115_v38 = vadd.f32 1.0, %v1468_v37 }
 0x6c6   : > { %1469 = vrcp.f32 %v930_v36 }
 0x6c7   : > { %1471 = vrcp.f32 %v1115_v38 }
 0x6d0   : > { %v1470_v40 = vpop.eup %1469 }
 0x6d1   : > { %v1472_v5 = vpop.eup %1471  ;;  %v934_v16 = vmul.f32 %v1663_v51, %v1470_v40 }
 0x6d2   : > { %v1119_v41 = vmul.f32 %v1655_v4, %v1472_v5 }
 0x731   : > { %v937_v1 = vpop.permute.xlu1 %936 }
 0x732   : > { %v939_v62 = vmul.f32 %v1470_v40, %v937_v1 }
 0x734   : > { %941 = vrot.lane.b32.xlu0 %v939_v62, %s1693_s19 }
 0x735   : > { %v1122_v6 = vpop.permute.xlu1 %1121 }
 0x736   : > { %v1124_v8 = vmul.f32 %v1472_v5, %v1122_v6 }
 0x738   : > { %1138 = vperm.xlu0 %1459, %v1136_v7   ;;  %1126 = vrot.lane.b32.xlu1 %v1124_v8, %s1693_s19 }
 0x73c   : > { %1145 = vperm.xlu1 %1460, %v1143_v15  }
 0x7a6   : > { %v942_v23 = vpop.permute.xlu0 %941 }
 0x7a7   : > { %v944_v24 = vadd.f32 %v942_v23, %v934_v16 }
 0x7a9   : > { %1473 = vtanh.f32 %v944_v24 }
 0x7aa   : > { %v1127_v42 = vpop.permute.xlu1 %1126 }
 0x7ab   : > { %v1129_v43 = vadd.f32 %v1127_v42, %v1119_v41 }
 0x7ad   : > { %1475 = vtanh.f32 %v1129_v43 }
 0x7b3   : > { %v1474_v44 = vpop.eup %1473 }
 0x7b4   : > { %947 = vrot.lane.b32.xlu1 %v1474_v44, %s1694_s6 }
 0x7b7   : > { %v1476_v33 = vpop.eup %1475  ;;  %v1139_v45 = vpop.permute.xlu0 %1138 }
 0x7b8   : > { %vm1140_vm1 = vcmp.eq.s32.totalorder %v1139_v45, 1  ;;  %1132 = vrot.lane.b32.xlu0 %v1476_v33, %s1694_s6 }
 0x7b9   : > { %v1142_v51 = vsel %vm1140_vm1, %v944_v24, %v1663_v51  }
 0x7bb   : > { %v1146_v34 = vpop.permute.xlu1 %1145 }
 0x7bc   : > { %vm1147_vm2 = vcmp.eq.s32.totalorder %v1146_v34, 1  ;;  %1151 = vrot.lane.b32.xlu0 (%p751_p13), %v2183_v26, %s1695_s18 }
 0x7bd   : > { %v1149_v4 = vsel %vm1147_vm2, %v1129_v43, %v1655_v4  }
 0x7c0   :  { %1155 = vrot.lane.b32.xlu0 (%p751_p13), %v2184_v29, %s1697_s20 }
 0x826   : > { %v948_v46 = vpop.permute.xlu1 %947 }
 0x827   : > { %v950_v47 = vmul.f32 %v1470_v40, %v948_v46 }
 0x828   :  { %753 = sbr.rel (!%p751_p13) target bundleno = 1383 (0x567), region = 135 }
 0x829   : > { %v1141_v48 = vsel %vm1140_vm1, %v950_v47, %v1667_v52  }
 0x82a   : > { %v1133_v49 = vpop.permute.xlu0 %1132  ;;  %v2188_v52 = vmov %v1141_v48  ;;  %1159 = vrot.lane.b32.xlu1 (%p751_p13), %v1141_v48, %s1696_s7 }
 0x82b   : > { %v1135_v3 = vmul.f32 %v1472_v5, %v1133_v49 }
 0x82d   : > { %v1148_v17 = vsel %vm1147_vm2, %v1135_v3, %v1659_v50  }
 0x82e   : > { %v2187_v50 = vmov %v1148_v17  ;;  %v1152_v52 = vpop.permute.xlu0 (%p751_p13), %1151 }
 0x832   :  { %v1156_v54 = vpop.permute.xlu0 %1155 }
 0x833   :  { %v1162_v55 = vsel %vm147_vm6, %v1152_v52, %v1156_v54 }
 0x89c   :  { %v1160_v53 = vpop.permute.xlu1 %1159 }
 0x89d   :  { %v1164_v56 = vsel %vm846_vm13, %v1162_v55, %v1160_v53 }
 0x89e   :  { %v1166_v57 = vsel %vm1165_vm4, %v1164_v56, %v1148_v17 }
 0x89f   :  { %1168 = vst.msk [vmem:[%s2178_s16] sm:$0xf] %vm1167_vm5, %v1166_v57 }
 0x8a0   :  { %1173 = vsyncpa [#allocation6], 1 }
 0x8a1   :  { %1174 = vsyncpa [#allocation8], 1 }
 0x8a2   :  { %1175 = vsyncpa [#allocation11], 1 }

// kernel: lflstm_forward.5
= control target key start
LH: loop header
LB: loop body
LE: loop exit
PB: predicated region body
PF: predicated region fallthrough
CT: control target
= control target key end

     0   :  { %v1710_v17 = vmov 0.0   ;;  %v1712_v18 = vmov 0.0   ;;  %v1714_v19 = vmov 0.0   ;;  %v1716_v20 = vmov 0.0   ;;  %s1979_s0 = inlined_call_operand.vmem [shape: s32[4,1], index: 0, kind: input, shape index: {}]   ;;  %s1980_s1 = inlined_call_operand.vmem [shape: f32[8,4,10], index: 1, kind: input, shape index: {}]   ;;  %s1981_s2 = inlined_call_operand.vmem [shape: f32[10,24], index: 2, kind: input, shape index: {}]   ;;  %s1982_s3 = inlined_call_operand.vmem [shape: f32[10,24], index: 3, kind: input, shape index: {}]   ;;  %s1983_s4 = inlined_call_operand.vmem [shape: f32[6,24], index: 4, kind: input, shape index: {}]   ;;  %s1984_s5 = inlined_call_operand.vmem [shape: f32[6,24], index: 5, kind: input, shape index: {}]   ;;  %s1985_s6 = inlined_call_operand.vmem [shape: f32[1,24], index: 6, kind: input, shape index: {}]   ;;  %s1986_s7 = inlined_call_operand.vmem [shape: f32[1,24], index: 7, kind: input, shape index: {}]   ;;  %s1987_s8 = inlined_call_operand.vmem [shape: f32[1,12], index: 8, kind: input, shape index: {}]   ;;  %s1988_s9 = inlined_call_operand.vmem [shape: f32[1,12], index: 9, kind: input, shape index: {}]   ;;  %s1989_s16 = inlined_call_operand.vmem [shape: f32[4,24], index: 16, kind: output, shape index: {}]   ;;  %s1990_s10 = inlined_call_operand.vmem [shape: f32[12,24], index: 10, kind: input, shape index: {}]   ;;  %s1991_s11 = inlined_call_operand.vmem [shape: f32[12,24], index: 11, kind: input, shape index: {}]   ;;  %s1992_s12 = inlined_call_operand.vmem [shape: f32[6,24], index: 12, kind: input, shape index: {}]   ;;  %s1993_s13 = inlined_call_operand.vmem [shape: f32[6,24], index: 13, kind: input, shape index: {}]   ;;  %s1994_s14 = inlined_call_operand.vmem [shape: f32[1,24], index: 14, kind: input, shape index: {}]   ;;  %s1995_s15 = inlined_call_operand.vmem [shape: f32[1,24], index: 15, kind: input, shape index: {}]  }
   0x1   :  { %1996 = sst [smem:[#allocation5_spill]] %s1979_s0  ;;  %v1633_v1 = vld [vmem:[%s1981_s2] sm:$0xff]  ;;  %v1638_v2 = vld [vmem:[%s1981_s2 + $0x8] sm:$0x3] }
   0x2   :  { %s1997_s23 = sld [smem:[#allocation5_spill]]  ;;  %v1643_v3 = vld [vmem:[%s1982_s3] sm:$0xff]  ;;  %v1648_v4 = vld [vmem:[%s1982_s3 + $0x8] sm:$0x3] }
   0x3   :  { %v1653_v5 = vld [vmem:[%s1983_s4] sm:$0x3f]  ;;  %v1678_v10 = vld [vmem:[%s1990_s10 + $0x8] sm:$0xf] }
   0x4   :  { %v1658_v6 = vld [vmem:[%s1984_s5] sm:$0x3f]  ;;  %v1688_v12 = vld [vmem:[%s1991_s11 + $0x8] sm:$0xf] }
   0x5   :  { %v1663_v7 = vld [vmem:[%s1985_s6] ss:$0 sm:$0xff] }
   0x6   :  { %v1668_v8 = vld [vmem:[%s1986_s7] ss:$0 sm:$0xff] }
   0x7   :  { %v1673_v9 = vld [vmem:[%s1990_s10] sm:$0xff] }
   0x8   :  { %v1628_v0 = vld [vmem:[%s1997_s23] sm:$0xf] }
   0x9   :  { %v1683_v11 = vld [vmem:[%s1991_s11] sm:$0xff]  ;;  %s1718_s11 = smov 0  }
   0xa   :  { %v1693_v13 = vld [vmem:[%s1992_s12] sm:$0x3f] }
   0xb   :  { %v1698_v14 = vld [vmem:[%s1993_s13] sm:$0x3f] }
   0xc   :  { %v1703_v15 = vld [vmem:[%s1994_s14] ss:$0 sm:$0xff] }
   0xd   :  { %v1708_v16 = vld [vmem:[%s1995_s15] ss:$0 sm:$0xff] }
   0xe LB: > { %vm172_vm0 = vcmask 1041408   ;;  %v1518_v21 = vmov 0.0|0.0   ;;  %v1269_v22 = vpack.c.bf16 %v1638_v2, %v1633_v1  ;;  %s1519_s12 = smov 110   ;;  %vm1520_vm1 = vmmov 1   ;;  %s1170_s13 = sshll.u32 %s1496_s11, 2  ;;  %s1496_s11 = sphi %s1718_s11, %s75_s11   ;;  %v1492_v20 = vphi %v1716_v20, %v2003_v20   ;;  %v1488_v19 = vphi %v1714_v19, %v471_v19   ;;  %v1484_v18 = vphi %v1712_v18, %v2002_v18   ;;  %v1480_v17 = vphi %v1710_v17, %v478_v17  }
   0xf   : > { %1268 = vmatprep.subr.bf16.mxu1 %v1518_v21  ;;  %89 = vrot.lane.b32.xlu0 %v1492_v20, %s1519_s12  ;;  %vm1739_vm2 = vmpackc.low %vm172_vm0, %vm1520_vm1  ;;  %vm94_vm3 = vcmask 1045504   ;;  %s80_s14 = ssub.s32 7, %s1496_s11  ;;  %v1521_v24 = vmov 0.0   ;;  %s86_s20 = scalar_lea.vmem %s1980_s1, %s1170_s13  ;;  %vm168_vm4 = vcmask 80896   ;;  %vm1522_vm5 = vmmov 0  }
  0x10   : > { %1271 = vmatpush3.bf16.msk.msra.mxu1 %vm1739_vm2, %v1269_v22  ;;  %1220 = vmatprep.subr.mxu0 %v1521_v24  ;;  %s1754_s2 = sshll.u32 %s80_s14, 2  ;;  %v87_v25 = vld [vmem:[%s86_s20] sm:$0xf]  ;;  %v1273_v26 = vpack.c.bf16 %v1648_v4, %v1643_v3  ;;  %vm91_vm6 = vcmask 48128   ;;  %v1523_v42 = vmov 0   ;;  %s1524_s3 = smov 116   ;;  %v81_v51 = vstv %s1496_s11 }
  0x11   : > { %1221 = vmatpush3.msk.msra.mxu0 %vm94_vm3, %v1653_v5  ;;  %1229 = vmatprep.mubr.msk.f32.mxu1 %vm1522_vm5, %v1521_v24  ;;  %s278_s23 = scalar_lea.vmem %s1980_s1, %s1754_s2  ;;  %vm82_vm7 = vcmp.lt.s32.totalorder %v81_v51, %v1628_v0  ;;  %v83_v55 = vstv %s80_s14  ;;  %s1525_s24 = smov 6   ;;  %vm484_vm11 = vcmask 44032  }
  0x12   : > { %1222 = vmatprep.mubr.msk.f32.mxu0 %vm1522_vm5, %v1521_v24  ;;  %1232 = vmatprep.subr.mxu0 %v1521_v24  ;;  %v279_v27 = vld [vmem:[%s278_s23] sm:$0xf]  ;;  %v465_v58 = vsel %vm82_vm7, 1, %v1523_v42  ;;  %vm84_vm8 = vcmp.lt.s32.totalorder %v83_v55, %v1628_v0  ;;  %s1526_s4 = smov 12   ;;  %s483_s25 = scalar_lea.vmem [#allocation2], %s1170_s13 }
  0x13   : > { %281 = vrot.lane.b32.xlu0 %v1484_v18, %s1519_s12  ;;  %1230 = vmatmul.mubr.msk.f32.vlgmr.msra.gmra.mrb[0].mxu1 %vm168_vm4, %v87_v25  ;;  %v472_v60 = vsel %vm84_vm8, 1, %v1523_v42  ;;  %s490_s5 = scalar_lea.vmem [#allocation3], %s1754_s2  ;;  %s75_s11 = sadd.s32 1, %s1496_s11  }
  0x14   : > { %1272 = vmatprep.subr.bf16.mxu1 %v1518_v21  ;;  %1241 = vmatprep.mubr.msk.f32.mxu1 %vm1522_vm5, %v1521_v24  ;;  %p72_p0 = scmp.ge.s32.totalorder %s75_s11, 8  }
  0x15   : > { %1275 = vmatpush3.bf16.msk.msra.mxu1 %vm1739_vm2, %v1273_v26  ;;  %1386 = vset.pattern.permute.xlu0 %v1523_v42  ;;  %s1527_s26 = smov (%p72_p0), 6   ;;  %vm549_vm12 = vcmask (%p72_p0), 93184  }
  0x16   : > { %1387 = vset.pattern.permute.xlu1 %v1523_v42 }
  0x18   : > { %1242 = vmatmul.mubr.msk.f32.vlgmr.msra.gmra.mrb[2].mxu1 %vm168_vm4, %v279_v27 }
  0x81   : > { %v90_v28 = vpop.permute.xlu0 %89 }
  0x82   : > { %1223 = vmatmul.mubr.msk.f32.vlgmr.msra.gmra.mrb[0].mxu0 %vm91_vm6, %v90_v28 }
  0x83   : > { %1233 = vmatpush3.msk.msra.mxu0 %vm94_vm3, %v1658_v6  ;;  %1234 = vmatprep.mubr.msk.f32.mxu0 %vm1522_vm5, %v1521_v24 }
  0x85   : > { %v282_v29 = vpop.permute.xlu0 %281 }
  0x86   : > { %1235 = vmatmul.mubr.msk.f32.vlgmr.msra.gmra.mrb[2].mxu0 %vm91_vm6, %v282_v29 }
  0xe6   : > { %v242_v30 = vpop.f32.mrb[0].mxu1 }
  0xe7   : > { %v1231_v31 = vpop.f32.mrb[1].mxu1 }
  0xeb   : > { %v430_v32 = vpop.f32.mrb[2].mxu1 }
  0xec   : > { %v1243_v33 = vpop.f32.mrb[3].mxu1 }
 0x155   : > { %v164_v34 = vpop.f32.mrb[0].mxu0 }
 0x156   : > { %v243_v35 = vadd.f32 %v242_v30, %v164_v34  ;;  %v1224_v36 = vpop.f32.mrb[1].mxu0 }
 0x158   : > { %v252_v37 = vadd.f32 %v1663_v7, %v243_v35 }
 0x159   : > { %v354_v38 = vpop.f32.mrb[2].mxu0 }
 0x15a   : > { %1388 = vtanh.f32 %v252_v37  ;;  %v431_v39 = vadd.f32 %v430_v32, %v354_v38  ;;  %v1236_v40 = vpop.f32.mrb[3].mxu0  ;;  %v1176_v45 = vmul.f32 -1.442695, %v252_v37 }
 0x15c   : > { %v440_v41 = vadd.f32 %v1668_v8, %v431_v39 }
 0x15e   : > { %1390 = vtanh.f32 %v440_v41  ;;  %v1183_v46 = vmul.f32 -1.442695, %v440_v41 }
 0x15f   : > { %1392 = vpow2.f32 %v1176_v45 }
 0x160   : > { %1394 = vpow2.f32 %v1183_v46 }
 0x164   : > { %v1389_v43 = vpop.eup %1388 }
 0x165   : > { %262 = vrot.lane.b32.xlu1 %v1389_v43, %s1524_s3 }
 0x168   : > { %v1391_v44 = vpop.eup %1390 }
 0x169   : > { %450 = vrot.lane.b32.xlu1 %v1391_v44, %s1524_s3  ;;  %v1393_v47 = vpop.eup %1392 }
 0x16a   : > { %v256_v48 = vadd.f32 1.0, %v1393_v47  ;;  %v1395_v49 = vpop.eup %1394 }
 0x16b   : > { %v444_v50 = vadd.f32 1.0, %v1395_v49 }
 0x16c   : > { %1396 = vrcp.f32 %v256_v48 }
 0x16d   : > { %1398 = vrcp.f32 %v444_v50 }
 0x176   : > { %v1397_v52 = vpop.eup %1396 }
 0x177   : > { %v1399_v56 = vpop.eup %1398  ;;  %v260_v61 = vmul.f32 %v1488_v19, %v1397_v52 }
 0x178   : > { %v448_v21 = vmul.f32 %v1480_v17, %v1399_v56 }
 0x1d7   : > { %v263_v53 = vpop.permute.xlu1 %262 }
 0x1d8   : > { %v265_v54 = vmul.f32 %v1397_v52, %v263_v53 }
 0x1da   : > { %267 = vrot.lane.b32.xlu0 %v265_v54, %s1525_s24 }
 0x1db   : > { %v451_v57 = vpop.permute.xlu1 %450 }
 0x1dc   : > { %v453_v59 = vmul.f32 %v1399_v56, %v451_v57 }
 0x1de   : > { %467 = vperm.xlu0 %1386, %v465_v58   ;;  %455 = vrot.lane.b32.xlu1 %v453_v59, %s1525_s24 }
 0x1e2   : > { %474 = vperm.xlu1 %1387, %v472_v60  }
 0x24c   : > { %v268_v62 = vpop.permute.xlu0 %267 }
 0x24d   : > { %v270_v63 = vadd.f32 %v268_v62, %v260_v61 }
 0x24f   : > { %1400 = vtanh.f32 %v270_v63 }
 0x250   : > { %v456_v22 = vpop.permute.xlu1 %455 }
 0x251   : > { %v458_v23 = vadd.f32 %v456_v22, %v448_v21 }
 0x253   : > { %1402 = vtanh.f32 %v458_v23 }
 0x259   : > { %v1401_v24 = vpop.eup %1400 }
 0x25a   : > { %273 = vrot.lane.b32.xlu1 %v1401_v24, %s1526_s4 }
 0x25d   : > { %v1403_v25 = vpop.eup %1402  ;;  %v468_v26 = vpop.permute.xlu0 %467 }
 0x25e   : > { %vm469_vm9 = vcmp.eq.s32.totalorder %v468_v26, 1  ;;  %461 = vrot.lane.b32.xlu0 %v1403_v25, %s1526_s4 }
 0x25f   : > { %v471_v19 = vsel %vm469_vm9, %v270_v63, %v1488_v19  }
 0x261   : > { %v475_v27 = vpop.permute.xlu1 %474 }
 0x262   : > { %vm476_vm10 = vcmp.eq.s32.totalorder %v475_v27, 1 }
 0x263   : > { %v478_v17 = vsel %vm476_vm10, %v458_v23, %v1480_v17  }
 0x2cc   : > { %v274_v28 = vpop.permute.xlu1 %273 }
 0x2cd   : > { %v276_v29 = vmul.f32 %v1397_v52, %v274_v28 }
 0x2cf   : > { %v1790_v20 = vsel %vm469_vm9, %v276_v29, %v1492_v20  }
 0x2d0   : > { %v2000_v30 = vmov %v1790_v20  ;;  %v462_v31 = vpop.permute.xlu0 %461 }
 0x2d1   : > { %480 = vrot.lane.b32.xlu1 %v2000_v30, %s1519_s12  ;;  %v464_v32 = vmul.f32 %v1399_v56, %v462_v31  ;;  %v2003_v20 = vmov %v2000_v30 }
 0x2d3   : > { %v1795_v18 = vsel %vm476_vm10, %v464_v32, %v1484_v18  }
 0x2d4   : > { %v2001_v33 = vmov %v1795_v18 }
 0x2d5   : > { %487 = vrot.lane.b32.xlu0 %v2001_v33, %s1519_s12  ;;  %v2002_v18 = vmov %v2001_v33 }
 0x342   :  { %74 = sbr.rel (!%p72_p0) target bundleno = 14 (0xe), region = 104 }
 0x343   : > { %v481_v34 = vpop.permute.xlu1 %480 }
 0x344   : > { %485 = vst.msk [vmem:[%s483_s25] sm:$0xf] %vm484_vm11, %v481_v34 }
 0x347   : > { %v488_v35 = vpop.permute.xlu0 %487 }
 0x348   : > { %491 = vst.msk [vmem:[%s490_s5] sm:$0xf] %vm484_vm11, %v488_v35 }
 0x34b   :  { %v492_v43 = vld [vmem:[#allocation2] sm:$0xf]  ;;  %v494_v44 = vld [vmem:[#allocation2 + $0x8] sm:$0xf]  ;;  %v493_v6 = vld [vmem:[#allocation2 + $0x4] sm:$0xf] }
 0x34c   :  { %v495_v7 = vld [vmem:[#allocation2 + $0xc] sm:$0xf]  ;;  %v496_v47 = vld [vmem:[#allocation2 + $0x10] sm:$0xf]  ;;  %v497_v48 = vld [vmem:[#allocation2 + $0x14] sm:$0xf] }
 0x34d   :  { %v498_v55 = vld [vmem:[#allocation2 + $0x18] sm:$0xf]  ;;  %v499_v56 = vld [vmem:[#allocation2 + $0x1c] sm:$0xf] }
 0x34f   :  { %v500_v20 = vld [vmem:[#allocation3] sm:$0xf]  ;;  %v502_v36 = vld [vmem:[#allocation3 + $0x8] sm:$0xf]  ;;  %v501_v37 = vld [vmem:[#allocation3 + $0x4] sm:$0xf] }
 0x350   :  { %516 = vrot.lane.b32.xlu0 %v500_v20, %s1527_s26  ;;  %520 = vrot.lane.b32.xlu1 %v502_v36, %s1527_s26  ;;  %v503_v38 = vld [vmem:[#allocation3 + $0xc] sm:$0xf]  ;;  %v504_v39 = vld [vmem:[#allocation3 + $0x10] sm:$0xf]  ;;  %v505_v40 = vld [vmem:[#allocation3 + $0x14] sm:$0xf] }
 0x351   :  { %v506_v41 = vld [vmem:[#allocation3 + $0x18] sm:$0xf]  ;;  %v507_v42 = vld [vmem:[#allocation3 + $0x1c] sm:$0xf] }
 0x354   :  { %518 = vrot.lane.b32.xlu0 %v501_v37, %s1527_s26  ;;  %522 = vrot.lane.b32.xlu1 %v503_v38, %s1527_s26 }
 0x358   :  { %524 = vrot.lane.b32.xlu0 %v504_v39, %s1527_s26  ;;  %526 = vrot.lane.b32.xlu1 %v505_v40, %s1527_s26 }
 0x35c   :  { %528 = vrot.lane.b32.xlu0 %v506_v41, %s1527_s26  ;;  %530 = vrot.lane.b32.xlu1 %v507_v42, %s1527_s26 }
 0x3c2   :  { %v517_v1 = vpop.permute.xlu0 %516  ;;  %v521_v2 = vpop.permute.xlu1 %520 }
 0x3c3   :  { %v541_v3 = vsel %vm91_vm6, %v492_v43, %v517_v1  ;;  %v543_v4 = vsel %vm91_vm6, %v494_v44, %v521_v2 }
 0x3c4   :  { %v550_v5 = vsel %vm549_vm12, %v541_v3, 0.0  ;;  %v556_v17 = vsel %vm549_vm12, %v543_v4, 0.0 }
 0x3c5   :  { %551 = vadd.xlane.f32.xlu0 %v550_v5 }
 0x3c6   :  { %v519_v8 = vpop.permute.xlu0 %518  ;;  %v523_v18 = vpop.permute.xlu1 %522 }
 0x3c7   :  { %v542_v19 = vsel %vm91_vm6, %v493_v6, %v519_v8  ;;  %v544_v45 = vsel %vm91_vm6, %v495_v7, %v523_v18 }
 0x3c8   :  { %v553_v46 = vsel %vm549_vm12, %v542_v19, 0.0  ;;  %v559_v50 = vsel %vm549_vm12, %v544_v45, 0.0 }
 0x3c9   :  { %554 = vadd.xlane.f32.xlu1 %v553_v46  ;;  %557 = vadd.xlane.f32.xlu0 %v556_v17 }
 0x3ca   :  { %v525_v49 = vpop.permute.xlu0 %524  ;;  %v527_v51 = vpop.permute.xlu1 %526 }
 0x3cb   :  { %v545_v52 = vsel %vm91_vm6, %v496_v47, %v525_v49  ;;  %v546_v53 = vsel %vm91_vm6, %v497_v48, %v527_v51 }
 0x3cc   :  { %v562_v54 = vsel %vm549_vm12, %v545_v52, 0.0  ;;  %v565_v58 = vsel %vm549_vm12, %v546_v53, 0.0 }
 0x3cd   :  { %563 = vadd.xlane.f32.xlu1 %v562_v54  ;;  %560 = vadd.xlane.f32.xlu0 %v559_v50 }
 0x3ce   :  { %v529_v57 = vpop.permute.xlu0 %528  ;;  %v531_v59 = vpop.permute.xlu1 %530 }
 0x3cf   :  { %v547_v60 = vsel %vm91_vm6, %v498_v55, %v529_v57  ;;  %v548_v61 = vsel %vm91_vm6, %v499_v56, %v531_v59 }
 0x3d0   :  { %v568_v62 = vsel %vm549_vm12, %v547_v60, 0.0  ;;  %v571_v63 = vsel %vm549_vm12, %v548_v61, 0.0 }
 0x3d1   :  { %569 = vadd.xlane.f32.xlu1 %v568_v62  ;;  %566 = vadd.xlane.f32.xlu0 %v565_v58 }
 0x3d5   :  { %572 = vadd.xlane.f32.xlu0 %v571_v63 }
 0x452   :  { %v552_v21 = vpop.xlane.xlu0 %551 }
 0x453   :  { %v575_v22 = vmul.f32 0.083333336, %v552_v21 }
 0x455   :  { %v1831_v23 = vsub.f32 %v541_v3, %v575_v22 }
 0x456   :  { %v555_v24 = vpop.xlane.xlu1 %554  ;;  %v558_v25 = vpop.xlane.xlu0 %557 }
 0x457   :  { %v576_v26 = vmul.f32 0.083333336, %v555_v24  ;;  %v577_v27 = vmul.f32 0.083333336, %v558_v25  ;;  %v591_v28 = vmul.f32 %v1831_v23, %v1831_v23 }
 0x459   :  { %v1835_v29 = vsub.f32 %v542_v19, %v576_v26  ;;  %v1837_v31 = vsub.f32 %v543_v4, %v577_v27  ;;  %v599_v32 = vsel %vm549_vm12, %v591_v28, 0.0 }
 0x45a   :  { %v564_v34 = vpop.xlane.xlu1 %563  ;;  %600 = vadd.xlane.f32.xlu1 %v599_v32  ;;  %v561_v35 = vpop.xlane.xlu0 %560  ;;  %v1184_v32 = vld [vmem:[%s1987_s8] ss:$0 sm:$0xff]  ;;  %s1901_s8 = smov 0  }
 0x45b   :  { %v579_v20 = vmul.f32 0.083333336, %v564_v34  ;;  %v578_v36 = vmul.f32 0.083333336, %v561_v35  ;;  %v592_v37 = vmul.f32 %v1835_v29, %v1835_v29  ;;  %v593_v38 = vmul.f32 %v1837_v31, %v1837_v31 }
 0x45d   :  { %v1844_v39 = vsub.f32 %v545_v52, %v579_v20  ;;  %v1846_v40 = vsub.f32 %v544_v45, %v578_v36  ;;  %v602_v41 = vsel %vm549_vm12, %v592_v37, 0.0  ;;  %v605_v42 = vsel %vm549_vm12, %v593_v38, 0.0  ;;  %v1185_v37 = vld [vmem:[%s1988_s9] ss:$0 sm:$0xff] }
 0x45e   :  { %v570_v43 = vpop.xlane.xlu1 %569  ;;  %603 = vadd.xlane.f32.xlu0 %v602_v41  ;;  %606 = vadd.xlane.f32.xlu1 %v605_v42  ;;  %v567_v44 = vpop.xlane.xlu0 %566 }
 0x45f   :  { %v581_v1 = vmul.f32 0.083333336, %v570_v43  ;;  %v580_v2 = vmul.f32 0.083333336, %v567_v44  ;;  %v595_v3 = vmul.f32 %v1844_v39, %v1844_v39  ;;  %v594_v4 = vmul.f32 %v1846_v40, %v1846_v40 }
 0x461   :  { %v1854_v5 = vsub.f32 %v547_v60, %v581_v1  ;;  %v1856_v6 = vsub.f32 %v546_v53, %v580_v2  ;;  %v611_v7 = vsel %vm549_vm12, %v595_v3, 0.0  ;;  %v608_v8 = vsel %vm549_vm12, %v594_v4, 0.0 }
 0x462   :  { %612 = vadd.xlane.f32.xlu1 %v611_v7  ;;  %609 = vadd.xlane.f32.xlu0 %v608_v8  ;;  %v573_v17 = vpop.xlane.xlu0 %572 }
 0x463   :  { %v582_v18 = vmul.f32 0.083333336, %v573_v17  ;;  %v597_v19 = vmul.f32 %v1854_v5, %v1854_v5  ;;  %v596_v45 = vmul.f32 %v1856_v6, %v1856_v6 }
 0x465   :  { %v1864_v46 = vsub.f32 %v548_v61, %v582_v18  ;;  %v617_v47 = vsel %vm549_vm12, %v597_v19, 0.0  ;;  %v614_v48 = vsel %vm549_vm12, %v596_v45, 0.0 }
 0x466   :  { %618 = vadd.xlane.f32.xlu1 %v617_v47  ;;  %615 = vadd.xlane.f32.xlu0 %v614_v48 }
 0x467   :  { %v598_v49 = vmul.f32 %v1864_v46, %v1864_v46 }
 0x469   :  { %v620_v50 = vsel %vm549_vm12, %v598_v49, 0.0 }
 0x46a   :  { %621 = vadd.xlane.f32.xlu0 %v620_v50 }
 0x4e7   :  { %v601_v51 = vpop.xlane.xlu1 %600 }
 0x4e8   :  { %v623_v52 = vmul.f32 0.083333336, %v601_v51 }
 0x4ea   :  { %v631_v53 = vadd.f32 1e-05, %v623_v52 }
 0x4eb   :  { %v607_v54 = vpop.xlane.xlu1 %606  ;;  %v604_v55 = vpop.xlane.xlu0 %603 }
 0x4ec   :  { %1404 = vrsqrt.f32 %v631_v53  ;;  %v625_v56 = vmul.f32 0.083333336, %v607_v54  ;;  %v624_v57 = vmul.f32 0.083333336, %v604_v55 }
 0x4ee   :  { %v633_v58 = vadd.f32 1e-05, %v625_v56  ;;  %v632_v59 = vadd.f32 1e-05, %v624_v57 }
 0x4ef   :  { %v613_v60 = vpop.xlane.xlu1 %612  ;;  %v610_v61 = vpop.xlane.xlu0 %609 }
 0x4f0   :  { %1406 = vrsqrt.f32 %v633_v58  ;;  %v627_v62 = vmul.f32 0.083333336, %v613_v60  ;;  %v626_v63 = vmul.f32 0.083333336, %v610_v61  ;;  %v1895_v58 = vmov 0.0  }
 0x4f1   :  { %1408 = vrsqrt.f32 %v632_v59  ;;  %v1897_v59 = vmov 0.0   ;;  %v1899_v60 = vmov 0.0  }
 0x4f2   :  { %v635_v21 = vadd.f32 1e-05, %v627_v62  ;;  %v634_v22 = vadd.f32 1e-05, %v626_v63 }
 0x4f3   :  { %v619_v24 = vpop.xlane.xlu1 %618  ;;  %v616_v25 = vpop.xlane.xlu0 %615 }
 0x4f4   :  { %1410 = vrsqrt.f32 %v635_v21  ;;  %v629_v26 = vmul.f32 0.083333336, %v619_v24  ;;  %v628_v27 = vmul.f32 0.083333336, %v616_v25 }
 0x4f5   :  { %1412 = vrsqrt.f32 %v634_v22 }
 0x4f6   :  { %v1405_v28 = vpop.eup %1404  ;;  %v637_v34 = vadd.f32 1e-05, %v629_v26  ;;  %v636_v35 = vadd.f32 1e-05, %v628_v27 }
 0x4f7   :  { %v647_v20 = vmul.f32 %v1405_v28, %v1831_v23  ;;  %v622_v36 = vpop.xlane.xlu0 %621 }
 0x4f8   :  { %1414 = vrsqrt.f32 %v637_v34  ;;  %v630_v38 = vmul.f32 0.083333336, %v622_v36 }
 0x4f9   :  { %v662_v41 = vmul.f32 %v1184_v32, %v647_v20  ;;  %1416 = vrsqrt.f32 %v636_v35 }
 0x4fa   :  { %v1407_v42 = vpop.eup %1406  ;;  %v638_v43 = vadd.f32 1e-05, %v630_v38 }
 0x4fb   :  { %v1409_v44 = vpop.eup %1408  ;;  %v677_v1 = vadd.f32 %v1185_v37, %v662_v41  ;;  %v649_v2 = vmul.f32 %v1407_v42, %v1837_v31 }
 0x4fc   :  { %v648_v3 = vmul.f32 %v1409_v44, %v1835_v29  ;;  %1418 = vrsqrt.f32 %v638_v43 }
 0x4fd   :  { %685 = vst.msk [vmem:[#allocation4] sm:$0xf] %vm549_vm12, %v677_v1  ;;  %v664_v23 = vmul.f32 %v1184_v32, %v649_v2 }
 0x4fe   :  { %v1411_v4 = vpop.eup %1410  ;;  %v663_v7 = vmul.f32 %v1184_v32, %v648_v3 }
 0x4ff   :  { %v1413_v8 = vpop.eup %1412  ;;  %v679_v17 = vadd.f32 %v1185_v37, %v664_v23  ;;  %v651_v18 = vmul.f32 %v1411_v4, %v1844_v39 }
 0x500   :  { %v678_v19 = vadd.f32 %v1185_v37, %v663_v7  ;;  %v650_v45 = vmul.f32 %v1413_v8, %v1846_v40 }
 0x501   :  { %687 = vst.msk [vmem:[#allocation4 + $0x8] sm:$0xf] %vm549_vm12, %v679_v17  ;;  %v666_v47 = vmul.f32 %v1184_v32, %v651_v18 }
 0x502   :  { %v1415_v48 = vpop.eup %1414  ;;  %686 = vst.msk [vmem:[#allocation4 + $0x4] sm:$0xf] %vm549_vm12, %v678_v19  ;;  %v665_v29 = vmul.f32 %v1184_v32, %v650_v45 }
 0x503   :  { %v1417_v31 = vpop.eup %1416  ;;  %v681_v49 = vadd.f32 %v1185_v37, %v666_v47  ;;  %v653_v50 = vmul.f32 %v1415_v48, %v1854_v5 }
 0x504   :  { %v680_v51 = vadd.f32 %v1185_v37, %v665_v29  ;;  %v652_v52 = vmul.f32 %v1417_v31, %v1856_v6  ;;  %v1893_v6 = vmov 0.0  }
 0x505   :  { %689 = vst.msk [vmem:[#allocation4 + $0x10] sm:$0xf] %vm549_vm12, %v681_v49  ;;  %v668_v39 = vmul.f32 %v1184_v32, %v653_v50 }
 0x506   :  { %v1419_v53 = vpop.eup %1418  ;;  %688 = vst.msk [vmem:[#allocation4 + $0xc] sm:$0xf] %vm549_vm12, %v680_v51  ;;  %v667_v40 = vmul.f32 %v1184_v32, %v652_v52 }
 0x507   :  { %v683_v54 = vadd.f32 %v1185_v37, %v668_v39  ;;  %v654_v55 = vmul.f32 %v1419_v53, %v1864_v46 }
 0x508   :  { %v682_v56 = vadd.f32 %v1185_v37, %v667_v40 }
 0x509   :  { %691 = vst.msk [vmem:[#allocation4 + $0x18] sm:$0xf] %vm549_vm12, %v683_v54  ;;  %v669_v57 = vmul.f32 %v1184_v32, %v654_v55 }
 0x50a   :  { %690 = vst.msk [vmem:[#allocation4 + $0x14] sm:$0xf] %vm549_vm12, %v682_v56 }
 0x50b   :  { %v684_v5 = vadd.f32 %v1185_v37, %v669_v57 }
 0x50d   :  { %692 = vst.msk [vmem:[#allocation4 + $0x1c] sm:$0xf] %vm549_vm12, %v684_v5 }
 0x50e LB: > { %vm794_vm13 = vcmask 1043456   ;;  %v1528_v46 = vmov 0.0|0.0   ;;  %v1277_v61 = vpack.c.bf16 %v1678_v10, %v1673_v9  ;;  %s1529_s9 = smov 110   ;;  %vm1530_vm14 = vmmov 1   ;;  %s1186_s28 = sshll.u32 %s1516_s8, 2  ;;  %s1516_s8 = sphi %s1901_s8, %s698_s8   ;;  %v1512_v60 = vphi %v1899_v60, %v2007_v60   ;;  %v1508_v59 = vphi %v1897_v59, %v1093_v59   ;;  %v1504_v58 = vphi %v1895_v58, %v2006_v58   ;;  %v1500_v6 = vphi %v1893_v6, %v1100_v6  }
 0x50f   : > { %1276 = vmatprep.subr.bf16.mxu1 %v1528_v46  ;;  %712 = vrot.lane.b32.xlu0 %v1512_v60, %s1529_s9  ;;  %vm1921_vm15 = vmpackc.low %vm794_vm13, %vm1530_vm14  ;;  %s703_s29 = ssub.s32 7, %s1516_s8  ;;  %v1531_v63 = vmov 0.0   ;;  %vm790_vm0 = vcmask 97280   ;;  %vm1532_vm1 = vmmov 0   ;;  %s709_s10 = scalar_lea.vmem [#allocation4], %s1186_s28  ;;  %v1281_v22 = vpack.c.bf16 %v1688_v12, %v1683_v11 }
 0x510   : > { %1279 = vmatpush3.bf16.msk.msra.mxu1 %vm1921_vm15, %v1277_v61  ;;  %1244 = vmatprep.subr.mxu0 %v1531_v63  ;;  %s1193_s30 = sshll.u32 %s703_s29, 2  ;;  %v1533_v44 = vmov 0   ;;  %s1534_s17 = smov 116   ;;  %v704_v18 = vstv %s1516_s8  ;;  %v706_v48 = vstv %s703_s29 }
 0x511   : > { %1245 = vmatpush3.msk.msra.mxu0 %vm94_vm3, %v1693_v13  ;;  %1253 = vmatprep.mubr.msk.f32.mxu1 %vm1532_vm1, %v1531_v63  ;;  %s900_s0 = scalar_lea.vmem [#allocation4], %s1193_s30  ;;  %vm705_vm2 = vcmp.lt.s32.totalorder %v704_v18, %v1628_v0  ;;  %s1535_s18 = smov 6   ;;  %vm707_vm4 = vcmp.lt.s32.totalorder %v706_v48, %v1628_v0 }
 0x512   : > { %1246 = vmatprep.mubr.msk.f32.mxu0 %vm1532_vm1, %v1531_v63  ;;  %1256 = vmatprep.subr.mxu0 %v1531_v63  ;;  %v1087_v49 = vsel %vm705_vm2, 1, %v1533_v44  ;;  %v1094_v51 = vsel %vm707_vm4, 1, %v1533_v44  ;;  %s1536_s11 = smov 12   ;;  %s698_s8 = sadd.s32 1, %s1516_s8  }
 0x513   : > { %903 = vrot.lane.b32.xlu0 %v1504_v58, %s1529_s9  ;;  %1280 = vmatprep.subr.bf16.mxu1 %v1528_v46  ;;  %p695_p1 = scmp.ge.s32.totalorder %s698_s8, 8  }
 0x514   : > { %v710_v21 = vld [vmem:[%s709_s10] sm:$0xf]  ;;  %1420 = vset.pattern.permute.xlu0 %v1533_v44  ;;  %1421 = vset.pattern.permute.xlu1 %v1533_v44  ;;  %s1537_s12 = smov (%p695_p1), 110   ;;  %s1538_s13 = smov (%p695_p1), 122   ;;  %vm1116_vm8 = vcmask (%p695_p1), 146432   ;;  %vm1118_vm9 = vcmask (%p695_p1), 191488  }
 0x515   : > { %1254 = vmatmul.mubr.msk.f32.vlgmr.msra.gmra.mrb[0].mxu1 %vm790_vm0, %v710_v21  ;;  %v901_v24 = vld [vmem:[%s900_s0] sm:$0xf]  ;;  %s1539_s14 = smov (%p695_p1), 116  }
 0x516   : > { %1265 = vmatprep.mubr.msk.f32.mxu1 %vm1532_vm1, %v1531_v63  ;;  %1283 = vmatpush3.bf16.msk.msra.mxu1 %vm1921_vm15, %v1281_v22 }
 0x519   : > { %1266 = vmatmul.mubr.msk.f32.vlgmr.msra.gmra.mrb[2].mxu1 %vm790_vm0, %v901_v24 }
 0x581   : > { %v713_v25 = vpop.permute.xlu0 %712 }
 0x582   : > { %1247 = vmatmul.mubr.msk.f32.vlgmr.msra.gmra.mrb[0].mxu0 %vm91_vm6, %v713_v25 }
 0x583   : > { %1257 = vmatpush3.msk.msra.mxu0 %vm94_vm3, %v1698_v14  ;;  %1258 = vmatprep.mubr.msk.f32.mxu0 %vm1532_vm1, %v1531_v63 }
 0x585   : > { %v904_v26 = vpop.permute.xlu0 %903 }
 0x586   : > { %1259 = vmatmul.mubr.msk.f32.vlgmr.msra.gmra.mrb[2].mxu0 %vm91_vm6, %v904_v26 }
 0x5e8   : > { %v864_v27 = vpop.f32.mrb[0].mxu1 }
 0x5e9   : > { %v1255_v28 = vpop.f32.mrb[1].mxu1 }
 0x5ec   : > { %v1052_v32 = vpop.f32.mrb[2].mxu1 }
 0x5ed   : > { %v1267_v34 = vpop.f32.mrb[3].mxu1 }
 0x655   : > { %v786_v35 = vpop.f32.mrb[0].mxu0 }
 0x656   : > { %v865_v20 = vadd.f32 %v864_v27, %v786_v35  ;;  %v1248_v36 = vpop.f32.mrb[1].mxu0 }
 0x658   : > { %v874_v37 = vadd.f32 %v1703_v15, %v865_v20 }
 0x659   : > { %v976_v38 = vpop.f32.mrb[2].mxu0 }
 0x65a   : > { %1422 = vtanh.f32 %v874_v37  ;;  %v1053_v41 = vadd.f32 %v1052_v32, %v976_v38  ;;  %v1260_v42 = vpop.f32.mrb[3].mxu0  ;;  %v1192_v3 = vmul.f32 -1.442695, %v874_v37 }
 0x65c   : > { %v1062_v43 = vadd.f32 %v1708_v16, %v1053_v41 }
 0x65e   : > { %1424 = vtanh.f32 %v1062_v43  ;;  %v1199_v23 = vmul.f32 -1.442695, %v1062_v43 }
 0x65f   : > { %1426 = vpow2.f32 %v1192_v3 }
 0x660   : > { %1428 = vpow2.f32 %v1199_v23 }
 0x664   : > { %v1423_v1 = vpop.eup %1422 }
 0x665   : > { %884 = vrot.lane.b32.xlu1 %v1423_v1, %s1534_s17 }
 0x668   : > { %v1425_v2 = vpop.eup %1424 }
 0x669   : > { %1072 = vrot.lane.b32.xlu1 %v1425_v2, %s1534_s17  ;;  %v1427_v4 = vpop.eup %1426 }
 0x66a   : > { %v878_v7 = vadd.f32 1.0, %v1427_v4  ;;  %v1429_v8 = vpop.eup %1428 }
 0x66b   : > { %v1066_v17 = vadd.f32 1.0, %v1429_v8 }
 0x66c   : > { %1430 = vrcp.f32 %v878_v7 }
 0x66d   : > { %1432 = vrcp.f32 %v1066_v17 }
 0x676   : > { %v1431_v19 = vpop.eup %1430 }
 0x677   : > { %v1433_v29 = vpop.eup %1432  ;;  %v882_v52 = vmul.f32 %v1508_v59, %v1431_v19 }
 0x678   : > { %v1070_v40 = vmul.f32 %v1500_v6, %v1433_v29 }
 0x6d7   : > { %v885_v45 = vpop.permute.xlu1 %884 }
 0x6d8   : > { %v887_v47 = vmul.f32 %v1431_v19, %v885_v45 }
 0x6da   : > { %889 = vrot.lane.b32.xlu0 %v887_v47, %s1535_s18 }
 0x6db   : > { %v1073_v31 = vpop.permute.xlu1 %1072 }
 0x6dc   : > { %v1075_v50 = vmul.f32 %v1433_v29, %v1073_v31 }
 0x6de   : > { %1089 = vperm.xlu0 %1420, %v1087_v49   ;;  %1077 = vrot.lane.b32.xlu1 %v1075_v50, %s1535_s18 }
 0x6e2   : > { %1096 = vperm.xlu1 %1421, %v1094_v51  }
 0x74c   : > { %v890_v39 = vpop.permute.xlu0 %889 }
 0x74d   : > { %v892_v53 = vadd.f32 %v890_v39, %v882_v52 }
 0x74f   : > { %1434 = vtanh.f32 %v892_v53 }
 0x750   : > { %v1078_v54 = vpop.permute.xlu1 %1077 }
 0x751   : > { %v1080_v55 = vadd.f32 %v1078_v54, %v1070_v40 }
 0x753   : > { %1436 = vtanh.f32 %v1080_v55 }
 0x759   : > { %v1435_v56 = vpop.eup %1434 }
 0x75a   : > { %895 = vrot.lane.b32.xlu1 %v1435_v56, %s1536_s11 }
 0x75d   : > { %v1437_v57 = vpop.eup %1436  ;;  %v1090_v5 = vpop.permute.xlu0 %1089 }
 0x75e   : > { %vm1091_vm5 = vcmp.eq.s32.totalorder %v1090_v5, 1  ;;  %1083 = vrot.lane.b32.xlu0 %v1437_v57, %s1536_s11 }
 0x75f   : > { %v1093_v59 = vsel %vm1091_vm5, %v892_v53, %v1508_v59  }
 0x761   : > { %v1097_v46 = vpop.permute.xlu1 %1096 }
 0x762   : > { %vm1098_vm7 = vcmp.eq.s32.totalorder %v1097_v46, 1  ;;  %1102 = vrot.lane.b32.xlu0 (%p695_p1), %v2000_v30, %s1537_s12 }
 0x763   : > { %v1100_v6 = vsel %vm1098_vm7, %v1080_v55, %v1500_v6  }
 0x766   :  { %1106 = vrot.lane.b32.xlu0 (%p695_p1), %v2001_v33, %s1539_s14 }
 0x7cc   : > { %v896_v61 = vpop.permute.xlu1 %895 }
 0x7cd   : > { %v898_v62 = vmul.f32 %v1431_v19, %v896_v61 }
 0x7ce   :  { %697 = sbr.rel (!%p695_p1) target bundleno = 1294 (0x50e), region = 115 }
 0x7cf   : > { %v1092_v63 = vsel %vm1091_vm5, %v898_v62, %v1512_v60  }
 0x7d0   : > { %v1084_v21 = vpop.permute.xlu0 %1083  ;;  %v2007_v60 = vmov %v1092_v63  ;;  %1110 = vrot.lane.b32.xlu1 (%p695_p1), %v1092_v63, %s1538_s13 }
 0x7d1   : > { %v1086_v22 = vmul.f32 %v1433_v29, %v1084_v21 }
 0x7d3   : > { %v1099_v24 = vsel %vm1098_vm7, %v1086_v22, %v1504_v58  }
 0x7d4   : > { %v2006_v58 = vmov %v1099_v24  ;;  %v1103_v60 = vpop.permute.xlu0 (%p695_p1), %1102 }
 0x7d8   :  { %v1107_v26 = vpop.permute.xlu0 %1106 }
 0x7d9   :  { %v1113_v27 = vsel %vm91_vm6, %v1103_v60, %v1107_v26 }
 0x842   :  { %v1111_v25 = vpop.permute.xlu1 %1110 }
 0x843   :  { %v1115_v28 = vsel %vm790_vm0, %v1113_v27, %v1111_v25 }
 0x844   :  { %v1117_v32 = vsel %vm1116_vm8, %v1115_v28, %v1099_v24 }
 0x845   :  { %1119 = vst.msk [vmem:[%s1989_s16] sm:$0xf] %vm1118_vm9, %v1117_v32 }

</bundles_post_ra>
